<compile_context>
chip_gen: v7x
topology: tpu7x:2x2x1
jax: 0.10.0
libtpu: 0.0.40
codegen_flags: <defaults>
</compile_context>

<pallas_src>
import functools

import jax
import jax.numpy as jnp
from jax.experimental import pallas as pl
from jax.experimental.pallas import tpu as pltpu


# --------------------------------------------------------------------------
# Kernel 1: per-point MLP (1x1 convs, BN folded) + running max-pool.
# --------------------------------------------------------------------------
def conv_pool_kernel(x_ref, w1_ref, b1_ref, w2_ref, b2_ref, w3_ref, out_ref):
    """One (batch, point-tile) grid step.

    x_ref   : (k, TN)    f32  -- NCL point tile of one batch element
    w*_ref  : (Cout,Cin) bf16 (BN folded);  b*_ref : (Cout, 1) f32
    out_ref : (1024, 1)  f32  -- running per-batch max of the *raw* layer-3
              matmul output (bias + ReLU hoisted past the pool; applied in the
              head kernel).  Resident across the point-tile (arbitrary) axis.
    """
    n = pl.program_id(1)

    # Reset the running-max accumulator at the first point tile of each batch
    # element.  Raw (pre-bias) matmul outputs can be negative -> init to -inf.
    @pl.when(n == 0)
    def _init():
        out_ref[...] = jnp.full(out_ref.shape, -jnp.inf, dtype=out_ref.dtype)

    # Channels-first matmul chain: points in lanes, channels in sublanes.
    x = x_ref[...].astype(jnp.bfloat16)                            # (k, TN)
    h = jnp.dot(w1_ref[...], x, preferred_element_type=jnp.float32)
    h = jnp.maximum(h + b1_ref[...], 0.0)                          # (64, TN)
    h = jnp.dot(w2_ref[...], h.astype(jnp.bfloat16),
                preferred_element_type=jnp.float32)
    h = jnp.maximum(h + b2_ref[...], 0.0)                          # (128, TN)
    h = jnp.dot(w3_ref[...], h.astype(jnp.bfloat16),
                preferred_element_type=jnp.float32)                # (1024, TN)

    # Running global max-pool over points (torch.max(x, dim=2)); the layer-3
    # bias + ReLU are applied later on the pooled vector (monotone hoist).
    tile_max = jnp.max(h, axis=-1, keepdims=True)                  # (1024, 1)
    out_ref[...] = jnp.maximum(out_ref[...], tile_max)


# --------------------------------------------------------------------------
# Kernel 2: FC head over pooled features (runs once, M = B).
# --------------------------------------------------------------------------
def head_kernel(p_ref, b3_ref, fw1_ref, fb1_ref, fw2_ref, fb2_ref,
                fw3_ref, fb3_ref, out_ref):
    """p_ref : (B, 1024) f32 raw pooled maxima.  b3/ReLU applied here
    (hoisted past the max-pool); fb3 already contains the identity matrix."""
    g = jnp.maximum(p_ref[...] + b3_ref[...], 0.0)
    g = jnp.maximum(
        jnp.dot(g.astype(jnp.bfloat16), fw1_ref[...],
                preferred_element_type=jnp.float32) + fb1_ref[...], 0.0)
    g = jnp.maximum(
        jnp.dot(g.astype(jnp.bfloat16), fw2_ref[...],
                preferred_element_type=jnp.float32) + fb2_ref[...], 0.0)
    out_ref[...] = (jnp.dot(g.astype(jnp.bfloat16), fw3_ref[...],
                            preferred_element_type=jnp.float32) + fb3_ref[...])


# --------------------------------------------------------------------------
# Plain-JAX glue: BN folding, parameters, tiling choices, wrappers
# --------------------------------------------------------------------------
def fold_bn(w, b, gamma, beta, mean, var, eps=1e-5):
    """Fold eval-mode BatchNorm1d into a preceding (in, out) weight / bias."""
    s = gamma / jnp.sqrt(var + eps)
    return w * s[None, :], (b - mean) * s + beta


def make_params(key, k):
    """Deterministic synthetic parameters with the PyTorch module's shapes."""
    dims = [
        ('c1', k, 64), ('c2', 64, 128), ('c3', 128, 1024),        # 1x1 convs
        ('f1', 1024, 512), ('f2', 512, 256), ('f3', 256, k * k),  # fc layers
    ]
    params = {}
    for name, cin, cout in dims:
        key, kw, kb = jax.random.split(key, 3)
        params[name + '_w'] = 0.05 * jax.random.normal(kw, (cin, cout), jnp.float32)
        params[name + '_b'] = 0.05 * jax.random.normal(kb, (cout,), jnp.float32)
    # BatchNorm params (eval-mode running stats) for bn1..bn5
    for name, c in [('bn1', 64), ('bn2', 128), ('bn3', 1024),
                    ('bn4', 512), ('bn5', 256)]:
        key, kg, kb, km, kv = jax.random.split(key, 5)
        params[name + '_gamma'] = 1.0 + 0.1 * jax.random.normal(kg, (c,), jnp.float32)
        params[name + '_beta'] = 0.1 * jax.random.normal(kb, (c,), jnp.float32)
        params[name + '_mean'] = 0.1 * jax.random.normal(km, (c,), jnp.float32)
        params[name + '_var'] = jax.random.uniform(kv, (c,), jnp.float32, 0.5, 1.5)
    return params


def _folded_params(params):
    w1, b1 = fold_bn(params['c1_w'], params['c1_b'], params['bn1_gamma'],
                     params['bn1_beta'], params['bn1_mean'], params['bn1_var'])
    w2, b2 = fold_bn(params['c2_w'], params['c2_b'], params['bn2_gamma'],
                     params['bn2_beta'], params['bn2_mean'], params['bn2_var'])
    w3, b3 = fold_bn(params['c3_w'], params['c3_b'], params['bn3_gamma'],
                     params['bn3_beta'], params['bn3_mean'], params['bn3_var'])
    fw1, fb1 = fold_bn(params['f1_w'], params['f1_b'], params['bn4_gamma'],
                       params['bn4_beta'], params['bn4_mean'], params['bn4_var'])
    fw2, fb2 = fold_bn(params['f2_w'], params['f2_b'], params['bn5_gamma'],
                       params['bn5_beta'], params['bn5_mean'], params['bn5_var'])
    fw3, fb3 = params['f3_w'], params['f3_b']
    return (w1, b1), (w2, b2), (w3, b3), (fw1, fb1), (fw2, fb2), (fw3, fb3)


def _prep_kernel_params(params, k):
    (w1, b1), (w2, b2), (w3, b3), (fw1, fb1), (fw2, fb2), (fw3, fb3) = \
        _folded_params(params)
    bf = lambda w: w.astype(jnp.bfloat16)
    col = lambda b: b.reshape(-1, 1).astype(jnp.float32)
    row = lambda b: b.reshape(1, -1).astype(jnp.float32)
    # Conv weights transposed to (C_out, C_in) for channels-first matmuls
    # (tiny one-time XLA transposes, weights only).
    conv_args = (bf(w1.T), col(b1), bf(w2.T), col(b2), bf(w3.T))
    # Layer-3 bias (+ ReLU) is applied in the head; identity folded into fc3.
    fb3_iden = fb3 + jnp.eye(k, dtype=jnp.float32).reshape(k * k)
    head_args = (row(b3), bf(fw1), row(fb1), bf(fw2), row(fb2),
                 bf(fw3), row(fb3_iden))
    return conv_args, head_args


def _vmem_capacity_bytes():
    try:
        return int(pltpu.get_tpu_info().vmem_capacity_bytes)
    except Exception:
        return 64 << 20    # conservative (v7x-sized) fallback


def _pick_point_tile(n_points, target):
    """Largest divisor of n_points that is <= target and a multiple of 128
    (the point axis sits in lanes); fall back to the full extent."""
    if n_points <= target:
        return n_points
    t = (min(target, n_points) // 128) * 128
    while t >= 128:
        if n_points % t == 0:
            return t
        t -= 128
    return n_points


def stnkd_forward(x_ncl, params, k, point_tile=None):
    """x_ncl: (B, k, N) like PyTorch Conv1d input.  Returns (B, k, k)."""
    B, _, N = x_ncl.shape
    x = x_ncl.astype(jnp.float32)            # consumed directly in NCL layout

    conv_args, head_args = _prep_kernel_params(params, k)

    # Generation-aware tiling: the dominant per-step temp is the (1024, TN)
    # f32 layer-3 output (4 KiB per point).
    vmem_cap = _vmem_capacity_bytes()
    if vmem_cap >= (100 << 20):              # v5e / v6e: 128 MiB VMEM
        tile_target, vmem_limit = 4096, 96 << 20
    else:                                    # v7x (64 MiB) or unknown
        tile_target, vmem_limit = 2048, 40 << 20
    TN = _pick_point_tile(N, point_tile if point_tile is not None else tile_target)
    grid = (B, N // TN)

    def const_spec(a):
        zeros = (0,) * a.ndim
        return pl.BlockSpec(a.shape, lambda b, n: zeros)

    x_spec = pl.BlockSpec((None, k, TN), lambda b, n: (b, 0, n))
    in_specs = [x_spec] + [const_spec(a) for a in conv_args]
    # (1024, 1) resident accumulator block per batch element.
    out_spec = pl.BlockSpec((None, 1024, 1), lambda b, n: (b, 0, 0))

    mlp_flops = 2 * B * N * (k * 64 + 64 * 128 + 128 * 1024)
    mlp_bytes = (4 * B * k * N
                 + 2 * (k * 64 + 64 * 128 + 128 * 1024)
                 + 4 * B * 1024)

    pooled = pl.pallas_call(
        conv_pool_kernel,
        out_shape=jax.ShapeDtypeStruct((B, 1024, 1), jnp.float32),
        grid_spec=pltpu.PrefetchScalarGridSpec(
            num_scalar_prefetch=0,
            grid=grid,
            in_specs=in_specs,
            out_specs=out_spec),
        compiler_params=pltpu.CompilerParams(
            dimension_semantics=("parallel", "arbitrary"),
            vmem_limit_bytes=vmem_limit),
        cost_estimate=pl.CostEstimate(flops=mlp_flops, transcendentals=0,
                                      bytes_accessed=mlp_bytes),
    )(x, *conv_args)

    pooled2d = pooled.reshape(B, 1024)       # tiny (B x 4 KiB) relayout in XLA

    def full_spec(a):
        zeros = (0,) * a.ndim
        return pl.BlockSpec(a.shape, lambda i: zeros)

    out = pl.pallas_call(
        head_kernel,
        out_shape=jax.ShapeDtypeStruct((B, k * k), jnp.float32),
        grid_spec=pltpu.PrefetchScalarGridSpec(
            num_scalar_prefetch=0,
            grid=(1,),
            in_specs=[full_spec(pooled2d)] + [full_spec(a) for a in head_args],
            out_specs=pl.BlockSpec((B, k * k), lambda i: (0, 0))),
        compiler_params=pltpu.CompilerParams(
            dimension_semantics=("arbitrary",)),
    )(pooled2d, *head_args)

    return out.reshape(B, k, k)


def stnkd_reference(x_ncl, params, k):
    """Pure-JAX reference with the same bf16-operand / f32-accum recipe."""
    (w1, b1), (w2, b2), (w3, b3), (fw1, fb1), (fw2, fb2), (fw3, fb3) = \
        _folded_params(params)
    B, _, N = x_ncl.shape
    xb = jnp.transpose(x_ncl, (0, 2, 1)).reshape(B * N, k)

    def mm(a, w):
        return jnp.dot(a.astype(jnp.bfloat16), w.astype(jnp.bfloat16),
                       preferred_element_type=jnp.float32)

    h = jnp.maximum(mm(xb, w1) + b1, 0.0)
    h = jnp.maximum(mm(h, w2) + b2, 0.0)
    h = jnp.maximum(mm(h, w3) + b3, 0.0)
    g = jnp.max(h.reshape(B, N, 1024), axis=1)
    g = jnp.maximum(mm(g, fw1) + fb1, 0.0)
    g = jnp.maximum(mm(g, fw2) + fb2, 0.0)
    g = mm(g, fw3) + fb3 + jnp.eye(k, dtype=jnp.float32).reshape(1, k * k)
    return g.reshape(B, k, k)


if __name__ == "__main__":
    # Small demo shapes: batch=2, feature-dim k=16, 256 points.
    B, K, N = 2, 16, 256
    key = jax.random.PRNGKey(0)
    key_x, key_p = jax.random.split(key)
    x = jax.random.normal(key_x, (B, K, N), jnp.float32)   # NCL like PyTorch
    params = make_params(key_p, K)

    # point_tile=128 so the demo exercises the multi-tile running-max path.
    fwd = jax.jit(functools.partial(stnkd_forward, k=K, point_tile=128))
    out = fwd(x, params)
    jax.block_until_ready(out)

    assert out.shape == (B, K, K) and out.dtype == jnp.float32
    ref = stnkd_reference(x, params, K)
    max_err = float(jnp.max(jnp.abs(out - ref)))
    assert jnp.allclose(out, ref, atol=2e-2, rtol=2e-2), max_err
    print("KERNEL_OK")
</pallas_src>

<mosaic_0001>
module attributes {stable_mosaic.version = 11 : i64} {
  func.func @conv_pool_kernel(%arg0: i32, %arg1: i32, %arg2: memref<1x16x128xf32, #tpu.memory_space<vmem>>, %arg3: memref<64x16xbf16, #tpu.memory_space<vmem>>, %arg4: memref<64x1xf32, #tpu.memory_space<vmem>>, %arg5: memref<128x64xbf16, #tpu.memory_space<vmem>>, %arg6: memref<128x1xf32, #tpu.memory_space<vmem>>, %arg7: memref<1024x128xbf16, #tpu.memory_space<vmem>>, %arg8: memref<1x1024x1xf32, #tpu.memory_space<vmem>>) attributes {dimension_semantics = [#tpu.dimension_semantics<parallel>, #tpu.dimension_semantics<arbitrary>], iteration_bounds = array<i64: 2, 2>, scalar_prefetch = 0 : i64, scratch_operands = 0 : i64, tpu.core_type = #tpu.core_type<tc>, window_params = [{transform_indices = @transform_0, window_bounds = array<i64: 1, 16, 128>}, {pipeline_mode = #tpu.pipeline_mode<synchronous>, transform_indices = @transform_1, window_bounds = array<i64: 64, 16>}, {pipeline_mode = #tpu.pipeline_mode<synchronous>, transform_indices = @transform_2, window_bounds = array<i64: 64, 1>}, {pipeline_mode = #tpu.pipeline_mode<synchronous>, transform_indices = @transform_3, window_bounds = array<i64: 128, 64>}, {pipeline_mode = #tpu.pipeline_mode<synchronous>, transform_indices = @transform_4, window_bounds = array<i64: 128, 1>}, {pipeline_mode = #tpu.pipeline_mode<synchronous>, transform_indices = @transform_5, window_bounds = array<i64: 1024, 128>}, {transform_indices = @transform_6, window_bounds = array<i64: 1, 1024, 1>}]} {
    %c0_i32 = arith.constant 0 : i32
    %0 = arith.cmpi eq, %arg1, %c0_i32 : i32
    %1 = arith.extui %0 : i1 to i32
    %c0_i32_0 = arith.constant 0 : i32
    %2 = arith.cmpi ne, %1, %c0_i32_0 : i32
    scf.if %2 {
      %cst_24 = arith.constant 0xFF800000 : f32
      %32 = vector.broadcast %cst_24 : f32 to vector<1024x1xf32>
      %c0_25 = arith.constant 0 : index
      %c0_26 = arith.constant 0 : index
      %c0_27 = arith.constant 0 : index
      %33 = vector.load %arg8[%c0_25, %c0_26, %c0_27] : memref<1x1024x1xf32, #tpu.memory_space<vmem>>, vector<1x1024x1xf32>
      %34 = vector.shape_cast %33 : vector<1x1024x1xf32> to vector<1024x1xf32>
      %35 = vector.shape_cast %32 : vector<1024x1xf32> to vector<1x1024x1xf32>
      tpu.vector_store %arg8[%c0_25, %c0_26, %c0_27], %35 {strides = array<i32>} : memref<1x1024x1xf32, #tpu.memory_space<vmem>>, vector<1x1024x1xf32>,
    } else {
    }
    %c0 = arith.constant 0 : index
    %c0_1 = arith.constant 0 : index
    %c0_2 = arith.constant 0 : index
    %3 = vector.load %arg2[%c0, %c0_1, %c0_2] : memref<1x16x128xf32, #tpu.memory_space<vmem>>, vector<1x16x128xf32>
    %4 = vector.shape_cast %3 : vector<1x16x128xf32> to vector<16x128xf32>
    %5 = arith.truncf %4 : vector<16x128xf32> to vector<16x128xbf16>
    %c0_3 = arith.constant 0 : index
    %c0_4 = arith.constant 0 : index
    %6 = vector.load %arg3[%c0_3, %c0_4] : memref<64x16xbf16, #tpu.memory_space<vmem>>, vector<64x16xbf16>
    %cst = arith.constant dense<0.000000e+00> : vector<64x128xf32>
    %7 = tpu.matmul %6, %5, %cst {dimension_numbers = #tpu.dot_dimension_numbers<[1], [0], [0], [1], [0, 0, 1, 1], [], []>} : vector<64x16xbf16>, vector<16x128xbf16>, vector<64x128xf32> -> vector<64x128xf32>
    %c0_5 = arith.constant 0 : index
    %c0_6 = arith.constant 0 : index
    %8 = vector.load %arg4[%c0_5, %c0_6] : memref<64x1xf32, #tpu.memory_space<vmem>>, vector<64x1xf32>
    %9 = vector.broadcast %8 : vector<64x1xf32> to vector<64x128xf32>
    %10 = arith.addf %7, %9 : vector<64x128xf32>
    %cst_7 = arith.constant 0.000000e+00 : f32
    %11 = vector.broadcast %cst_7 : f32 to vector<64x128xf32>
    %12 = arith.maximumf %10, %11 : vector<64x128xf32>
    %c0_8 = arith.constant 0 : index
    %c0_9 = arith.constant 0 : index
    %13 = vector.load %arg5[%c0_8, %c0_9] : memref<128x64xbf16, #tpu.memory_space<vmem>>, vector<128x64xbf16>
    %14 = arith.truncf %12 : vector<64x128xf32> to vector<64x128xbf16>
    %cst_10 = arith.constant dense<0.000000e+00> : vector<128x128xf32>
    %15 = tpu.matmul %13, %14, %cst_10 {dimension_numbers = #tpu.dot_dimension_numbers<[1], [0], [0], [1], [0, 0, 1, 1], [], []>} : vector<128x64xbf16>, vector<64x128xbf16>, vector<128x128xf32> -> vector<128x128xf32>
    %c0_11 = arith.constant 0 : index
    %c0_12 = arith.constant 0 : index
    %16 = vector.load %arg6[%c0_11, %c0_12] : memref<128x1xf32, #tpu.memory_space<vmem>>, vector<128x1xf32>
    %17 = vector.broadcast %16 : vector<128x1xf32> to vector<128x128xf32>
    %18 = arith.addf %15, %17 : vector<128x128xf32>
    %cst_13 = arith.constant 0.000000e+00 : f32
    %19 = vector.broadcast %cst_13 : f32 to vector<128x128xf32>
    %20 = arith.maximumf %18, %19 : vector<128x128xf32>
    %c0_14 = arith.constant 0 : index
    %c0_15 = arith.constant 0 : index
    %21 = vector.load %arg7[%c0_14, %c0_15] : memref<1024x128xbf16, #tpu.memory_space<vmem>>, vector<1024x128xbf16>
    %22 = arith.truncf %20 : vector<128x128xf32> to vector<128x128xbf16>
    %cst_16 = arith.constant dense<0.000000e+00> : vector<1024x128xf32>
    %23 = tpu.matmul %21, %22, %cst_16 {dimension_numbers = #tpu.dot_dimension_numbers<[1], [0], [0], [1], [0, 0, 1, 1], [], []>} : vector<1024x128xbf16>, vector<128x128xbf16>, vector<1024x128xf32> -> vector<1024x128xf32>
    %cst_17 = arith.constant dense<0xFF800000> : vector<1024xf32>
    %24 = vector.multi_reduction <maximumf>, %23, %cst_17 [1] : vector<1024x128xf32> to vector<1024xf32>
    %25 = vector.shape_cast %24 : vector<1024xf32> to vector<1024x1xf32>
    %c0_18 = arith.constant 0 : index
    %c0_19 = arith.constant 0 : index
    %c0_20 = arith.constant 0 : index
    %26 = vector.load %arg8[%c0_18, %c0_19, %c0_20] : memref<1x1024x1xf32, #tpu.memory_space<vmem>>, vector<1x1024x1xf32>
    %27 = vector.shape_cast %26 : vector<1x1024x1xf32> to vector<1024x1xf32>
    %28 = arith.maximumf %27, %25 : vector<1024x1xf32>
    %c0_21 = arith.constant 0 : index
    %c0_22 = arith.constant 0 : index
    %c0_23 = arith.constant 0 : index
    %29 = vector.load %arg8[%c0_21, %c0_22, %c0_23] : memref<1x1024x1xf32, #tpu.memory_space<vmem>>, vector<1x1024x1xf32>
    %30 = vector.shape_cast %29 : vector<1x1024x1xf32> to vector<1024x1xf32>
    %31 = vector.shape_cast %28 : vector<1024x1xf32> to vector<1x1024x1xf32>
    tpu.vector_store %arg8[%c0_21, %c0_22, %c0_23], %31 {strides = array<i32>} : memref<1x1024x1xf32, #tpu.memory_space<vmem>>, vector<1x1024x1xf32>,
    return
  }
  func.func @transform_0(%arg0: i32, %arg1: i32) -> (i32, i32, i32) {
    %c0_i32 = arith.constant 0 : i32
    %c0_i32_0 = arith.constant 0 : i32
    return %arg0, %c0_i32, %arg1 : i32, i32, i32
  }
  func.func @transform_1(%arg0: i32, %arg1: i32) -> (i32, i32) {
    %c0_i32 = arith.constant 0 : i32
    %c0_i32_0 = arith.constant 0 : i32
    %c0_i32_1 = arith.constant 0 : i32
    return %c0_i32, %c0_i32_0 : i32, i32
  }
  func.func @transform_2(%arg0: i32, %arg1: i32) -> (i32, i32) {
    %c0_i32 = arith.constant 0 : i32
    %c0_i32_0 = arith.constant 0 : i32
    %c0_i32_1 = arith.constant 0 : i32
    return %c0_i32, %c0_i32_0 : i32, i32
  }
  func.func @transform_3(%arg0: i32, %arg1: i32) -> (i32, i32) {
    %c0_i32 = arith.constant 0 : i32
    %c0_i32_0 = arith.constant 0 : i32
    %c0_i32_1 = arith.constant 0 : i32
    return %c0_i32, %c0_i32_0 : i32, i32
  }
  func.func @transform_4(%arg0: i32, %arg1: i32) -> (i32, i32) {
    %c0_i32 = arith.constant 0 : i32
    %c0_i32_0 = arith.constant 0 : i32
    %c0_i32_1 = arith.constant 0 : i32
    return %c0_i32, %c0_i32_0 : i32, i32
  }
  func.func @transform_5(%arg0: i32, %arg1: i32) -> (i32, i32) {
    %c0_i32 = arith.constant 0 : i32
    %c0_i32_0 = arith.constant 0 : i32
    %c0_i32_1 = arith.constant 0 : i32
    return %c0_i32, %c0_i32_0 : i32, i32
  }
  func.func @transform_6(%arg0: i32, %arg1: i32) -> (i32, i32, i32) {
    %c0_i32 = arith.constant 0 : i32
    %c0_i32_0 = arith.constant 0 : i32
    %c0_i32_1 = arith.constant 0 : i32
    return %arg0, %c0_i32, %c0_i32_0 : i32, i32, i32
  }
}

module attributes {stable_mosaic.version = 11 : i64} {
  func.func @head_kernel(%arg0: i32, %arg1: memref<2x1024xf32, #tpu.memory_space<vmem>>, %arg2: memref<1x1024xf32, #tpu.memory_space<vmem>>, %arg3: memref<1024x512xbf16, #tpu.memory_space<vmem>>, %arg4: memref<1x512xf32, #tpu.memory_space<vmem>>, %arg5: memref<512x256xbf16, #tpu.memory_space<vmem>>, %arg6: memref<1x256xf32, #tpu.memory_space<vmem>>, %arg7: memref<256x256xbf16, #tpu.memory_space<vmem>>, %arg8: memref<1x256xf32, #tpu.memory_space<vmem>>, %arg9: memref<2x256xf32, #tpu.memory_space<vmem>>) attributes {dimension_semantics = [#tpu.dimension_semantics<arbitrary>], iteration_bounds = array<i64: 1>, scalar_prefetch = 0 : i64, scratch_operands = 0 : i64, tpu.core_type = #tpu.core_type<tc>, window_params = [{pipeline_mode = #tpu.pipeline_mode<synchronous>, transform_indices = @transform_0, window_bounds = array<i64: 2, 1024>}, {pipeline_mode = #tpu.pipeline_mode<synchronous>, transform_indices = @transform_1, window_bounds = array<i64: 1, 1024>}, {pipeline_mode = #tpu.pipeline_mode<synchronous>, transform_indices = @transform_2, window_bounds = array<i64: 1024, 512>}, {pipeline_mode = #tpu.pipeline_mode<synchronous>, transform_indices = @transform_3, window_bounds = array<i64: 1, 512>}, {pipeline_mode = #tpu.pipeline_mode<synchronous>, transform_indices = @transform_4, window_bounds = array<i64: 512, 256>}, {pipeline_mode = #tpu.pipeline_mode<synchronous>, transform_indices = @transform_5, window_bounds = array<i64: 1, 256>}, {pipeline_mode = #tpu.pipeline_mode<synchronous>, transform_indices = @transform_6, window_bounds = array<i64: 256, 256>}, {pipeline_mode = #tpu.pipeline_mode<synchronous>, transform_indices = @transform_7, window_bounds = array<i64: 1, 256>}, {pipeline_mode = #tpu.pipeline_mode<synchronous>, transform_indices = @transform_8, window_bounds = array<i64: 2, 256>}]} {
    %c0 = arith.constant 0 : index
    %c0_0 = arith.constant 0 : index
    %0 = vector.load %arg1[%c0, %c0_0] : memref<2x1024xf32, #tpu.memory_space<vmem>>, vector<2x1024xf32>
    %c0_1 = arith.constant 0 : index
    %c0_2 = arith.constant 0 : index
    %1 = vector.load %arg2[%c0_1, %c0_2] : memref<1x1024xf32, #tpu.memory_space<vmem>>, vector<1x1024xf32>
    %2 = vector.broadcast %1 : vector<1x1024xf32> to vector<2x1024xf32>
    %3 = arith.addf %0, %2 : vector<2x1024xf32>
    %cst = arith.constant 0.000000e+00 : f32
    %4 = vector.broadcast %cst : f32 to vector<2x1024xf32>
    %5 = arith.maximumf %3, %4 : vector<2x1024xf32>
    %6 = arith.truncf %5 : vector<2x1024xf32> to vector<2x1024xbf16>
    %c0_3 = arith.constant 0 : index
    %c0_4 = arith.constant 0 : index
    %7 = vector.load %arg3[%c0_3, %c0_4] : memref<1024x512xbf16, #tpu.memory_space<vmem>>, vector<1024x512xbf16>
    %cst_5 = arith.constant dense<0.000000e+00> : vector<2x512xf32>
    %8 = tpu.matmul %6, %7, %cst_5 {dimension_numbers = #tpu.dot_dimension_numbers<[1], [0], [0], [1], [0, 0, 1, 1], [], []>} : vector<2x1024xbf16>, vector<1024x512xbf16>, vector<2x512xf32> -> vector<2x512xf32>
    %c0_6 = arith.constant 0 : index
    %c0_7 = arith.constant 0 : index
    %9 = vector.load %arg4[%c0_6, %c0_7] : memref<1x512xf32, #tpu.memory_space<vmem>>, vector<1x512xf32>
    %10 = vector.broadcast %9 : vector<1x512xf32> to vector<2x512xf32>
    %11 = arith.addf %8, %10 : vector<2x512xf32>
    %cst_8 = arith.constant 0.000000e+00 : f32
    %12 = vector.broadcast %cst_8 : f32 to vector<2x512xf32>
    %13 = arith.maximumf %11, %12 : vector<2x512xf32>
    %14 = arith.truncf %13 : vector<2x512xf32> to vector<2x512xbf16>
    %c0_9 = arith.constant 0 : index
    %c0_10 = arith.constant 0 : index
    %15 = vector.load %arg5[%c0_9, %c0_10] : memref<512x256xbf16, #tpu.memory_space<vmem>>, vector<512x256xbf16>
    %cst_11 = arith.constant dense<0.000000e+00> : vector<2x256xf32>
    %16 = tpu.matmul %14, %15, %cst_11 {dimension_numbers = #tpu.dot_dimension_numbers<[1], [0], [0], [1], [0, 0, 1, 1], [], []>} : vector<2x512xbf16>, vector<512x256xbf16>, vector<2x256xf32> -> vector<2x256xf32>
    %c0_12 = arith.constant 0 : index
    %c0_13 = arith.constant 0 : index
    %17 = vector.load %arg6[%c0_12, %c0_13] : memref<1x256xf32, #tpu.memory_space<vmem>>, vector<1x256xf32>
    %18 = vector.broadcast %17 : vector<1x256xf32> to vector<2x256xf32>
    %19 = arith.addf %16, %18 : vector<2x256xf32>
    %cst_14 = arith.constant 0.000000e+00 : f32
    %20 = vector.broadcast %cst_14 : f32 to vector<2x256xf32>
    %21 = arith.maximumf %19, %20 : vector<2x256xf32>
    %22 = arith.truncf %21 : vector<2x256xf32> to vector<2x256xbf16>
    %c0_15 = arith.constant 0 : index
    %c0_16 = arith.constant 0 : index
    %23 = vector.load %arg7[%c0_15, %c0_16] : memref<256x256xbf16, #tpu.memory_space<vmem>>, vector<256x256xbf16>
    %cst_17 = arith.constant dense<0.000000e+00> : vector<2x256xf32>
    %24 = tpu.matmul %22, %23, %cst_17 {dimension_numbers = #tpu.dot_dimension_numbers<[1], [0], [0], [1], [0, 0, 1, 1], [], []>} : vector<2x256xbf16>, vector<256x256xbf16>, vector<2x256xf32> -> vector<2x256xf32>
    %c0_18 = arith.constant 0 : index
    %c0_19 = arith.constant 0 : index
    %25 = vector.load %arg8[%c0_18, %c0_19] : memref<1x256xf32, #tpu.memory_space<vmem>>, vector<1x256xf32>
    %26 = vector.broadcast %25 : vector<1x256xf32> to vector<2x256xf32>
    %27 = arith.addf %24, %26 : vector<2x256xf32>
    %c0_20 = arith.constant 0 : index
    %c0_21 = arith.constant 0 : index
    %28 = vector.load %arg9[%c0_20, %c0_21] : memref<2x256xf32, #tpu.memory_space<vmem>>, vector<2x256xf32>
    tpu.vector_store %arg9[%c0_20, %c0_21], %27 {strides = array<i32>} : memref<2x256xf32, #tpu.memory_space<vmem>>, vector<2x256xf32>,
    return
  }
  func.func @transform_0(%arg0: i32) -> (i32, i32) {
    %c0_i32 = arith.constant 0 : i32
    %c0_i32_0 = arith.constant 0 : i32
    %c0_i32_1 = arith.constant 0 : i32
    return %c0_i32, %c0_i32_0 : i32, i32
  }
  func.func @transform_1(%arg0: i32) -> (i32, i32) {
    %c0_i32 = arith.constant 0 : i32
    %c0_i32_0 = arith.constant 0 : i32
    %c0_i32_1 = arith.constant 0 : i32
    return %c0_i32, %c0_i32_0 : i32, i32
  }
  func.func @transform_2(%arg0: i32) -> (i32, i32) {
    %c0_i32 = arith.constant 0 : i32
    %c0_i32_0 = arith.constant 0 : i32
    %c0_i32_1 = arith.constant 0 : i32
    return %c0_i32, %c0_i32_0 : i32, i32
  }
  func.func @transform_3(%arg0: i32) -> (i32, i32) {
    %c0_i32 = arith.constant 0 : i32
    %c0_i32_0 = arith.constant 0 : i32
    %c0_i32_1 = arith.constant 0 : i32
    return %c0_i32, %c0_i32_0 : i32, i32
  }
  func.func @transform_4(%arg0: i32) -> (i32, i32) {
    %c0_i32 = arith.constant 0 : i32
    %c0_i32_0 = arith.constant 0 : i32
    %c0_i32_1 = arith.constant 0 : i32
    return %c0_i32, %c0_i32_0 : i32, i32
  }
  func.func @transform_5(%arg0: i32) -> (i32, i32) {
    %c0_i32 = arith.constant 0 : i32
    %c0_i32_0 = arith.constant 0 : i32
    %c0_i32_1 = arith.constant 0 : i32
    return %c0_i32, %c0_i32_0 : i32, i32
  }
  func.func @transform_6(%arg0: i32) -> (i32, i32) {
    %c0_i32 = arith.constant 0 : i32
    %c0_i32_0 = arith.constant 0 : i32
    %c0_i32_1 = arith.constant 0 : i32
    return %c0_i32, %c0_i32_0 : i32, i32
  }
  func.func @transform_7(%arg0: i32) -> (i32, i32) {
    %c0_i32 = arith.constant 0 : i32
    %c0_i32_0 = arith.constant 0 : i32
    %c0_i32_1 = arith.constant 0 : i32
    return %c0_i32, %c0_i32_0 : i32, i32
  }
  func.func @transform_8(%arg0: i32) -> (i32, i32) {
    %c0_i32 = arith.constant 0 : i32
    %c0_i32_0 = arith.constant 0 : i32
    %c0_i32_1 = arith.constant 0 : i32
    return %c0_i32, %c0_i32_0 : i32, i32
  }
}

</mosaic_0001>

<bundles_post_ra>
// kernel: stnkd_forward.2
= control target key start
LH: loop header
LB: loop body
LE: loop exit
PB: predicated region body
PF: predicated region fallthrough
CT: control target
= control target key end

     0   :  { %s3294_s21 = smov 0   ;;  %s3296_s22 = smov 0   ;;  %s4734_s0 = inlined_call_operand.vmem [shape: f32[2,16,256], index: 0, kind: input, shape index: {}]   ;;  %s4735_s1 = inlined_call_operand.vmem [shape: bf16[64,16], index: 1, kind: input, shape index: {}]   ;;  %s4736_s2 = inlined_call_operand.vmem [shape: f32[64,1], index: 2, kind: input, shape index: {}]   ;;  %s4737_s3 = inlined_call_operand.vmem [shape: bf16[128,64], index: 3, kind: input, shape index: {}]   ;;  %s4738_s4 = inlined_call_operand.vmem [shape: f32[128,1], index: 4, kind: input, shape index: {}]   ;;  %s4739_s5 = inlined_call_operand.vmem [shape: bf16[1024,128], index: 5, kind: input, shape index: {}]   ;;  %s4740_s6 = inlined_call_operand.vmem [shape: f32[2,1024,1], index: 6, kind: output, shape index: {}]  }
   0x1   :  { %s3298_s23 = smov 0   ;;  %s3300_s24 = smov 0  }
   0x2   :  { %s3302_s25 = smov 0   ;;  %s3304_s26 = smov 0  }
   0x3   :  { %s3306_s27 = smov 0  }
   0x4 LB: > { %s25_s28 = sadd.s32 1, %s3247_s25  ;;  %s28_s29 = sadd.s32 1, %s3251_s26  ;;  %s3255_s27 = sphi %s3306_s27, %s16_s27   ;;  %s3251_s26 = sphi %s3304_s26, %s4754_s26   ;;  %s3247_s25 = sphi %s3302_s25, %s4753_s25   ;;  %s3243_s24 = sphi %s3300_s24, %s4752_s24   ;;  %s3239_s23 = sphi %s3298_s23, %s4751_s23   ;;  %s3235_s22 = sphi %s3296_s22, %s4750_s22   ;;  %s3231_s21 = sphi %s3294_s21, %s4749_s21  }
   0x5   : > { %p26_p0 = scmp.ge.s32.totalorder %s25_s28, 2  ;;  %p44_p1 = scmp.ne.s32.totalorder %s3235_s22, %s3231_s21 }
   0x6   : > { %p45_p2 = scmp.eq.s32.totalorder %s3255_s27, 0  ;;  %s37_s9 = sadd.s32 1, %s3235_s22 }
   0x7   : > { %s4756_s28 = smov (%p26_p0, %s25_s28), 0  ;;  %s4758_s29 = smov (!%p26_p0, %s28_s29), %s3251_s26 }
   0x8   : > { %p46_p3 = por %p45_p2, %p44_p1  ;;  %p30_p4 = scmp.ge.s32.totalorder %s4758_s29, 2 }
   0x9   : > { %s33_s30 = ssub.s32 %s3247_s25, %s4756_s28  ;;  %p2682_p6 = scmp.ge.s32.totalorder %s3255_s27, 4 }
   0xa   : > { %s4760_s29 = smov (%p30_p4, %s4758_s29), 0 }
   0xb   : > { %s32_s7 = ssub.s32 %s3251_s26, %s4760_s29  ;;  %216 = sbr.rel (%p2682_p6) target bundleno = 25 (0x19), region = 36 }
   0xc   : > { %s34_s8 = sor.u32 %s33_s30, %s32_s7 }
   0xd   : > { %p35_p5 = scmp.eq.s32.totalorder %s34_s8, 0 }
   0xf   : > { %s3345_s10 = scalar_select %p35_p5, %s3235_s22, %s37_s9  }
  0x12   : > { %219 = sbr.rel (!%p46_p3) target bundleno = 25 (0x19), region = 40  ;;  %s221_s11 = sand.u32 (%p46_p3), 1, %s3235_s22  }
  0x13   : > { %s2684_s12 = sshll.u32 (%p46_p3), %s3251_s26, 2  ;;  %s2683_s13 = sshll.u32 (%p46_p3), %s221_s11, 4 }
  0x14   : > { %s225_s14 = sadd.s32 (%p46_p3), %s3247_s25, %s2684_s12  ;;  %s223_s19 = scalar_lea.vmem (%p46_p3), [#allocation2], %s2683_s13 }
  0x15   : > { %s2685_s15 = sshll.u32 (%p46_p3), %s225_s14, 3 }
  0x16   : > { %s227_s18 = scalar_lea.vmem (%p46_p3), %s4734_s0, %s2685_s15 }
  0x17   : > { %v257_v0 = vld [vmem:[%s227_s18] sm:$0xff] (%p46_p3)  ;;  %v259_v1 = vld [vmem:[%s227_s18 + $0x10] sm:$0xff] (%p46_p3) }
  0x18   : > { %258 = vst [vmem:[%s223_s19] sm:$0xff] (%p46_p3), %v257_v0  ;;  %260 = vst [vmem:[%s223_s19 + $0x8] sm:$0xff] (%p46_p3), %v259_v1 }
  0x19 PF: > { %p2686_p7 = scmp.ge.s32.totalorder %s3255_s27, 1  ;;  %p265_p8 = scmp.lt.s32.totalorder %s3255_s27, 5 }
  0x1b   : > { %p266_p9 = pnand %p2686_p7, %p265_p8 }
  0x1d   : > { %269 = sbr.rel (%p266_p9) target bundleno = 1215 (0x4bf), region = 78 }
  0x24   : > { %s272_s20 = sand.u32 1, %s3231_s21   ;;  %p301_p10 = scmp.lt.s32.totalorder %s3243_s24, 1 }
  0x25   : > { %s3358_s30 = sshll.u32 %s272_s20, 4  ;;  %p2690_p11 = scmp.ne.s32.totalorder %s3239_s23, 0 }
  0x26   : > { %s4762_s24 = smov (!%p301_p10, %s3243_s24), 1  ;;  %s274_s12 = scalar_lea.vmem [#allocation2], %s3358_s30  ;;  %vm311_vm0 = vcmask (!%p2690_p11), 7168   ;;  %v3257_v2 = vmov (!%p2690_p11), -inf  }
  0x27   : > { %s2781_s7 = sshll.u32 %s4762_s24, 10  ;;  %310 = sbr.rel (%p2690_p11) target bundleno = 105 (0x69), region = 86 }
  0x28   : > { %s3364_s11 = scalar_lea.vmem %s4740_s6, %s2781_s7 }
  0x29   : > { %312 = vst.msk [vmem:[%s3364_s11] sm:$0xff] (!%p2690_p11), %vm311_vm0, %v3257_v2  ;;  %313 = vst.msk [vmem:[%s3364_s11 + $0x8] sm:$0xff] (!%p2690_p11), %vm311_vm0, %v3257_v2 }
  0x2a   : > { %314 = vst.msk [vmem:[%s3364_s11 + $0x10] sm:$0xff] (!%p2690_p11), %vm311_vm0, %v3257_v2  ;;  %315 = vst.msk [vmem:[%s3364_s11 + $0x18] sm:$0xff] (!%p2690_p11), %vm311_vm0, %v3257_v2 }
  0x2b   : > { %316 = vst.msk [vmem:[%s3364_s11 + $0x20] sm:$0xff] (!%p2690_p11), %vm311_vm0, %v3257_v2  ;;  %317 = vst.msk [vmem:[%s3364_s11 + $0x28] sm:$0xff] (!%p2690_p11), %vm311_vm0, %v3257_v2 }
  0x2c   : > { %318 = vst.msk [vmem:[%s3364_s11 + $0x30] sm:$0xff] (!%p2690_p11), %vm311_vm0, %v3257_v2  ;;  %319 = vst.msk [vmem:[%s3364_s11 + $0x38] sm:$0xff] (!%p2690_p11), %vm311_vm0, %v3257_v2 }
  0x2d   : > { %320 = vst.msk [vmem:[%s3364_s11 + $0x40] sm:$0xff] (!%p2690_p11), %vm311_vm0, %v3257_v2  ;;  %321 = vst.msk [vmem:[%s3364_s11 + $0x48] sm:$0xff] (!%p2690_p11), %vm311_vm0, %v3257_v2 }
  0x2e   : > { %322 = vst.msk [vmem:[%s3364_s11 + $0x50] sm:$0xff] %vm311_vm0, %v3257_v2  ;;  %323 = vst.msk [vmem:[%s3364_s11 + $0x58] sm:$0xff] %vm311_vm0, %v3257_v2 }
  0x2f   : > { %324 = vst.msk [vmem:[%s3364_s11 + $0x60] sm:$0xff] %vm311_vm0, %v3257_v2  ;;  %325 = vst.msk [vmem:[%s3364_s11 + $0x68] sm:$0xff] %vm311_vm0, %v3257_v2 }
  0x30   : > { %326 = vst.msk [vmem:[%s3364_s11 + $0x70] sm:$0xff] %vm311_vm0, %v3257_v2  ;;  %327 = vst.msk [vmem:[%s3364_s11 + $0x78] sm:$0xff] %vm311_vm0, %v3257_v2 }
  0x31   : > { %328 = vst.msk [vmem:[%s3364_s11 + $0x80] sm:$0xff] %vm311_vm0, %v3257_v2  ;;  %329 = vst.msk [vmem:[%s3364_s11 + $0x88] sm:$0xff] %vm311_vm0, %v3257_v2 }
  0x32   : > { %330 = vst.msk [vmem:[%s3364_s11 + $0x90] sm:$0xff] %vm311_vm0, %v3257_v2  ;;  %331 = vst.msk [vmem:[%s3364_s11 + $0x98] sm:$0xff] %vm311_vm0, %v3257_v2 }
  0x33   : > { %332 = vst.msk [vmem:[%s3364_s11 + $0xa0] sm:$0xff] %vm311_vm0, %v3257_v2  ;;  %333 = vst.msk [vmem:[%s3364_s11 + $0xa8] sm:$0xff] %vm311_vm0, %v3257_v2 }
  0x34   : > { %334 = vst.msk [vmem:[%s3364_s11 + $0xb0] sm:$0xff] %vm311_vm0, %v3257_v2  ;;  %335 = vst.msk [vmem:[%s3364_s11 + $0xb8] sm:$0xff] %vm311_vm0, %v3257_v2 }
  0x35   : > { %336 = vst.msk [vmem:[%s3364_s11 + $0xc0] sm:$0xff] %vm311_vm0, %v3257_v2  ;;  %337 = vst.msk [vmem:[%s3364_s11 + $0xc8] sm:$0xff] %vm311_vm0, %v3257_v2 }
  0x36   : > { %338 = vst.msk [vmem:[%s3364_s11 + $0xd0] sm:$0xff] %vm311_vm0, %v3257_v2  ;;  %339 = vst.msk [vmem:[%s3364_s11 + $0xd8] sm:$0xff] %vm311_vm0, %v3257_v2 }
  0x37   : > { %340 = vst.msk [vmem:[%s3364_s11 + $0xe0] sm:$0xff] %vm311_vm0, %v3257_v2  ;;  %341 = vst.msk [vmem:[%s3364_s11 + $0xe8] sm:$0xff] %vm311_vm0, %v3257_v2 }
  0x38   : > { %342 = vst.msk [vmem:[%s3364_s11 + $0xf0] sm:$0xff] %vm311_vm0, %v3257_v2  ;;  %343 = vst.msk [vmem:[%s3364_s11 + $0xf8] sm:$0xff] %vm311_vm0, %v3257_v2 }
  0x39   : > { %344 = vst.msk [vmem:[%s3364_s11 + $0x100] sm:$0xff] %vm311_vm0, %v3257_v2  ;;  %345 = vst.msk [vmem:[%s3364_s11 + $0x108] sm:$0xff] %vm311_vm0, %v3257_v2 }
  0x3a   : > { %346 = vst.msk [vmem:[%s3364_s11 + $0x110] sm:$0xff] %vm311_vm0, %v3257_v2  ;;  %347 = vst.msk [vmem:[%s3364_s11 + $0x118] sm:$0xff] %vm311_vm0, %v3257_v2 }
  0x3b   : > { %348 = vst.msk [vmem:[%s3364_s11 + $0x120] sm:$0xff] %vm311_vm0, %v3257_v2  ;;  %349 = vst.msk [vmem:[%s3364_s11 + $0x128] sm:$0xff] %vm311_vm0, %v3257_v2 }
  0x3c   : > { %350 = vst.msk [vmem:[%s3364_s11 + $0x130] sm:$0xff] %vm311_vm0, %v3257_v2  ;;  %351 = vst.msk [vmem:[%s3364_s11 + $0x138] sm:$0xff] %vm311_vm0, %v3257_v2 }
  0x3d   : > { %352 = vst.msk [vmem:[%s3364_s11 + $0x140] sm:$0xff] %vm311_vm0, %v3257_v2  ;;  %353 = vst.msk [vmem:[%s3364_s11 + $0x148] sm:$0xff] %vm311_vm0, %v3257_v2 }
  0x3e   : > { %354 = vst.msk [vmem:[%s3364_s11 + $0x150] sm:$0xff] %vm311_vm0, %v3257_v2  ;;  %355 = vst.msk [vmem:[%s3364_s11 + $0x158] sm:$0xff] %vm311_vm0, %v3257_v2 }
  0x3f   : > { %356 = vst.msk [vmem:[%s3364_s11 + $0x160] sm:$0xff] %vm311_vm0, %v3257_v2  ;;  %357 = vst.msk [vmem:[%s3364_s11 + $0x168] sm:$0xff] %vm311_vm0, %v3257_v2 }
  0x40   : > { %358 = vst.msk [vmem:[%s3364_s11 + $0x170] sm:$0xff] %vm311_vm0, %v3257_v2  ;;  %359 = vst.msk [vmem:[%s3364_s11 + $0x178] sm:$0xff] %vm311_vm0, %v3257_v2 }
  0x41   : > { %360 = vst.msk [vmem:[%s3364_s11 + $0x180] sm:$0xff] %vm311_vm0, %v3257_v2  ;;  %361 = vst.msk [vmem:[%s3364_s11 + $0x188] sm:$0xff] %vm311_vm0, %v3257_v2 }
  0x42   : > { %362 = vst.msk [vmem:[%s3364_s11 + $0x190] sm:$0xff] %vm311_vm0, %v3257_v2  ;;  %363 = vst.msk [vmem:[%s3364_s11 + $0x198] sm:$0xff] %vm311_vm0, %v3257_v2 }
  0x43   : > { %364 = vst.msk [vmem:[%s3364_s11 + $0x1a0] sm:$0xff] %vm311_vm0, %v3257_v2  ;;  %365 = vst.msk [vmem:[%s3364_s11 + $0x1a8] sm:$0xff] %vm311_vm0, %v3257_v2 }
  0x44   : > { %366 = vst.msk [vmem:[%s3364_s11 + $0x1b0] sm:$0xff] %vm311_vm0, %v3257_v2  ;;  %367 = vst.msk [vmem:[%s3364_s11 + $0x1b8] sm:$0xff] %vm311_vm0, %v3257_v2 }
  0x45   : > { %368 = vst.msk [vmem:[%s3364_s11 + $0x1c0] sm:$0xff] %vm311_vm0, %v3257_v2  ;;  %369 = vst.msk [vmem:[%s3364_s11 + $0x1c8] sm:$0xff] %vm311_vm0, %v3257_v2 }
  0x46   : > { %370 = vst.msk [vmem:[%s3364_s11 + $0x1d0] sm:$0xff] %vm311_vm0, %v3257_v2  ;;  %371 = vst.msk [vmem:[%s3364_s11 + $0x1d8] sm:$0xff] %vm311_vm0, %v3257_v2 }
  0x47   : > { %372 = vst.msk [vmem:[%s3364_s11 + $0x1e0] sm:$0xff] %vm311_vm0, %v3257_v2  ;;  %373 = vst.msk [vmem:[%s3364_s11 + $0x1e8] sm:$0xff] %vm311_vm0, %v3257_v2 }
  0x48   : > { %374 = vst.msk [vmem:[%s3364_s11 + $0x1f0] sm:$0xff] %vm311_vm0, %v3257_v2  ;;  %375 = vst.msk [vmem:[%s3364_s11 + $0x1f8] sm:$0xff] %vm311_vm0, %v3257_v2 }
  0x49   : > { %376 = vst.msk [vmem:[%s3364_s11 + $0x200] sm:$0xff] %vm311_vm0, %v3257_v2  ;;  %377 = vst.msk [vmem:[%s3364_s11 + $0x208] sm:$0xff] %vm311_vm0, %v3257_v2 }
  0x4a   : > { %378 = vst.msk [vmem:[%s3364_s11 + $0x210] sm:$0xff] %vm311_vm0, %v3257_v2  ;;  %379 = vst.msk [vmem:[%s3364_s11 + $0x218] sm:$0xff] %vm311_vm0, %v3257_v2 }
  0x4b   : > { %380 = vst.msk [vmem:[%s3364_s11 + $0x220] sm:$0xff] %vm311_vm0, %v3257_v2  ;;  %381 = vst.msk [vmem:[%s3364_s11 + $0x228] sm:$0xff] %vm311_vm0, %v3257_v2 }
  0x4c   : > { %382 = vst.msk [vmem:[%s3364_s11 + $0x230] sm:$0xff] %vm311_vm0, %v3257_v2  ;;  %383 = vst.msk [vmem:[%s3364_s11 + $0x238] sm:$0xff] %vm311_vm0, %v3257_v2 }
  0x4d   : > { %384 = vst.msk [vmem:[%s3364_s11 + $0x240] sm:$0xff] %vm311_vm0, %v3257_v2  ;;  %385 = vst.msk [vmem:[%s3364_s11 + $0x248] sm:$0xff] %vm311_vm0, %v3257_v2 }
  0x4e   : > { %386 = vst.msk [vmem:[%s3364_s11 + $0x250] sm:$0xff] %vm311_vm0, %v3257_v2  ;;  %387 = vst.msk [vmem:[%s3364_s11 + $0x258] sm:$0xff] %vm311_vm0, %v3257_v2 }
  0x4f   : > { %388 = vst.msk [vmem:[%s3364_s11 + $0x260] sm:$0xff] %vm311_vm0, %v3257_v2  ;;  %389 = vst.msk [vmem:[%s3364_s11 + $0x268] sm:$0xff] %vm311_vm0, %v3257_v2 }
  0x50   : > { %390 = vst.msk [vmem:[%s3364_s11 + $0x270] sm:$0xff] %vm311_vm0, %v3257_v2  ;;  %391 = vst.msk [vmem:[%s3364_s11 + $0x278] sm:$0xff] %vm311_vm0, %v3257_v2 }
  0x51   : > { %392 = vst.msk [vmem:[%s3364_s11 + $0x280] sm:$0xff] %vm311_vm0, %v3257_v2  ;;  %393 = vst.msk [vmem:[%s3364_s11 + $0x288] sm:$0xff] %vm311_vm0, %v3257_v2 }
  0x52   : > { %394 = vst.msk [vmem:[%s3364_s11 + $0x290] sm:$0xff] %vm311_vm0, %v3257_v2  ;;  %395 = vst.msk [vmem:[%s3364_s11 + $0x298] sm:$0xff] %vm311_vm0, %v3257_v2 }
  0x53   : > { %396 = vst.msk [vmem:[%s3364_s11 + $0x2a0] sm:$0xff] %vm311_vm0, %v3257_v2  ;;  %397 = vst.msk [vmem:[%s3364_s11 + $0x2a8] sm:$0xff] %vm311_vm0, %v3257_v2 }
  0x54   : > { %398 = vst.msk [vmem:[%s3364_s11 + $0x2b0] sm:$0xff] %vm311_vm0, %v3257_v2  ;;  %399 = vst.msk [vmem:[%s3364_s11 + $0x2b8] sm:$0xff] %vm311_vm0, %v3257_v2 }
  0x55   : > { %400 = vst.msk [vmem:[%s3364_s11 + $0x2c0] sm:$0xff] %vm311_vm0, %v3257_v2  ;;  %401 = vst.msk [vmem:[%s3364_s11 + $0x2c8] sm:$0xff] %vm311_vm0, %v3257_v2 }
  0x56   : > { %402 = vst.msk [vmem:[%s3364_s11 + $0x2d0] sm:$0xff] %vm311_vm0, %v3257_v2  ;;  %403 = vst.msk [vmem:[%s3364_s11 + $0x2d8] sm:$0xff] %vm311_vm0, %v3257_v2 }
  0x57   : > { %404 = vst.msk [vmem:[%s3364_s11 + $0x2e0] sm:$0xff] %vm311_vm0, %v3257_v2  ;;  %405 = vst.msk [vmem:[%s3364_s11 + $0x2e8] sm:$0xff] %vm311_vm0, %v3257_v2 }
  0x58   : > { %406 = vst.msk [vmem:[%s3364_s11 + $0x2f0] sm:$0xff] %vm311_vm0, %v3257_v2  ;;  %407 = vst.msk [vmem:[%s3364_s11 + $0x2f8] sm:$0xff] %vm311_vm0, %v3257_v2 }
  0x59   : > { %408 = vst.msk [vmem:[%s3364_s11 + $0x300] sm:$0xff] %vm311_vm0, %v3257_v2  ;;  %409 = vst.msk [vmem:[%s3364_s11 + $0x308] sm:$0xff] %vm311_vm0, %v3257_v2 }
  0x5a   : > { %410 = vst.msk [vmem:[%s3364_s11 + $0x310] sm:$0xff] %vm311_vm0, %v3257_v2  ;;  %411 = vst.msk [vmem:[%s3364_s11 + $0x318] sm:$0xff] %vm311_vm0, %v3257_v2 }
  0x5b   : > { %412 = vst.msk [vmem:[%s3364_s11 + $0x320] sm:$0xff] %vm311_vm0, %v3257_v2  ;;  %413 = vst.msk [vmem:[%s3364_s11 + $0x328] sm:$0xff] %vm311_vm0, %v3257_v2 }
  0x5c   : > { %414 = vst.msk [vmem:[%s3364_s11 + $0x330] sm:$0xff] %vm311_vm0, %v3257_v2  ;;  %415 = vst.msk [vmem:[%s3364_s11 + $0x338] sm:$0xff] %vm311_vm0, %v3257_v2 }
  0x5d   : > { %416 = vst.msk [vmem:[%s3364_s11 + $0x340] sm:$0xff] %vm311_vm0, %v3257_v2  ;;  %417 = vst.msk [vmem:[%s3364_s11 + $0x348] sm:$0xff] %vm311_vm0, %v3257_v2 }
  0x5e   : > { %418 = vst.msk [vmem:[%s3364_s11 + $0x350] sm:$0xff] %vm311_vm0, %v3257_v2  ;;  %419 = vst.msk [vmem:[%s3364_s11 + $0x358] sm:$0xff] %vm311_vm0, %v3257_v2 }
  0x5f   : > { %420 = vst.msk [vmem:[%s3364_s11 + $0x360] sm:$0xff] %vm311_vm0, %v3257_v2  ;;  %421 = vst.msk [vmem:[%s3364_s11 + $0x368] sm:$0xff] %vm311_vm0, %v3257_v2 }
  0x60   : > { %422 = vst.msk [vmem:[%s3364_s11 + $0x370] sm:$0xff] %vm311_vm0, %v3257_v2  ;;  %423 = vst.msk [vmem:[%s3364_s11 + $0x378] sm:$0xff] %vm311_vm0, %v3257_v2 }
  0x61   : > { %424 = vst.msk [vmem:[%s3364_s11 + $0x380] sm:$0xff] %vm311_vm0, %v3257_v2  ;;  %425 = vst.msk [vmem:[%s3364_s11 + $0x388] sm:$0xff] %vm311_vm0, %v3257_v2 }
  0x62   : > { %426 = vst.msk [vmem:[%s3364_s11 + $0x390] sm:$0xff] %vm311_vm0, %v3257_v2  ;;  %427 = vst.msk [vmem:[%s3364_s11 + $0x398] sm:$0xff] %vm311_vm0, %v3257_v2 }
  0x63   : > { %428 = vst.msk [vmem:[%s3364_s11 + $0x3a0] sm:$0xff] %vm311_vm0, %v3257_v2  ;;  %429 = vst.msk [vmem:[%s3364_s11 + $0x3a8] sm:$0xff] %vm311_vm0, %v3257_v2 }
  0x64   : > { %430 = vst.msk [vmem:[%s3364_s11 + $0x3b0] sm:$0xff] %vm311_vm0, %v3257_v2  ;;  %431 = vst.msk [vmem:[%s3364_s11 + $0x3b8] sm:$0xff] %vm311_vm0, %v3257_v2 }
  0x65   : > { %432 = vst.msk [vmem:[%s3364_s11 + $0x3c0] sm:$0xff] %vm311_vm0, %v3257_v2  ;;  %433 = vst.msk [vmem:[%s3364_s11 + $0x3c8] sm:$0xff] %vm311_vm0, %v3257_v2 }
  0x66   : > { %434 = vst.msk [vmem:[%s3364_s11 + $0x3d0] sm:$0xff] %vm311_vm0, %v3257_v2  ;;  %435 = vst.msk [vmem:[%s3364_s11 + $0x3d8] sm:$0xff] %vm311_vm0, %v3257_v2 }
  0x67   : > { %436 = vst.msk [vmem:[%s3364_s11 + $0x3e0] sm:$0xff] %vm311_vm0, %v3257_v2  ;;  %437 = vst.msk [vmem:[%s3364_s11 + $0x3e8] sm:$0xff] %vm311_vm0, %v3257_v2 }
  0x68   : > { %438 = vst.msk [vmem:[%s3364_s11 + $0x3f0] sm:$0xff] %vm311_vm0, %v3257_v2  ;;  %439 = vst.msk [vmem:[%s3364_s11 + $0x3f8] sm:$0xff] %vm311_vm0, %v3257_v2 }
  0x69 PF: > { %v440_v3 = vld [vmem:[%s274_s12] sm:$0xff]  ;;  %v441_v4 = vld [vmem:[%s274_s12 + $0x8] sm:$0xff]  ;;  %vm519_vm1 = vcmask 130048   ;;  %v3258_v7 = vmov 0   ;;  %vm761_vm2 = vcmask 523264   ;;  %vm2476_vm3 = vcmask 7168  }
  0x6a   : > { %v442_v5 = vpack.c.bf16 %v441_v4, %v440_v3  ;;  %v3125_v6 = vld [vmem:[%s4735_s1] sm:$0xff]   ;;  %3123 = vset.pattern.permute.xlu0 %v3258_v7  ;;  %3124 = vset.pattern.permute.xlu1 %v3258_v7  ;;  %v3126_v8 = vld [vmem:[%s4735_s1 + $0x8] sm:$0xff]   ;;  %v3127_v9 = vld [vmem:[%s4735_s1 + $0x10] sm:$0xff]  }
  0x6b   : > { %2873 = vmatprep.mubr.msk.bf16.mxu0 %vm519_vm1, %v3125_v6  ;;  %v451_v10 = vld [vmem:[%s4736_s2] sm:$0xff]  ;;  %v453_v11 = vld [vmem:[%s4736_s2 + $0x10] sm:$0xff]  ;;  %v452_v12 = vld [vmem:[%s4736_s2 + $0x8] sm:$0xff] }
  0x6c   : > { %2871 = vmatprep.subr.bf16.mxu0 %v442_v5  ;;  %461 = vperm.xlu0 %3123, %v451_v10   ;;  %v454_v13 = vld [vmem:[%s4736_s2 + $0x18] sm:$0xff]  ;;  %v455_v14 = vld [vmem:[%s4736_s2 + $0x20] sm:$0xff]  ;;  %v456_v16 = vld [vmem:[%s4736_s2 + $0x28] sm:$0xff] }
  0x6d   : > { %2872 = vmatpush3.bf16.msra.mxu0 %v442_v5  ;;  %471 = vperm.xlu1 %3124, %v453_v11   ;;  %v3128_v15 = vld [vmem:[%s4735_s1 + $0x18] sm:$0xff]   ;;  %v457_v17 = vld [vmem:[%s4736_s2 + $0x30] sm:$0xff]  ;;  %v625_v19 = vld [vmem:[%s4738_s4] sm:$0xff] }
  0x6e   : > { %v458_v18 = vld [vmem:[%s4736_s2 + $0x38] sm:$0xff]  ;;  %v626_v20 = vld [vmem:[%s4738_s4 + $0x8] sm:$0xff]  ;;  %v627_v21 = vld [vmem:[%s4738_s4 + $0x10] sm:$0xff] }
  0x6f   : > { %v628_v22 = vld [vmem:[%s4738_s4 + $0x18] sm:$0xff]  ;;  %v629_v23 = vld [vmem:[%s4738_s4 + $0x20] sm:$0xff]  ;;  %v630_v24 = vld [vmem:[%s4738_s4 + $0x28] sm:$0xff] }
  0x70   : > { %2874 = vmatmul.mubr.msk.bf16.vlgmr.msra.gmra.mrb[0].mxu0 %vm519_vm1, %v3126_v8  ;;  %466 = vperm.xlu0 %3123, %v452_v12   ;;  %v631_v25 = vld [vmem:[%s4738_s4 + $0x30] sm:$0xff]  ;;  %v632_v26 = vld [vmem:[%s4738_s4 + $0x38] sm:$0xff]  ;;  %v633_v27 = vld [vmem:[%s4738_s4 + $0x40] sm:$0xff] }
  0x71   : > { %2877 = vmatprep.mubr.msk.bf16.mxu0 %vm519_vm1, %v3127_v9  ;;  %476 = vperm.xlu1 %3124, %v454_v13   ;;  %v634_v28 = vld [vmem:[%s4738_s4 + $0x48] sm:$0xff]  ;;  %v635_v29 = vld [vmem:[%s4738_s4 + $0x50] sm:$0xff]  ;;  %v636_v30 = vld [vmem:[%s4738_s4 + $0x58] sm:$0xff] }
  0x72   : > { %v637_v31 = vld [vmem:[%s4738_s4 + $0x60] sm:$0xff]  ;;  %v638_v32 = vld [vmem:[%s4738_s4 + $0x68] sm:$0xff]  ;;  %v639_v33 = vld [vmem:[%s4738_s4 + $0x70] sm:$0xff] }
  0x73   : > { %v640_v34 = vld [vmem:[%s4738_s4 + $0x78] sm:$0xff]  ;;  %v3129_v35 = vld [vmem:[%s4737_s3] sm:$0xff]   ;;  %v3130_v8 = vld [vmem:[%s4737_s3 + $0x8] sm:$0xff]  }
  0x74   : > { %481 = vperm.xlu0 %3123, %v455_v14   ;;  %2889 = vmatprep.mubr.msk.bf16.mxu1 %vm761_vm2, %v3129_v35  ;;  %v3131_v9 = vld [vmem:[%s4737_s3 + $0x10] sm:$0xff]   ;;  %v3132_v10 = vld [vmem:[%s4737_s3 + $0x18] sm:$0xff]   ;;  %v3133_v11 = vld [vmem:[%s4737_s3 + $0x20] sm:$0xff]  }
  0x75   : > { %486 = vperm.xlu1 %3124, %v456_v16   ;;  %v3134_v12 = vld [vmem:[%s4737_s3 + $0x28] sm:$0xff]   ;;  %v3135_v13 = vld [vmem:[%s4737_s3 + $0x30] sm:$0xff]   ;;  %v3136_v14 = vld [vmem:[%s4737_s3 + $0x38] sm:$0xff]  }
  0x76   : > { %v3138_v16 = vld [vmem:[%s4739_s5 + $0x110] sm:$0xff]  }
  0x78   : > { %2878 = vmatmul.mubr.msk.bf16.gmra.mrb[4].mxu0 %vm519_vm1, %v3128_v15  ;;  %491 = vperm.xlu0 %3123, %v457_v17   ;;  %v3137_v15 = vld [vmem:[%s4739_s5] sm:$0xff]  }
  0x79   : > { %496 = vperm.xlu1 %3124, %v458_v18   ;;  %2921 = vmatprep.mubr.bf16.mxu0 %v3137_v15 }
  0x7c   : > { %643 = vperm.xlu0 %3123, %v625_v19  }
  0x7d   : > { %648 = vperm.xlu1 %3124, %v626_v20  }
  0x80   : > { %653 = vperm.xlu0 %3123, %v627_v21  }
  0x81   : > { %658 = vperm.xlu1 %3124, %v628_v22  }
  0x84   : > { %663 = vperm.xlu0 %3123, %v629_v23  }
  0x85   : > { %668 = vperm.xlu1 %3124, %v630_v24  }
  0x88   : > { %673 = vperm.xlu0 %3123, %v631_v25  }
  0x89   : > { %678 = vperm.xlu1 %3124, %v632_v26  }
  0x8c   : > { %683 = vperm.xlu0 %3123, %v633_v27  }
  0x8d   : > { %688 = vperm.xlu1 %3124, %v634_v28  }
  0x90   : > { %693 = vperm.xlu0 %3123, %v635_v29  }
  0x91   : > { %698 = vperm.xlu1 %3124, %v636_v30  }
  0x94   : > { %703 = vperm.xlu0 %3123, %v637_v31  }
  0x95   : > { %708 = vperm.xlu1 %3124, %v638_v32  }
  0x98   : > { %713 = vperm.xlu0 %3123, %v639_v33  }
  0x99   : > { %718 = vperm.xlu1 %3124, %v640_v34  }
  0xeb   : > { %v462_v36 = vpop.permute.xlu0 %461 }
  0xec   : > { %v472_v37 = vpop.permute.xlu1 %471 }
  0xef   : > { %v467_v38 = vpop.permute.xlu0 %466 }
  0xf0   : > { %v477_v39 = vpop.permute.xlu1 %476 }
  0xf3   : > { %v482_v43 = vpop.permute.xlu0 %481 }
  0xf4   : > { %v487_v48 = vpop.permute.xlu1 %486 }
  0xf7   : > { %v492_v55 = vpop.permute.xlu0 %491 }
  0xf8   : > { %v497_v60 = vpop.permute.xlu1 %496 }
  0xfb   : > { %v644_v17 = vpop.permute.xlu0 %643 }
  0xfc   : > { %v649_v18 = vpop.permute.xlu1 %648 }
  0xff   : > { %v654_v19 = vpop.permute.xlu0 %653 }
 0x100   : > { %v659_v20 = vpop.permute.xlu1 %658 }
 0x103   : > { %v664_v21 = vpop.permute.xlu0 %663 }
 0x104   : > { %v669_v22 = vpop.permute.xlu1 %668 }
 0x107   : > { %v674_v23 = vpop.permute.xlu0 %673 }
 0x108   : > { %v679_v27 = vpop.permute.xlu1 %678 }
 0x10b   : > { %v684_v35 = vpop.permute.xlu0 %683 }
 0x143   : > { %v2875_v40 = vpop.f32.mrb[0].mxu0 }
 0x144   : > { %v575_v41 = vadd.f32 %v2875_v40, %v472_v37  ;;  %v566_v42 = vpop.f32.mrb[1].mxu0 }
 0x145   : > { %v567_v44 = vadd.f32 %v566_v42, %v462_v36  ;;  %v2876_v45 = vpop.f32.mrb[2].mxu0 }
 0x146   : > { %v578_v46 = vadd.f32 %v2876_v45, %v477_v39  ;;  %v569_v47 = vpop.f32.mrb[3].mxu0  ;;  %v599_v50 = vmax.f32 %v575_v41, 0.0  ;;  %v689_v39 = vpop.permute.xlu1 %688 }
 0x147   : > { %v570_v49 = vadd.f32 %v569_v47, %v467_v38  ;;  %v597_v52 = vmax.f32 %v567_v44, 0.0 }
 0x148   : > { %v600_v51 = vmax.f32 %v578_v46, 0.0 }
 0x149   : > { %v598_v53 = vmax.f32 %v570_v49, 0.0 }
 0x14a   : > { %v622_v54 = vpack.c.bf16 %v600_v51, %v599_v50 }
 0x14b   : > { %v2879_v56 = vpop.f32.mrb[4].mxu0  ;;  %v621_v57 = vpack.c.bf16 %v598_v53, %v597_v52  ;;  %v699_v52 = vpop.permute.xlu1 %698 }
 0x14c   : > { %v591_v58 = vadd.f32 %v2879_v56, %v492_v55  ;;  %v582_v59 = vpop.f32.mrb[5].mxu0 }
 0x14d   : > { %v583_v61 = vadd.f32 %v582_v59, %v482_v43  ;;  %v2880_v62 = vpop.f32.mrb[6].mxu0  ;;  %2881 = vmatprep.subr.bf16.mxu1 %v621_v57 }
 0x14e   : > { %v594_v63 = vadd.f32 %v2880_v62, %v497_v60  ;;  %v585_v0 = vpop.f32.mrb[7].mxu0  ;;  %2882 = vmatpush3.bf16.msra.mxu1 %v621_v57  ;;  %v603_v2 = vmax.f32 %v591_v58, 0.0 }
 0x14f   : > { %v586_v1 = vadd.f32 %v585_v0, %v487_v48  ;;  %2883 = vmatprep.subr.bf16.mxu1 %v622_v54  ;;  %v601_v4 = vmax.f32 %v583_v61, 0.0  ;;  %v694_v48 = vpop.permute.xlu0 %693 }
 0x150   : > { %v604_v3 = vmax.f32 %v594_v63, 0.0 }
 0x151   : > { %v602_v5 = vmax.f32 %v586_v1, 0.0  ;;  %v709_v1 = vpop.permute.xlu1 %708 }
 0x152   : > { %v624_v6 = vpack.c.bf16 %v604_v3, %v603_v2  ;;  %2884 = vmatpush3.bf16.msra.mxu1 %v622_v54 }
 0x153   : > { %v623_v7 = vpack.c.bf16 %v602_v5, %v601_v4  ;;  %v704_v60 = vpop.permute.xlu0 %703 }
 0x155   : > { %2885 = vmatprep.subr.bf16.mxu1 %v623_v7 }
 0x156   : > { %2886 = vmatpush3.bf16.msra.mxu1 %v623_v7 }
 0x157   : > { %2887 = vmatprep.subr.bf16.mxu1 %v624_v6 }
 0x15a   : > { %2888 = vmatpush3.bf16.msra.mxu1 %v624_v6 }
 0x15d   : > { %2890 = vmatmul.mubr.msk.bf16.vlgmr.msra.gmra.mrb[0].mxu1 %vm761_vm2, %v3130_v8  ;;  %v714_v8 = vpop.permute.xlu0 %713 }
 0x15e   : > { %2893 = vmatprep.mubr.msk.bf16.mxu1 %vm761_vm2, %v3131_v9 }
 0x165   : > { %2894 = vmatmul.mubr.msk.bf16.gmra.mrb[4].mxu1 %vm761_vm2, %v3132_v10 }
 0x166   : > { %2897 = vmatprep.mubr.msk.bf16.mxu1 %vm761_vm2, %v3133_v11 }
 0x16d   : > { %2898 = vmatmul.mubr.msk.bf16.gmra.mrb[8].mxu1 %vm761_vm2, %v3134_v12 }
 0x16e   : > { %2901 = vmatprep.mubr.msk.bf16.mxu1 %vm761_vm2, %v3135_v13  ;;  %v719_v13 = vpop.permute.xlu1 %718 }
 0x175   : > { %2902 = vmatmul.mubr.msk.bf16.gmra.mrb[12].mxu1 %vm761_vm2, %v3136_v14 }
 0x176   : > { %2989 = vmatprep.mubr.bf16.mxu1 %v3138_v16 }
 0x230   : > { %v2891_v24 = vpop.f32.mrb[0].mxu1 }
 0x231   : > { %v829_v25 = vadd.f32 %v2891_v24, %v654_v19  ;;  %v820_v26 = vpop.f32.mrb[1].mxu1 }
 0x232   : > { %v821_v28 = vadd.f32 %v820_v26, %v644_v17  ;;  %v2892_v29 = vpop.f32.mrb[2].mxu1  ;;  %v3140_v26 = vld [vmem:[%s4739_s5 + $0x118] sm:$0xff]  }
 0x233   : > { %v832_v30 = vadd.f32 %v2892_v29, %v659_v20  ;;  %v823_v31 = vpop.f32.mrb[3].mxu1  ;;  %v885_v33 = vmax.f32 %v829_v25, 0.0  ;;  %v3139_v25 = vld [vmem:[%s4739_s5 + $0x8] sm:$0xff]   ;;  %v3142_v29 = vld [vmem:[%s4739_s5 + $0x18] sm:$0xff]  }
 0x234   : > { %v824_v32 = vadd.f32 %v823_v31, %v649_v18  ;;  %v883_v36 = vmax.f32 %v821_v28, 0.0  ;;  %v3143_v28 = vld [vmem:[%s4739_s5 + $0x120] sm:$0xff]  }
 0x235   : > { %v886_v34 = vmax.f32 %v832_v30, 0.0  ;;  %v3144_v30 = vld [vmem:[%s4739_s5 + $0x128] sm:$0xff]   ;;  %v3145_v31 = vld [vmem:[%s4739_s5 + $0x20] sm:$0xff]  }
 0x236   : > { %v884_v37 = vmax.f32 %v824_v32, 0.0  ;;  %v3147_v32 = vld [vmem:[%s4739_s5 + $0x130] sm:$0xff]  }
 0x237   : > { %v1028_v38 = vpack.c.bf16 %v886_v34, %v885_v33  ;;  %v3146_v33 = vld [vmem:[%s4739_s5 + $0x28] sm:$0xff]   ;;  %v3148_v34 = vld [vmem:[%s4739_s5 + $0x138] sm:$0xff]  }
 0x238   : > { %v1027_v40 = vpack.c.bf16 %v884_v37, %v883_v36  ;;  %v2895_v41 = vpop.f32.mrb[4].mxu1  ;;  %v3151_v36 = vld [vmem:[%s4739_s5 + $0x140] sm:$0xff]   ;;  %v3150_v37 = vld [vmem:[%s4739_s5 + $0x38] sm:$0xff]  }
 0x239   : > { %v845_v42 = vadd.f32 %v2895_v41, %v674_v23  ;;  %v836_v43 = vpop.f32.mrb[5].mxu1  ;;  %v3154_v41 = vld [vmem:[%s4739_s5 + $0x48] sm:$0xff]  }
 0x23a   : > { %v837_v44 = vadd.f32 %v836_v43, %v664_v21  ;;  %v2896_v45 = vpop.f32.mrb[6].mxu1  ;;  %2905 = vmatprep.subr.bf16.mxu0 %v1027_v40  ;;  %3049 = vmatprep.subr.bf16.mxu1 %v1027_v40  ;;  %v3157_v43 = vld [vmem:[%s4739_s5 + $0x50] sm:$0xff]  }
 0x23b   : > { %v848_v46 = vadd.f32 %v2896_v45, %v679_v27  ;;  %v839_v47 = vpop.f32.mrb[7].mxu1  ;;  %2906 = vmatpush3.bf16.msra.mxu0 %v1027_v40  ;;  %3057 = vmatpush3.bf16.msra.mxu1 %v1027_v40  ;;  %v889_v50 = vmax.f32 %v845_v42, 0.0  ;;  %v3141_v27 = vld [vmem:[%s4739_s5 + $0x10] sm:$0xff]   ;;  %v3156_v42 = vld [vmem:[%s4739_s5 + $0x158] sm:$0xff]  }
 0x23c   : > { %v840_v49 = vadd.f32 %v839_v47, %v669_v22  ;;  %2907 = vmatprep.subr.bf16.mxu0 %v1028_v38  ;;  %3050 = vmatprep.subr.bf16.mxu1 %v1028_v38  ;;  %v887_v53 = vmax.f32 %v837_v44, 0.0  ;;  %v3155_v40 = vld [vmem:[%s4739_s5 + $0x150] sm:$0xff]   ;;  %v3159_v44 = vld [vmem:[%s4739_s5 + $0x160] sm:$0xff]   ;;  %v3158_v45 = vld [vmem:[%s4739_s5 + $0x58] sm:$0xff]  }
 0x23d   : > { %v890_v51 = vmax.f32 %v848_v46, 0.0  ;;  %v3160_v46 = vld [vmem:[%s4739_s5 + $0x168] sm:$0xff]   ;;  %v3161_v47 = vld [vmem:[%s4739_s5 + $0x60] sm:$0xff]  }
 0x23e   : > { %v888_v54 = vmax.f32 %v840_v49, 0.0  ;;  %v3162_v49 = vld [vmem:[%s4739_s5 + $0x68] sm:$0xff]  }
 0x23f   : > { %v1030_v55 = vpack.c.bf16 %v890_v51, %v889_v50  ;;  %2908 = vmatpush3.bf16.msra.mxu0 %v1028_v38  ;;  %3058 = vmatpush3.bf16.msra.mxu1 %v1028_v38  ;;  %v3152_v38 = vld [vmem:[%s4739_s5 + $0x148] sm:$0xff]   ;;  %v3164_v50 = vld [vmem:[%s4739_s5 + $0x178] sm:$0xff]   ;;  %v3165_v51 = vld [vmem:[%s4739_s5 + $0x70] sm:$0xff]  }
 0x240   : > { %v1029_v56 = vpack.c.bf16 %v888_v54, %v887_v53  ;;  %v2899_v57 = vpop.f32.mrb[8].mxu1  ;;  %v3166_v53 = vld [vmem:[%s4739_s5 + $0x78] sm:$0xff]   ;;  %v3168_v54 = vld [vmem:[%s4739_s5 + $0x188] sm:$0xff]  }
 0x241   : > { %v861_v58 = vadd.f32 %v2899_v57, %v694_v48  ;;  %v852_v59 = vpop.f32.mrb[9].mxu1  ;;  %v3163_v48 = vld [vmem:[%s4739_s5 + $0x170] sm:$0xff]   ;;  %v3170_v57 = vld [vmem:[%s4739_s5 + $0x88] sm:$0xff]  }
 0x242   : > { %v853_v61 = vadd.f32 %v852_v59, %v684_v35  ;;  %v2900_v62 = vpop.f32.mrb[10].mxu1  ;;  %2909 = vmatprep.subr.bf16.mxu0 %v1029_v56  ;;  %3051 = vmatprep.subr.bf16.mxu1 %v1029_v56  ;;  %v3149_v35 = vld [vmem:[%s4739_s5 + $0x30] sm:$0xff]  }
 0x243   : > { %v864_v63 = vadd.f32 %v2900_v62, %v699_v52  ;;  %v855_v0 = vpop.f32.mrb[11].mxu1  ;;  %2910 = vmatpush3.bf16.msra.mxu0 %v1029_v56  ;;  %3059 = vmatpush3.bf16.msra.mxu1 %v1029_v56  ;;  %v893_v3 = vmax.f32 %v861_v58, 0.0  ;;  %v3167_v52 = vld [vmem:[%s4739_s5 + $0x180] sm:$0xff]   ;;  %v3171_v56 = vld [vmem:[%s4739_s5 + $0x190] sm:$0xff]   ;;  %v3172_v58 = vld [vmem:[%s4739_s5 + $0x198] sm:$0xff]  }
 0x244   : > { %v856_v2 = vadd.f32 %v855_v0, %v689_v39  ;;  %2911 = vmatprep.subr.bf16.mxu0 %v1030_v55  ;;  %3052 = vmatprep.subr.bf16.mxu1 %v1030_v55  ;;  %v891_v5 = vmax.f32 %v853_v61, 0.0  ;;  %v3153_v39 = vld [vmem:[%s4739_s5 + $0x40] sm:$0xff]   ;;  %v3173_v59 = vld [vmem:[%s4739_s5 + $0x90] sm:$0xff]   ;;  %v3174_v61 = vld [vmem:[%s4739_s5 + $0x98] sm:$0xff]  }
 0x245   : > { %v894_v4 = vmax.f32 %v864_v63, 0.0  ;;  %v3176_v62 = vld [vmem:[%s4739_s5 + $0x1a8] sm:$0xff]   ;;  %v3177_v63 = vld [vmem:[%s4739_s5 + $0xa0] sm:$0xff]   ;;  %v3179_v0 = vld [vmem:[%s4739_s5 + $0x1b0] sm:$0xff]  }
 0x246   : > { %v892_v6 = vmax.f32 %v856_v2, 0.0  ;;  %v3180_v2 = vld [vmem:[%s4739_s5 + $0x1b8] sm:$0xff]  }
 0x247   : > { %v1032_v7 = vpack.c.bf16 %v894_v4, %v893_v3  ;;  %2912 = vmatpush3.bf16.msra.mxu0 %v1030_v55  ;;  %3060 = vmatpush3.bf16.msra.mxu1 %v1030_v55  ;;  %v3169_v55 = vld [vmem:[%s4739_s5 + $0x80] sm:$0xff]   ;;  %v3181_v3 = vld [vmem:[%s4739_s5 + $0xb0] sm:$0xff]  }
 0x248   : > { %v1031_v9 = vpack.c.bf16 %v892_v6, %v891_v5  ;;  %v2903_v10 = vpop.f32.mrb[12].mxu1  ;;  %v3183_v4 = vld [vmem:[%s4739_s5 + $0x1c0] sm:$0xff]   ;;  %v3182_v5 = vld [vmem:[%s4739_s5 + $0xb8] sm:$0xff]   ;;  %v3184_v6 = vld [vmem:[%s4739_s5 + $0x1c8] sm:$0xff]  }
 0x249   : > { %v877_v11 = vadd.f32 %v2903_v10, %v714_v8  ;;  %v868_v12 = vpop.f32.mrb[13].mxu1  ;;  %v3187_v8 = vld [vmem:[%s4739_s5 + $0x1d0] sm:$0xff]   ;;  %v3188_v10 = vld [vmem:[%s4739_s5 + $0x1d8] sm:$0xff]  }
 0x24a   : > { %v869_v14 = vadd.f32 %v868_v12, %v704_v60  ;;  %v2904_v15 = vpop.f32.mrb[14].mxu1  ;;  %2913 = vmatprep.subr.bf16.mxu0 %v1031_v9  ;;  %3053 = vmatprep.subr.bf16.mxu1 %v1031_v9  ;;  %v3175_v60 = vld [vmem:[%s4739_s5 + $0x1a0] sm:$0xff]  }
 0x24b   : > { %v880_v16 = vadd.f32 %v2904_v15, %v719_v13  ;;  %v871_v17 = vpop.f32.mrb[15].mxu1  ;;  %2914 = vmatpush3.bf16.msra.mxu0 %v1031_v9  ;;  %3061 = vmatpush3.bf16.msra.mxu1 %v1031_v9  ;;  %v897_v19 = vmax.f32 %v877_v11, 0.0  ;;  %v3186_v9 = vld [vmem:[%s4739_s5 + $0xc8] sm:$0xff]   ;;  %v3189_v11 = vld [vmem:[%s4739_s5 + $0xd0] sm:$0xff]   ;;  %v3191_v12 = vld [vmem:[%s4739_s5 + $0x1e0] sm:$0xff]  }
 0x24c   : > { %v872_v18 = vadd.f32 %v871_v17, %v709_v1  ;;  %2915 = vmatprep.subr.bf16.mxu0 %v1032_v7  ;;  %3054 = vmatprep.subr.bf16.mxu1 %v1032_v7  ;;  %v895_v21 = vmax.f32 %v869_v14, 0.0  ;;  %v3178_v1 = vld [vmem:[%s4739_s5 + $0xa8] sm:$0xff]   ;;  %v3190_v13 = vld [vmem:[%s4739_s5 + $0xd8] sm:$0xff]   ;;  %v3193_v15 = vld [vmem:[%s4739_s5 + $0xe0] sm:$0xff]  }
 0x24d   : > { %v898_v20 = vmax.f32 %v880_v16, 0.0  ;;  %v3192_v14 = vld [vmem:[%s4739_s5 + $0x1e8] sm:$0xff]   ;;  %v3195_v16 = vld [vmem:[%s4739_s5 + $0x1f0] sm:$0xff]  }
 0x24e   : > { %v896_v22 = vmax.f32 %v872_v18, 0.0  ;;  %v3194_v17 = vld [vmem:[%s4739_s5 + $0xe8] sm:$0xff]   ;;  %v3196_v18 = vld [vmem:[%s4739_s5 + $0x1f8] sm:$0xff]  }
 0x24f   : > { %v1034_v23 = vpack.c.bf16 %v898_v20, %v897_v19  ;;  %2916 = vmatpush3.bf16.msra.mxu0 %v1032_v7  ;;  %3062 = vmatpush3.bf16.msra.mxu1 %v1032_v7  ;;  %v3185_v7 = vld [vmem:[%s4739_s5 + $0xc0] sm:$0xff]   ;;  %v3197_v19 = vld [vmem:[%s4739_s5 + $0xf0] sm:$0xff]   ;;  %v3198_v20 = vld [vmem:[%s4739_s5 + $0xf8] sm:$0xff]  }
 0x250   : > { %v1033_v24 = vpack.c.bf16 %v896_v22, %v895_v21  ;;  %v3199_v21 = vld [vmem:[%s4739_s5 + $0x100] sm:$0xff]   ;;  %v3200_v22 = vld [vmem:[%s4739_s5 + $0x108] sm:$0xff]  }
 0x252   : > { %2917 = vmatprep.subr.bf16.mxu0 %v1033_v24  ;;  %3055 = vmatprep.subr.bf16.mxu1 %v1033_v24 }
 0x253   : > { %2918 = vmatpush3.bf16.msra.mxu0 %v1033_v24  ;;  %3063 = vmatpush3.bf16.msra.mxu1 %v1033_v24 }
 0x254   : > { %2919 = vmatprep.subr.bf16.mxu0 %v1034_v23  ;;  %3056 = vmatprep.subr.bf16.mxu1 %v1034_v23 }
 0x257   : > { %2920 = vmatpush3.bf16.msra.mxu0 %v1034_v23  ;;  %3064 = vmatpush3.bf16.msra.mxu1 %v1034_v23 }
 0x25a   : > { %2922 = vmatmul.mubr.bf16.vlgmr.msra.gmra.mrb[8].mxu0 %v3139_v25  ;;  %2990 = vmatmul.mubr.bf16.vlgmr.msra.gmra.mrb[16].mxu1 %v3140_v26 }
 0x25b   : > { %2925 = vmatprep.mubr.bf16.mxu0 %v3141_v27  ;;  %2993 = vmatprep.mubr.bf16.mxu1 %v3143_v28 }
 0x262   : > { %2926 = vmatmul.mubr.bf16.gmra.mrb[12].mxu0 %v3142_v29  ;;  %2994 = vmatmul.mubr.bf16.gmra.mrb[20].mxu1 %v3144_v30 }
 0x263   : > { %2929 = vmatprep.mubr.bf16.mxu0 %v3145_v31  ;;  %2997 = vmatprep.mubr.bf16.mxu1 %v3147_v32 }
 0x26a   : > { %2930 = vmatmul.mubr.bf16.gmra.mrb[16].mxu0 %v3146_v33  ;;  %2998 = vmatmul.mubr.bf16.gmra.mrb[24].mxu1 %v3148_v34 }
 0x26b   : > { %2933 = vmatprep.mubr.bf16.mxu0 %v3149_v35  ;;  %3001 = vmatprep.mubr.bf16.mxu1 %v3151_v36 }
 0x272   : > { %2934 = vmatmul.mubr.bf16.gmra.mrb[20].mxu0 %v3150_v37  ;;  %3002 = vmatmul.mubr.bf16.gmra.mrb[28].mxu1 %v3152_v38 }
 0x273   : > { %2937 = vmatprep.mubr.bf16.mxu0 %v3153_v39  ;;  %3005 = vmatprep.mubr.bf16.mxu1 %v3155_v40 }
 0x27a   : > { %2938 = vmatmul.mubr.bf16.gmra.mrb[24].mxu0 %v3154_v41  ;;  %3006 = vmatmul.mubr.bf16.gmra.mrb[32].mxu1 %v3156_v42 }
 0x27b   : > { %2941 = vmatprep.mubr.bf16.mxu0 %v3157_v43  ;;  %3009 = vmatprep.mubr.bf16.mxu1 %v3159_v44 }
 0x282   : > { %2942 = vmatmul.mubr.bf16.gmra.mrb[28].mxu0 %v3158_v45  ;;  %3010 = vmatmul.mubr.bf16.gmra.mrb[36].mxu1 %v3160_v46 }
 0x283   : > { %2945 = vmatprep.mubr.bf16.mxu0 %v3161_v47  ;;  %3013 = vmatprep.mubr.bf16.mxu1 %v3163_v48 }
 0x28a   : > { %2946 = vmatmul.mubr.bf16.gmra.mrb[32].mxu0 %v3162_v49  ;;  %3014 = vmatmul.mubr.bf16.gmra.mrb[40].mxu1 %v3164_v50 }
 0x28b   : > { %2949 = vmatprep.mubr.bf16.mxu0 %v3165_v51  ;;  %3017 = vmatprep.mubr.bf16.mxu1 %v3167_v52 }
 0x292   : > { %2950 = vmatmul.mubr.bf16.gmra.mrb[36].mxu0 %v3166_v53  ;;  %3018 = vmatmul.mubr.bf16.gmra.mrb[44].mxu1 %v3168_v54 }
 0x293   : > { %2953 = vmatprep.mubr.bf16.mxu0 %v3169_v55  ;;  %3021 = vmatprep.mubr.bf16.mxu1 %v3171_v56 }
 0x29a   : > { %2954 = vmatmul.mubr.bf16.gmra.mrb[40].mxu0 %v3170_v57  ;;  %3022 = vmatmul.mubr.bf16.gmra.mrb[48].mxu1 %v3172_v58 }
 0x29b   : > { %2957 = vmatprep.mubr.bf16.mxu0 %v3173_v59  ;;  %3025 = vmatprep.mubr.bf16.mxu1 %v3175_v60 }
 0x2a2   : > { %2958 = vmatmul.mubr.bf16.gmra.mrb[44].mxu0 %v3174_v61  ;;  %3026 = vmatmul.mubr.bf16.gmra.mrb[52].mxu1 %v3176_v62 }
 0x2a3   : > { %2961 = vmatprep.mubr.bf16.mxu0 %v3177_v63  ;;  %3029 = vmatprep.mubr.bf16.mxu1 %v3179_v0 }
 0x2aa   : > { %2962 = vmatmul.mubr.bf16.gmra.mrb[48].mxu0 %v3178_v1  ;;  %3030 = vmatmul.mubr.bf16.gmra.mrb[56].mxu1 %v3180_v2 }
 0x2ab   : > { %2965 = vmatprep.mubr.bf16.mxu0 %v3181_v3  ;;  %3033 = vmatprep.mubr.bf16.mxu1 %v3183_v4 }
 0x2b2   : > { %2966 = vmatmul.mubr.bf16.gmra.mrb[52].mxu0 %v3182_v5  ;;  %3034 = vmatmul.mubr.bf16.gmra.mrb[60].mxu1 %v3184_v6 }
 0x2b3   : > { %2969 = vmatprep.mubr.bf16.mxu0 %v3185_v7  ;;  %3037 = vmatprep.mubr.bf16.mxu1 %v3187_v8 }
 0x2ba   : > { %2970 = vmatmul.mubr.bf16.gmra.mrb[56].mxu0 %v3186_v9  ;;  %3038 = vmatmul.mubr.bf16.gmra.mrb[64].mxu1 %v3188_v10 }
 0x2bb   : > { %2973 = vmatprep.mubr.bf16.mxu0 %v3189_v11  ;;  %3041 = vmatprep.mubr.bf16.mxu1 %v3191_v12 }
 0x2c2   : > { %2974 = vmatmul.mubr.bf16.gmra.mrb[60].mxu0 %v3190_v13  ;;  %3042 = vmatmul.mubr.bf16.gmra.mrb[68].mxu1 %v3192_v14 }
 0x2c3   : > { %2977 = vmatprep.mubr.bf16.mxu0 %v3193_v15  ;;  %3045 = vmatprep.mubr.bf16.mxu1 %v3195_v16 }
 0x2ca   : > { %2978 = vmatmul.mubr.bf16.gmra.mrb[64].mxu0 %v3194_v17  ;;  %3046 = vmatmul.mubr.bf16.gmra.mrb[72].mxu1 %v3196_v18 }
 0x2cb   : > { %2981 = vmatprep.mubr.bf16.mxu0 %v3197_v19 }
 0x2d2   : > { %2982 = vmatmul.mubr.bf16.gmra.mrb[68].mxu0 %v3198_v20 }
 0x2d3   : > { %2985 = vmatprep.mubr.bf16.mxu0 %v3199_v21 }
 0x2da   : > { %2986 = vmatmul.mubr.bf16.gmra.mrb[72].mxu0 %v3200_v22 }
 0x32d   : > { %v2923_v23 = vpop.f32.mrb[8].mxu0  ;;  %v2991_v24 = vpop.f32.mrb[16].mxu1 }
 0x32e   : > { %2104 = vmax.xlane.f32.xlu1 %v2991_v24  ;;  %1968 = vmax.xlane.f32.xlu0 %v2923_v23  ;;  %v1453_v25 = vpop.f32.mrb[9].mxu0  ;;  %v1725_v26 = vpop.f32.mrb[17].mxu1 }
 0x32f   : > { %v2924_v27 = vpop.f32.mrb[10].mxu0  ;;  %v2992_v28 = vpop.f32.mrb[18].mxu1 }
 0x330   : > { %v1456_v29 = vpop.f32.mrb[11].mxu0  ;;  %v1728_v30 = vpop.f32.mrb[19].mxu1 }
 0x332   : > { %2100 = vmax.xlane.f32.xlu1 %v1725_v26  ;;  %1964 = vmax.xlane.f32.xlu0 %v1453_v25 }
 0x335   : > { %v2927_v31 = vpop.f32.mrb[12].mxu0  ;;  %v2995_v32 = vpop.f32.mrb[20].mxu1 }
 0x336   : > { %1970 = vmax.xlane.f32.xlu0 %v2924_v27  ;;  %1966 = vmax.xlane.f32.xlu1 %v1456_v29  ;;  %v1469_v33 = vpop.f32.mrb[13].mxu0  ;;  %v1741_v34 = vpop.f32.mrb[21].mxu1 }
 0x337   : > { %v2928_v35 = vpop.f32.mrb[14].mxu0  ;;  %v2996_v36 = vpop.f32.mrb[22].mxu1 }
 0x338   : > { %v1472_v37 = vpop.f32.mrb[15].mxu0  ;;  %v1744_v38 = vpop.f32.mrb[23].mxu1 }
 0x33a   : > { %2106 = vmax.xlane.f32.xlu0 %v2992_v28  ;;  %1976 = vmax.xlane.f32.xlu1 %v2927_v31 }
 0x33d   : > { %v2931_v39 = vpop.f32.mrb[16].mxu0  ;;  %v2999_v40 = vpop.f32.mrb[24].mxu1 }
 0x33e   : > { %2102 = vmax.xlane.f32.xlu0 %v1728_v30  ;;  %2112 = vmax.xlane.f32.xlu1 %v2995_v32  ;;  %v1485_v41 = vpop.f32.mrb[17].mxu0  ;;  %v1757_v42 = vpop.f32.mrb[25].mxu1 }
 0x33f   : > { %v2932_v43 = vpop.f32.mrb[18].mxu0  ;;  %v3000_v44 = vpop.f32.mrb[26].mxu1 }
 0x340   : > { %v1488_v45 = vpop.f32.mrb[19].mxu0  ;;  %v1760_v46 = vpop.f32.mrb[27].mxu1 }
 0x342   : > { %1972 = vmax.xlane.f32.xlu1 %v1469_v33  ;;  %1978 = vmax.xlane.f32.xlu0 %v2928_v35 }
 0x345   : > { %v2935_v47 = vpop.f32.mrb[20].mxu0  ;;  %v3003_v48 = vpop.f32.mrb[28].mxu1 }
 0x346   : > { %2108 = vmax.xlane.f32.xlu1 %v1741_v34  ;;  %2114 = vmax.xlane.f32.xlu0 %v2996_v36  ;;  %v1501_v49 = vpop.f32.mrb[21].mxu0  ;;  %v1773_v50 = vpop.f32.mrb[29].mxu1 }
 0x347   : > { %v2936_v51 = vpop.f32.mrb[22].mxu0  ;;  %v3004_v52 = vpop.f32.mrb[30].mxu1 }
 0x348   : > { %v1504_v53 = vpop.f32.mrb[23].mxu0  ;;  %v1776_v54 = vpop.f32.mrb[31].mxu1 }
 0x34a   : > { %1974 = vmax.xlane.f32.xlu0 %v1472_v37  ;;  %1984 = vmax.xlane.f32.xlu1 %v2931_v39 }
 0x34d   : > { %v2939_v55 = vpop.f32.mrb[24].mxu0  ;;  %v3007_v56 = vpop.f32.mrb[32].mxu1 }
 0x34e   : > { %2110 = vmax.xlane.f32.xlu0 %v1744_v38  ;;  %2120 = vmax.xlane.f32.xlu1 %v2999_v40  ;;  %v1517_v57 = vpop.f32.mrb[25].mxu0  ;;  %v1789_v58 = vpop.f32.mrb[33].mxu1 }
 0x34f   : > { %v2940_v59 = vpop.f32.mrb[26].mxu0  ;;  %v3008_v60 = vpop.f32.mrb[34].mxu1 }
 0x350   : > { %v1520_v61 = vpop.f32.mrb[27].mxu0  ;;  %v4068_v62 = vpop.f32.mrb[35].mxu1 }
 0x352   : > { %1980 = vmax.xlane.f32.xlu1 %v1485_v41  ;;  %1986 = vmax.xlane.f32.xlu0 %v2932_v43 }
 0x355   : > { %v2943_v63 = vpop.f32.mrb[28].mxu0  ;;  %v3011_v0 = vpop.f32.mrb[36].mxu1 }
 0x356   : > { %2116 = vmax.xlane.f32.xlu1 %v1757_v42  ;;  %2122 = vmax.xlane.f32.xlu0 %v3000_v44  ;;  %v4070_v1 = vpop.f32.mrb[29].mxu0  ;;  %v4072_v2 = vpop.f32.mrb[37].mxu1 }
 0x357   : > { %v4074_v3 = vpop.f32.mrb[30].mxu0  ;;  %v4076_v4 = vpop.f32.mrb[38].mxu1 }
 0x358   : > { %v4078_v5 = vpop.f32.mrb[31].mxu0  ;;  %v4080_v6 = vpop.f32.mrb[39].mxu1 }
 0x35a   : > { %1982 = vmax.xlane.f32.xlu0 %v1488_v45  ;;  %1992 = vmax.xlane.f32.xlu1 %v2935_v47 }
 0x35d   : > { %v4082_v7 = vpop.f32.mrb[32].mxu0  ;;  %v4084_v8 = vpop.f32.mrb[40].mxu1 }
 0x35e   : > { %2118 = vmax.xlane.f32.xlu0 %v1760_v46  ;;  %2128 = vmax.xlane.f32.xlu1 %v3003_v48  ;;  %v4086_v9 = vpop.f32.mrb[33].mxu0  ;;  %v4088_v10 = vpop.f32.mrb[41].mxu1 }
 0x35f   : > { %v4090_v11 = vpop.f32.mrb[34].mxu0  ;;  %v4092_v12 = vpop.f32.mrb[42].mxu1 }
 0x360   : > { %v4094_v13 = vpop.f32.mrb[35].mxu0  ;;  %v4096_v14 = vpop.f32.mrb[43].mxu1 }
 0x362   : > { %1988 = vmax.xlane.f32.xlu1 %v1501_v49  ;;  %1994 = vmax.xlane.f32.xlu0 %v2936_v51 }
 0x365   : > { %v4098_v15 = vpop.f32.mrb[36].mxu0  ;;  %v4100_v16 = vpop.f32.mrb[44].mxu1 }
 0x366   : > { %2124 = vmax.xlane.f32.xlu1 %v1773_v50  ;;  %2130 = vmax.xlane.f32.xlu0 %v3004_v52  ;;  %v4102_v17 = vpop.f32.mrb[37].mxu0  ;;  %v4104_v18 = vpop.f32.mrb[45].mxu1 }
 0x367   : > { %v4106_v19 = vpop.f32.mrb[38].mxu0  ;;  %v4108_v20 = vpop.f32.mrb[46].mxu1 }
 0x368   : > { %v4110_v21 = vpop.f32.mrb[39].mxu0  ;;  %v4112_v22 = vpop.f32.mrb[47].mxu1 }
 0x36a   : > { %1990 = vmax.xlane.f32.xlu0 %v1504_v53  ;;  %2000 = vmax.xlane.f32.xlu1 %v2939_v55 }
 0x36d   : > { %v4114_v23 = vpop.f32.mrb[40].mxu0  ;;  %v4116_v24 = vpop.f32.mrb[48].mxu1 }
 0x36e   : > { %2126 = vmax.xlane.f32.xlu0 %v1776_v54  ;;  %2136 = vmax.xlane.f32.xlu1 %v3007_v56  ;;  %v4118_v25 = vpop.f32.mrb[41].mxu0  ;;  %v4120_v26 = vpop.f32.mrb[49].mxu1 }
 0x36f   : > { %v4122_v27 = vpop.f32.mrb[42].mxu0  ;;  %v4124_v28 = vpop.f32.mrb[50].mxu1 }
 0x370   : > { %v4126_v29 = vpop.f32.mrb[43].mxu0  ;;  %v4128_v30 = vpop.f32.mrb[51].mxu1 }
 0x372   : > { %1996 = vmax.xlane.f32.xlu1 %v1517_v57  ;;  %2002 = vmax.xlane.f32.xlu0 %v2940_v59 }
 0x375   : > { %v4130_v31 = vpop.f32.mrb[44].mxu0  ;;  %v4132_v32 = vpop.f32.mrb[52].mxu1 }
 0x376   : > { %2132 = vmax.xlane.f32.xlu1 %v1789_v58  ;;  %2138 = vmax.xlane.f32.xlu0 %v3008_v60  ;;  %v4134_v33 = vpop.f32.mrb[45].mxu0  ;;  %v4136_v34 = vpop.f32.mrb[53].mxu1 }
 0x377   : > { %v4138_v35 = vpop.f32.mrb[46].mxu0  ;;  %v4140_v36 = vpop.f32.mrb[54].mxu1 }
 0x378   : > { %v4142_v37 = vpop.f32.mrb[47].mxu0  ;;  %v4144_v38 = vpop.f32.mrb[55].mxu1 }
 0x37a   : > { %1998 = vmax.xlane.f32.xlu0 %v1520_v61  ;;  %2008 = vmax.xlane.f32.xlu1 %v2943_v63 }
 0x37d   : > { %v4146_v39 = vpop.f32.mrb[48].mxu0  ;;  %v4148_v40 = vpop.f32.mrb[56].mxu1 }
 0x37e   : > { %2134 = vmax.xlane.f32.xlu0 %v4068_v62  ;;  %2144 = vmax.xlane.f32.xlu1 %v3011_v0  ;;  %v4151_v41 = vpop.f32.mrb[49].mxu0  ;;  %v4153_v42 = vpop.f32.mrb[57].mxu1 }
 0x37f   : > { %v4155_v43 = vpop.f32.mrb[50].mxu0  ;;  %v4157_v44 = vpop.f32.mrb[58].mxu1 }
 0x380   : > { %v4159_v45 = vpop.f32.mrb[51].mxu0  ;;  %v4161_v46 = vpop.f32.mrb[59].mxu1 }
 0x382   : > { %2004 = vmax.xlane.f32.xlu1 %v4070_v1  ;;  %2010 = vmax.xlane.f32.xlu0 %v4074_v3 }
 0x385   : > { %v4165_v47 = vpop.f32.mrb[52].mxu0  ;;  %v4167_v48 = vpop.f32.mrb[60].mxu1 }
 0x386   : > { %2140 = vmax.xlane.f32.xlu1 %v4072_v2  ;;  %2146 = vmax.xlane.f32.xlu0 %v4076_v4  ;;  %v4171_v49 = vpop.f32.mrb[53].mxu0  ;;  %v4173_v50 = vpop.f32.mrb[61].mxu1 }
 0x387   : > { %v4175_v51 = vpop.f32.mrb[54].mxu0  ;;  %v4177_v52 = vpop.f32.mrb[62].mxu1 }
 0x388   : > { %v4179_v53 = vpop.f32.mrb[55].mxu0  ;;  %v4181_v54 = vpop.f32.mrb[63].mxu1 }
 0x38a   : > { %2006 = vmax.xlane.f32.xlu0 %v4078_v5  ;;  %2016 = vmax.xlane.f32.xlu1 %v4082_v7 }
 0x38d   : > { %v4185_v55 = vpop.f32.mrb[56].mxu0  ;;  %v4187_v56 = vpop.f32.mrb[64].mxu1 }
 0x38e   : > { %2142 = vmax.xlane.f32.xlu0 %v4080_v6  ;;  %2152 = vmax.xlane.f32.xlu1 %v4084_v8  ;;  %v4191_v57 = vpop.f32.mrb[57].mxu0  ;;  %v4193_v58 = vpop.f32.mrb[65].mxu1 }
 0x38f   : > { %v4195_v59 = vpop.f32.mrb[58].mxu0  ;;  %v4197_v60 = vpop.f32.mrb[66].mxu1 }
 0x390   : > { %v4199_v61 = vpop.f32.mrb[59].mxu0  ;;  %v4201_v62 = vpop.f32.mrb[67].mxu1 }
 0x392   : > { %2012 = vmax.xlane.f32.xlu1 %v4086_v9  ;;  %2018 = vmax.xlane.f32.xlu0 %v4090_v11 }
 0x395   : > { %v4205_v63 = vpop.f32.mrb[60].mxu0  ;;  %v4207_v0 = vpop.f32.mrb[68].mxu1 }
 0x396   : > { %2148 = vmax.xlane.f32.xlu1 %v4088_v10  ;;  %2154 = vmax.xlane.f32.xlu0 %v4092_v12  ;;  %v4211_v1 = vpop.f32.mrb[61].mxu0  ;;  %v4213_v2 = vpop.f32.mrb[69].mxu1 }
 0x397   : > { %v4215_v3 = vpop.f32.mrb[62].mxu0  ;;  %v4217_v4 = vpop.f32.mrb[70].mxu1 }
 0x398   : > { %v4219_v5 = vpop.f32.mrb[63].mxu0  ;;  %v4221_v6 = vpop.f32.mrb[71].mxu1 }
 0x399   : > { %4741 = vst [vmem:[#allocation3_spill] sm:$0xff] %v4221_v6 }
 0x39a   : > { %2014 = vmax.xlane.f32.xlu0 %v4094_v13  ;;  %2024 = vmax.xlane.f32.xlu1 %v4098_v15 }
 0x39d   : > { %v4225_v7 = vpop.f32.mrb[64].mxu0  ;;  %v4227_v8 = vpop.f32.mrb[72].mxu1 }
 0x39e   : > { %2150 = vmax.xlane.f32.xlu0 %v4096_v14  ;;  %2160 = vmax.xlane.f32.xlu1 %v4100_v16  ;;  %v4231_v9 = vpop.f32.mrb[65].mxu0  ;;  %v4233_v10 = vpop.f32.mrb[73].mxu1 }
 0x39f   : > { %v4235_v11 = vpop.f32.mrb[66].mxu0  ;;  %v4237_v12 = vpop.f32.mrb[74].mxu1 }
 0x3a0   : > { %4742 = vst [vmem:[#allocation4_spill] sm:$0xff] %v4237_v12  ;;  %v4239_v6 = vpop.f32.mrb[67].mxu0  ;;  %v4241_v13 = vpop.f32.mrb[75].mxu1 }
 0x3a2   : > { %2020 = vmax.xlane.f32.xlu1 %v4102_v17  ;;  %2026 = vmax.xlane.f32.xlu0 %v4106_v19 }
 0x3a5   : > { %v4245_v15 = vpop.f32.mrb[68].mxu0 }
 0x3a6   : > { %2156 = vmax.xlane.f32.xlu1 %v4104_v18  ;;  %2162 = vmax.xlane.f32.xlu0 %v4108_v20  ;;  %v4249_v14 = vpop.f32.mrb[69].mxu0 }
 0x3a7   : > { %v4251_v16 = vpop.f32.mrb[70].mxu0 }
 0x3a8   : > { %v4253_v12 = vpop.f32.mrb[71].mxu0 }
 0x3aa   : > { %2022 = vmax.xlane.f32.xlu0 %v4110_v21  ;;  %2032 = vmax.xlane.f32.xlu1 %v4114_v23  ;;  %v2290_v21 = vld [vmem:[%s3364_s11 + $0x230] sm:$0xff] }
 0x3ad   : > { %v4257_v17 = vpop.f32.mrb[72].mxu0 }
 0x3ae   : > { %2158 = vmax.xlane.f32.xlu0 %v4112_v22  ;;  %2168 = vmax.xlane.f32.xlu1 %v4116_v24  ;;  %v4261_v18 = vpop.f32.mrb[73].mxu0  ;;  %v2222_v22 = vld [vmem:[%s3364_s11 + $0x10] sm:$0xff] }
 0x3af   : > { %v4263_v19 = vpop.f32.mrb[74].mxu0 }
 0x3b0   : > { %4743 = vst [vmem:[#allocation5_spill] sm:$0xff] %v4263_v19  ;;  %v4265_v20 = vpop.f32.mrb[75].mxu0  ;;  %v2220_v19 = vld [vmem:[%s3364_s11] sm:$0xff] }
 0x3b1   : > { %4744 = vst [vmem:[#allocation6_spill] sm:$0xff] %v4265_v20 }
 0x3b2   : > { %2028 = vmax.xlane.f32.xlu1 %v4118_v25  ;;  %2034 = vmax.xlane.f32.xlu0 %v4122_v27  ;;  %v2288_v27 = vld [vmem:[%s3364_s11 + $0x220] sm:$0xff] }
 0x3b6   : > { %2164 = vmax.xlane.f32.xlu1 %v4120_v26  ;;  %2170 = vmax.xlane.f32.xlu0 %v4124_v28 }
 0x3ba   : > { %2030 = vmax.xlane.f32.xlu0 %v4126_v29  ;;  %2040 = vmax.xlane.f32.xlu1 %v4130_v31 }
 0x3bb   : > { %v2105_v23 = vpop.xlane.xlu1 %2104  ;;  %v1969_v24 = vpop.xlane.xlu0 %1968 }
 0x3bc   : > { %v2418_v25 = vmax.f32 %v2290_v21, %v2105_v23  ;;  %v2350_v20 = vmax.f32 %v2222_v22, %v1969_v24  ;;  %v2223_v21 = vld [vmem:[%s3364_s11 + $0x18] sm:$0xff]  ;;  %v2221_v22 = vld [vmem:[%s3364_s11 + $0x8] sm:$0xff] }
 0x3bd   : > { %v2291_v24 = vld [vmem:[%s3364_s11 + $0x238] sm:$0xff] }
 0x3be   : > { %2547 = vst.msk [vmem:[%s3364_s11 + $0x230] sm:$0xff] %vm2476_vm3, %v2418_v25  ;;  %2479 = vst.msk [vmem:[%s3364_s11 + $0x10] sm:$0xff] %vm2476_vm3, %v2350_v20  ;;  %2166 = vmax.xlane.f32.xlu0 %v4128_v30  ;;  %2176 = vmax.xlane.f32.xlu1 %v4132_v32 }
 0x3bf   : > { %v2101_v26 = vpop.xlane.xlu1 %2100  ;;  %v1965_v28 = vpop.xlane.xlu0 %1964 }
 0x3c0   : > { %v2416_v29 = vmax.f32 %v2288_v27, %v2101_v26  ;;  %v2348_v31 = vmax.f32 %v2220_v19, %v1965_v28  ;;  %v2226_v19 = vld [vmem:[%s3364_s11 + $0x30] sm:$0xff]  ;;  %v2289_v26 = vld [vmem:[%s3364_s11 + $0x228] sm:$0xff] }
 0x3c1   : > { %v2294_v28 = vld [vmem:[%s3364_s11 + $0x250] sm:$0xff] }
 0x3c2   : > { %2545 = vst.msk [vmem:[%s3364_s11 + $0x220] sm:$0xff] %vm2476_vm3, %v2416_v29  ;;  %2477 = vst.msk [vmem:[%s3364_s11] sm:$0xff] %vm2476_vm3, %v2348_v31  ;;  %2036 = vmax.xlane.f32.xlu1 %v4134_v33  ;;  %2042 = vmax.xlane.f32.xlu0 %v4138_v35 }
 0x3c3   : > { %v1971_v30 = vpop.xlane.xlu0 %1970  ;;  %v1967_v32 = vpop.xlane.xlu1 %1966 }
 0x3c4   : > { %v2351_v20 = vmax.f32 %v2223_v21, %v1971_v30  ;;  %v2349_v23 = vmax.f32 %v2221_v22, %v1967_v32  ;;  %v2224_v21 = vld [vmem:[%s3364_s11 + $0x20] sm:$0xff]  ;;  %v2227_v22 = vld [vmem:[%s3364_s11 + $0x38] sm:$0xff] }
 0x3c6   : > { %2480 = vst.msk [vmem:[%s3364_s11 + $0x18] sm:$0xff] %vm2476_vm3, %v2351_v20  ;;  %2478 = vst.msk [vmem:[%s3364_s11 + $0x8] sm:$0xff] %vm2476_vm3, %v2349_v23  ;;  %2172 = vmax.xlane.f32.xlu1 %v4136_v34  ;;  %2178 = vmax.xlane.f32.xlu0 %v4140_v36  ;;  %v2292_v20 = vld [vmem:[%s3364_s11 + $0x240] sm:$0xff]  ;;  %v2295_v23 = vld [vmem:[%s3364_s11 + $0x258] sm:$0xff] }
 0x3c7   : > { %v2107_v33 = vpop.xlane.xlu0 %2106  ;;  %v1977_v35 = vpop.xlane.xlu1 %1976 }
 0x3c8   : > { %v2419_v25 = vmax.f32 %v2291_v24, %v2107_v33  ;;  %v2354_v27 = vmax.f32 %v2226_v19, %v1977_v35  ;;  %v2225_v33 = vld [vmem:[%s3364_s11 + $0x28] sm:$0xff]  ;;  %v2230_v35 = vld [vmem:[%s3364_s11 + $0x50] sm:$0xff] }
 0x3ca   : > { %2548 = vst.msk [vmem:[%s3364_s11 + $0x238] sm:$0xff] %vm2476_vm3, %v2419_v25  ;;  %2483 = vst.msk [vmem:[%s3364_s11 + $0x30] sm:$0xff] %vm2476_vm3, %v2354_v27  ;;  %2038 = vmax.xlane.f32.xlu0 %v4142_v37  ;;  %2048 = vmax.xlane.f32.xlu1 %v4146_v39 }
 0x3cb   : > { %v2103_v34 = vpop.xlane.xlu0 %2102  ;;  %v2113_v36 = vpop.xlane.xlu1 %2112 }
 0x3cc   : > { %v2417_v29 = vmax.f32 %v2289_v26, %v2103_v34  ;;  %v2422_v31 = vmax.f32 %v2294_v28, %v2113_v36  ;;  %v2293_v26 = vld [vmem:[%s3364_s11 + $0x248] sm:$0xff]  ;;  %v2298_v28 = vld [vmem:[%s3364_s11 + $0x270] sm:$0xff] }
 0x3ce   : > { %2546 = vst.msk [vmem:[%s3364_s11 + $0x228] sm:$0xff] %vm2476_vm3, %v2417_v29  ;;  %2551 = vst.msk [vmem:[%s3364_s11 + $0x250] sm:$0xff] %vm2476_vm3, %v2422_v31  ;;  %2174 = vmax.xlane.f32.xlu0 %v4144_v38  ;;  %2184 = vmax.xlane.f32.xlu1 %v4148_v40  ;;  %v2228_v29 = vld [vmem:[%s3364_s11 + $0x40] sm:$0xff]  ;;  %v2231_v31 = vld [vmem:[%s3364_s11 + $0x58] sm:$0xff] }
 0x3cf   : > { %v1973_v37 = vpop.xlane.xlu1 %1972  ;;  %v1979_v39 = vpop.xlane.xlu0 %1978 }
 0x3d0   : > { %v2352_v30 = vmax.f32 %v2224_v21, %v1973_v37  ;;  %v2355_v32 = vmax.f32 %v2227_v22, %v1979_v39  ;;  %v2296_v37 = vld [vmem:[%s3364_s11 + $0x260] sm:$0xff]  ;;  %v2299_v39 = vld [vmem:[%s3364_s11 + $0x278] sm:$0xff] }
 0x3d2   : > { %2481 = vst.msk [vmem:[%s3364_s11 + $0x20] sm:$0xff] %vm2476_vm3, %v2352_v30  ;;  %2484 = vst.msk [vmem:[%s3364_s11 + $0x38] sm:$0xff] %vm2476_vm3, %v2355_v32  ;;  %2044 = vmax.xlane.f32.xlu1 %v4151_v41  ;;  %2050 = vmax.xlane.f32.xlu0 %v4155_v43 }
 0x3d3   : > { %v2109_v38 = vpop.xlane.xlu1 %2108  ;;  %v2115_v40 = vpop.xlane.xlu0 %2114 }
 0x3d4   : > { %v2420_v24 = vmax.f32 %v2292_v20, %v2109_v38  ;;  %v2423_v19 = vmax.f32 %v2295_v23, %v2115_v40  ;;  %v2229_v20 = vld [vmem:[%s3364_s11 + $0x48] sm:$0xff]  ;;  %v2234_v23 = vld [vmem:[%s3364_s11 + $0x70] sm:$0xff] }
 0x3d6   : > { %2549 = vst.msk [vmem:[%s3364_s11 + $0x240] sm:$0xff] %vm2476_vm3, %v2420_v24  ;;  %2552 = vst.msk [vmem:[%s3364_s11 + $0x258] sm:$0xff] %vm2476_vm3, %v2423_v19  ;;  %2180 = vmax.xlane.f32.xlu1 %v4153_v42  ;;  %2186 = vmax.xlane.f32.xlu0 %v4157_v44  ;;  %v2297_v24 = vld [vmem:[%s3364_s11 + $0x268] sm:$0xff]  ;;  %v2302_v19 = vld [vmem:[%s3364_s11 + $0x290] sm:$0xff] }
 0x3d7   : > { %v1975_v41 = vpop.xlane.xlu0 %1974  ;;  %v1985_v43 = vpop.xlane.xlu1 %1984 }
 0x3d8   : > { %v2353_v25 = vmax.f32 %v2225_v33, %v1975_v41  ;;  %v2358_v27 = vmax.f32 %v2230_v35, %v1985_v43  ;;  %v2232_v41 = vld [vmem:[%s3364_s11 + $0x60] sm:$0xff]  ;;  %v2235_v43 = vld [vmem:[%s3364_s11 + $0x78] sm:$0xff] }
 0x3da   : > { %2482 = vst.msk [vmem:[%s3364_s11 + $0x28] sm:$0xff] %vm2476_vm3, %v2353_v25  ;;  %2487 = vst.msk [vmem:[%s3364_s11 + $0x50] sm:$0xff] %vm2476_vm3, %v2358_v27  ;;  %2046 = vmax.xlane.f32.xlu0 %v4159_v45  ;;  %2056 = vmax.xlane.f32.xlu1 %v4165_v47 }
 0x3db   : > { %v2111_v42 = vpop.xlane.xlu0 %2110  ;;  %v2121_v44 = vpop.xlane.xlu1 %2120 }
 0x3dc   : > { %v2421_v34 = vmax.f32 %v2293_v26, %v2111_v42  ;;  %v2426_v36 = vmax.f32 %v2298_v28, %v2121_v44  ;;  %v2300_v26 = vld [vmem:[%s3364_s11 + $0x280] sm:$0xff]  ;;  %v2303_v28 = vld [vmem:[%s3364_s11 + $0x298] sm:$0xff] }
 0x3de   : > { %2550 = vst.msk [vmem:[%s3364_s11 + $0x248] sm:$0xff] %vm2476_vm3, %v2421_v34  ;;  %2555 = vst.msk [vmem:[%s3364_s11 + $0x270] sm:$0xff] %vm2476_vm3, %v2426_v36  ;;  %2182 = vmax.xlane.f32.xlu0 %v4161_v46  ;;  %2192 = vmax.xlane.f32.xlu1 %v4167_v48  ;;  %v2233_v34 = vld [vmem:[%s3364_s11 + $0x68] sm:$0xff]  ;;  %v2238_v36 = vld [vmem:[%s3364_s11 + $0x90] sm:$0xff] }
 0x3df   : > { %v1981_v45 = vpop.xlane.xlu1 %1980  ;;  %v1987_v47 = vpop.xlane.xlu0 %1986 }
 0x3e0   : > { %v2356_v21 = vmax.f32 %v2228_v29, %v1981_v45  ;;  %v2359_v22 = vmax.f32 %v2231_v31, %v1987_v47  ;;  %v2301_v45 = vld [vmem:[%s3364_s11 + $0x288] sm:$0xff]  ;;  %v2306_v47 = vld [vmem:[%s3364_s11 + $0x2b0] sm:$0xff] }
 0x3e2   : > { %2485 = vst.msk [vmem:[%s3364_s11 + $0x40] sm:$0xff] %vm2476_vm3, %v2356_v21  ;;  %2488 = vst.msk [vmem:[%s3364_s11 + $0x58] sm:$0xff] %vm2476_vm3, %v2359_v22  ;;  %2052 = vmax.xlane.f32.xlu1 %v4171_v49  ;;  %2058 = vmax.xlane.f32.xlu0 %v4175_v51 }
 0x3e3   : > { %v2117_v46 = vpop.xlane.xlu1 %2116  ;;  %v2123_v48 = vpop.xlane.xlu0 %2122 }
 0x3e4   : > { %v2424_v30 = vmax.f32 %v2296_v37, %v2117_v46  ;;  %v2427_v32 = vmax.f32 %v2299_v39, %v2123_v48  ;;  %v2236_v37 = vld [vmem:[%s3364_s11 + $0x80] sm:$0xff]  ;;  %v2239_v39 = vld [vmem:[%s3364_s11 + $0x98] sm:$0xff] }
 0x3e6   : > { %2553 = vst.msk [vmem:[%s3364_s11 + $0x260] sm:$0xff] %vm2476_vm3, %v2424_v30  ;;  %2556 = vst.msk [vmem:[%s3364_s11 + $0x278] sm:$0xff] %vm2476_vm3, %v2427_v32  ;;  %2188 = vmax.xlane.f32.xlu1 %v4173_v50  ;;  %2194 = vmax.xlane.f32.xlu0 %v4177_v52  ;;  %v2304_v30 = vld [vmem:[%s3364_s11 + $0x2a0] sm:$0xff]  ;;  %v2307_v32 = vld [vmem:[%s3364_s11 + $0x2b8] sm:$0xff] }
 0x3e7   : > { %v1983_v49 = vpop.xlane.xlu0 %1982  ;;  %v1993_v51 = vpop.xlane.xlu1 %1992 }
 0x3e8   : > { %v2357_v38 = vmax.f32 %v2229_v20, %v1983_v49  ;;  %v2362_v40 = vmax.f32 %v2234_v23, %v1993_v51  ;;  %v2237_v49 = vld [vmem:[%s3364_s11 + $0x88] sm:$0xff]  ;;  %v2242_v51 = vld [vmem:[%s3364_s11 + $0xb0] sm:$0xff] }
 0x3ea   : > { %2486 = vst.msk [vmem:[%s3364_s11 + $0x48] sm:$0xff] %vm2476_vm3, %v2357_v38  ;;  %2491 = vst.msk [vmem:[%s3364_s11 + $0x70] sm:$0xff] %vm2476_vm3, %v2362_v40  ;;  %2054 = vmax.xlane.f32.xlu0 %v4179_v53  ;;  %2064 = vmax.xlane.f32.xlu1 %v4185_v55 }
 0x3eb   : > { %v2119_v50 = vpop.xlane.xlu0 %2118  ;;  %v2129_v52 = vpop.xlane.xlu1 %2128 }
 0x3ec   : > { %v2425_v33 = vmax.f32 %v2297_v24, %v2119_v50  ;;  %v2430_v35 = vmax.f32 %v2302_v19, %v2129_v52  ;;  %v2305_v24 = vld [vmem:[%s3364_s11 + $0x2a8] sm:$0xff]  ;;  %v2310_v19 = vld [vmem:[%s3364_s11 + $0x2d0] sm:$0xff] }
 0x3ee   : > { %2554 = vst.msk [vmem:[%s3364_s11 + $0x268] sm:$0xff] %vm2476_vm3, %v2425_v33  ;;  %2559 = vst.msk [vmem:[%s3364_s11 + $0x290] sm:$0xff] %vm2476_vm3, %v2430_v35  ;;  %2190 = vmax.xlane.f32.xlu0 %v4181_v54  ;;  %2200 = vmax.xlane.f32.xlu1 %v4187_v56  ;;  %v2240_v33 = vld [vmem:[%s3364_s11 + $0xa0] sm:$0xff]  ;;  %v2243_v35 = vld [vmem:[%s3364_s11 + $0xb8] sm:$0xff] }
 0x3ef   : > { %v1989_v53 = vpop.xlane.xlu1 %1988  ;;  %v1995_v55 = vpop.xlane.xlu0 %1994 }
 0x3f0   : > { %v2360_v25 = vmax.f32 %v2232_v41, %v1989_v53  ;;  %v2363_v27 = vmax.f32 %v2235_v43, %v1995_v55  ;;  %v4745_v41 = vld [vmem:[#allocation3_spill] sm:$0xff] }
 0x3f1   : > { %v2308_v55 = vld [vmem:[%s3364_s11 + $0x2c0] sm:$0xff] }
 0x3f2   : > { %2489 = vst.msk [vmem:[%s3364_s11 + $0x60] sm:$0xff] %vm2476_vm3, %v2360_v25  ;;  %2492 = vst.msk [vmem:[%s3364_s11 + $0x78] sm:$0xff] %vm2476_vm3, %v2363_v27  ;;  %2060 = vmax.xlane.f32.xlu1 %v4191_v57  ;;  %2066 = vmax.xlane.f32.xlu0 %v4195_v59  ;;  %v2311_v25 = vld [vmem:[%s3364_s11 + $0x2d8] sm:$0xff] }
 0x3f3   : > { %v2125_v54 = vpop.xlane.xlu1 %2124  ;;  %v2131_v56 = vpop.xlane.xlu0 %2130 }
 0x3f4   : > { %v2428_v42 = vmax.f32 %v2300_v26, %v2125_v54  ;;  %v2431_v44 = vmax.f32 %v2303_v28, %v2131_v56  ;;  %v2241_v54 = vld [vmem:[%s3364_s11 + $0xa8] sm:$0xff]  ;;  %v2246_v56 = vld [vmem:[%s3364_s11 + $0xd0] sm:$0xff] }
 0x3f6   : > { %2557 = vst.msk [vmem:[%s3364_s11 + $0x280] sm:$0xff] %vm2476_vm3, %v2428_v42  ;;  %2560 = vst.msk [vmem:[%s3364_s11 + $0x298] sm:$0xff] %vm2476_vm3, %v2431_v44  ;;  %2196 = vmax.xlane.f32.xlu1 %v4193_v58  ;;  %2202 = vmax.xlane.f32.xlu0 %v4197_v60 }
 0x3f7   : > { %v1991_v57 = vpop.xlane.xlu0 %1990  ;;  %v2001_v59 = vpop.xlane.xlu1 %2000 }
 0x3f8   : > { %v2361_v29 = vmax.f32 %v2233_v34, %v1991_v57  ;;  %v2366_v31 = vmax.f32 %v2238_v36, %v2001_v59  ;;  %v2309_v34 = vld [vmem:[%s3364_s11 + $0x2c8] sm:$0xff]  ;;  %v2314_v36 = vld [vmem:[%s3364_s11 + $0x2f0] sm:$0xff] }
 0x3fa   : > { %2490 = vst.msk [vmem:[%s3364_s11 + $0x68] sm:$0xff] %vm2476_vm3, %v2361_v29  ;;  %2495 = vst.msk [vmem:[%s3364_s11 + $0x90] sm:$0xff] %vm2476_vm3, %v2366_v31  ;;  %2062 = vmax.xlane.f32.xlu0 %v4199_v61  ;;  %2072 = vmax.xlane.f32.xlu1 %v4205_v63  ;;  %v2244_v29 = vld [vmem:[%s3364_s11 + $0xc0] sm:$0xff]  ;;  %v2247_v31 = vld [vmem:[%s3364_s11 + $0xd8] sm:$0xff] }
 0x3fb   : > { %v2127_v58 = vpop.xlane.xlu0 %2126  ;;  %v2137_v60 = vpop.xlane.xlu1 %2136 }
 0x3fc   : > { %v2429_v21 = vmax.f32 %v2301_v45, %v2127_v58  ;;  %v2434_v22 = vmax.f32 %v2306_v47, %v2137_v60  ;;  %v2312_v58 = vld [vmem:[%s3364_s11 + $0x2e0] sm:$0xff]  ;;  %v2315_v60 = vld [vmem:[%s3364_s11 + $0x2f8] sm:$0xff] }
 0x3fe   : > { %2558 = vst.msk [vmem:[%s3364_s11 + $0x288] sm:$0xff] %vm2476_vm3, %v2429_v21  ;;  %2563 = vst.msk [vmem:[%s3364_s11 + $0x2b0] sm:$0xff] %vm2476_vm3, %v2434_v22  ;;  %2198 = vmax.xlane.f32.xlu0 %v4201_v62  ;;  %2208 = vmax.xlane.f32.xlu1 %v4207_v0 }
 0x3ff   : > { %v1997_v61 = vpop.xlane.xlu1 %1996  ;;  %v2003_v63 = vpop.xlane.xlu0 %2002 }
 0x400   : > { %v2364_v46 = vmax.f32 %v2236_v37, %v1997_v61  ;;  %v2367_v48 = vmax.f32 %v2239_v39, %v2003_v63  ;;  %v2245_v37 = vld [vmem:[%s3364_s11 + $0xc8] sm:$0xff]  ;;  %v2250_v39 = vld [vmem:[%s3364_s11 + $0xf0] sm:$0xff] }
 0x402   : > { %2493 = vst.msk [vmem:[%s3364_s11 + $0x80] sm:$0xff] %vm2476_vm3, %v2364_v46  ;;  %2496 = vst.msk [vmem:[%s3364_s11 + $0x98] sm:$0xff] %vm2476_vm3, %v2367_v48  ;;  %2068 = vmax.xlane.f32.xlu1 %v4211_v1  ;;  %2074 = vmax.xlane.f32.xlu0 %v4215_v3  ;;  %v2313_v48 = vld [vmem:[%s3364_s11 + $0x2e8] sm:$0xff] }
 0x403   : > { %v2133_v62 = vpop.xlane.xlu1 %2132  ;;  %v2139_v0 = vpop.xlane.xlu0 %2138 }
 0x404   : > { %v2432_v20 = vmax.f32 %v2304_v30, %v2133_v62  ;;  %v2435_v23 = vmax.f32 %v2307_v32, %v2139_v0  ;;  %v2318_v30 = vld [vmem:[%s3364_s11 + $0x310] sm:$0xff]  ;;  %v4747_v32 = vld [vmem:[#allocation6_spill] sm:$0xff] }
 0x406   : > { %2561 = vst.msk [vmem:[%s3364_s11 + $0x2a0] sm:$0xff] %vm2476_vm3, %v2432_v20  ;;  %2564 = vst.msk [vmem:[%s3364_s11 + $0x2b8] sm:$0xff] %vm2476_vm3, %v2435_v23  ;;  %2204 = vmax.xlane.f32.xlu1 %v4213_v2  ;;  %2210 = vmax.xlane.f32.xlu0 %v4217_v4  ;;  %v2248_v23 = vld [vmem:[%s3364_s11 + $0xe0] sm:$0xff] }
 0x407   : > { %v1999_v1 = vpop.xlane.xlu0 %1998  ;;  %v2009_v3 = vpop.xlane.xlu1 %2008 }
 0x408   : > { %v2365_v38 = vmax.f32 %v2237_v49, %v1999_v1  ;;  %v2370_v40 = vmax.f32 %v2242_v51, %v2009_v3  ;;  %v2251_v49 = vld [vmem:[%s3364_s11 + $0xf8] sm:$0xff]  ;;  %v4748_v51 = vld [vmem:[#allocation4_spill] sm:$0xff] }
 0x40a   : > { %2494 = vst.msk [vmem:[%s3364_s11 + $0x88] sm:$0xff] %vm2476_vm3, %v2365_v38  ;;  %2499 = vst.msk [vmem:[%s3364_s11 + $0xb0] sm:$0xff] %vm2476_vm3, %v2370_v40  ;;  %2070 = vmax.xlane.f32.xlu0 %v4219_v5  ;;  %2080 = vmax.xlane.f32.xlu1 %v4225_v7 }
 0x40b   : > { %v2135_v2 = vpop.xlane.xlu0 %2134  ;;  %v2145_v4 = vpop.xlane.xlu1 %2144 }
 0x40c   : > { %v2433_v50 = vmax.f32 %v2305_v24, %v2135_v2  ;;  %v2438_v52 = vmax.f32 %v2310_v19, %v2145_v4  ;;  %v2316_v24 = vld [vmem:[%s3364_s11 + $0x300] sm:$0xff]  ;;  %v2319_v19 = vld [vmem:[%s3364_s11 + $0x318] sm:$0xff] }
 0x40e   : > { %2562 = vst.msk [vmem:[%s3364_s11 + $0x2a8] sm:$0xff] %vm2476_vm3, %v2433_v50  ;;  %2567 = vst.msk [vmem:[%s3364_s11 + $0x2d0] sm:$0xff] %vm2476_vm3, %v2438_v52  ;;  %2206 = vmax.xlane.f32.xlu0 %v4745_v41  ;;  %2076 = vmax.xlane.f32.xlu1 %v4231_v9 }
 0x40f   : > { %v2005_v5 = vpop.xlane.xlu1 %2004  ;;  %v2011_v7 = vpop.xlane.xlu0 %2010 }
 0x410   : > { %v2368_v43 = vmax.f32 %v2240_v33, %v2005_v5  ;;  %v2371_v53 = vmax.f32 %v2243_v35, %v2011_v7  ;;  %v2249_v33 = vld [vmem:[%s3364_s11 + $0xe8] sm:$0xff]  ;;  %v2254_v35 = vld [vmem:[%s3364_s11 + $0x110] sm:$0xff] }
 0x412   : > { %2497 = vst.msk [vmem:[%s3364_s11 + $0xa0] sm:$0xff] %vm2476_vm3, %v2368_v43  ;;  %2500 = vst.msk [vmem:[%s3364_s11 + $0xb8] sm:$0xff] %vm2476_vm3, %v2371_v53  ;;  %2212 = vmax.xlane.f32.xlu1 %v4233_v10  ;;  %2082 = vmax.xlane.f32.xlu0 %v4235_v11  ;;  %v2317_v53 = vld [vmem:[%s3364_s11 + $0x308] sm:$0xff] }
 0x413   : > { %v2141_v9 = vpop.xlane.xlu1 %2140  ;;  %v2147_v27 = vpop.xlane.xlu0 %2146 }
 0x414   : > { %v2436_v26 = vmax.f32 %v2308_v55, %v2141_v9  ;;  %v2439_v28 = vmax.f32 %v2311_v25, %v2147_v27  ;;  %v2322_v55 = vld [vmem:[%s3364_s11 + $0x330] sm:$0xff] }
 0x416   : > { %2565 = vst.msk [vmem:[%s3364_s11 + $0x2c0] sm:$0xff] %vm2476_vm3, %v2436_v26  ;;  %2568 = vst.msk [vmem:[%s3364_s11 + $0x2d8] sm:$0xff] %vm2476_vm3, %v2439_v28  ;;  %2078 = vmax.xlane.f32.xlu0 %v4239_v6  ;;  %2088 = vmax.xlane.f32.xlu1 %v4245_v15  ;;  %v2252_v28 = vld [vmem:[%s3364_s11 + $0x100] sm:$0xff] }
 0x417   : > { %v2007_v10 = vpop.xlane.xlu0 %2006  ;;  %v2017_v11 = vpop.xlane.xlu1 %2016 }
 0x418   : > { %v2369_v42 = vmax.f32 %v2241_v54, %v2007_v10  ;;  %v2374_v44 = vmax.f32 %v2246_v56, %v2017_v11  ;;  %v2255_v54 = vld [vmem:[%s3364_s11 + $0x118] sm:$0xff] }
 0x41a   : > { %2498 = vst.msk [vmem:[%s3364_s11 + $0xa8] sm:$0xff] %vm2476_vm3, %v2369_v42  ;;  %2503 = vst.msk [vmem:[%s3364_s11 + $0xd0] sm:$0xff] %vm2476_vm3, %v2374_v44  ;;  %2214 = vmax.xlane.f32.xlu0 %v4241_v13  ;;  %2084 = vmax.xlane.f32.xlu1 %v4249_v14  ;;  %v2320_v44 = vld [vmem:[%s3364_s11 + $0x320] sm:$0xff] }
 0x41b   : > { %v2143_v6 = vpop.xlane.xlu0 %2142  ;;  %v2153_v15 = vpop.xlane.xlu1 %2152 }
 0x41c   : > { %v2437_v57 = vmax.f32 %v2309_v34, %v2143_v6  ;;  %v2442_v59 = vmax.f32 %v2314_v36, %v2153_v15  ;;  %v2323_v34 = vld [vmem:[%s3364_s11 + $0x338] sm:$0xff] }
 0x41e   : > { %2566 = vst.msk [vmem:[%s3364_s11 + $0x2c8] sm:$0xff] %vm2476_vm3, %v2437_v57  ;;  %2571 = vst.msk [vmem:[%s3364_s11 + $0x2f0] sm:$0xff] %vm2476_vm3, %v2442_v59  ;;  %2090 = vmax.xlane.f32.xlu0 %v4251_v16  ;;  %2096 = vmax.xlane.f32.xlu1 %v4257_v17  ;;  %v2253_v59 = vld [vmem:[%s3364_s11 + $0x108] sm:$0xff] }
 0x41f   : > { %v2013_v13 = vpop.xlane.xlu1 %2012  ;;  %v2019_v14 = vpop.xlane.xlu0 %2018 }
 0x420   : > { %v2372_v45 = vmax.f32 %v2244_v29, %v2013_v13  ;;  %v2375_v47 = vmax.f32 %v2247_v31, %v2019_v14  ;;  %v2258_v29 = vld [vmem:[%s3364_s11 + $0x130] sm:$0xff] }
 0x422   : > { %2501 = vst.msk [vmem:[%s3364_s11 + $0xc0] sm:$0xff] %vm2476_vm3, %v2372_v45  ;;  %2504 = vst.msk [vmem:[%s3364_s11 + $0xd8] sm:$0xff] %vm2476_vm3, %v2375_v47  ;;  %2086 = vmax.xlane.f32.xlu0 %v4253_v12  ;;  %2092 = vmax.xlane.f32.xlu1 %v4261_v18  ;;  %v4746_v12 = vld [vmem:[#allocation5_spill] sm:$0xff]  ;;  %v2321_v47 = vld [vmem:[%s3364_s11 + $0x328] sm:$0xff] }
 0x423   : > { %v2149_v16 = vpop.xlane.xlu1 %2148  ;;  %v2155_v17 = vpop.xlane.xlu0 %2154 }
 0x424   : > { %v2440_v21 = vmax.f32 %v2312_v58, %v2149_v16  ;;  %v2443_v22 = vmax.f32 %v2315_v60, %v2155_v17  ;;  %v2326_v58 = vld [vmem:[%s3364_s11 + $0x350] sm:$0xff] }
 0x426   : > { %2569 = vst.msk [vmem:[%s3364_s11 + $0x2e0] sm:$0xff] %vm2476_vm3, %v2440_v21  ;;  %2572 = vst.msk [vmem:[%s3364_s11 + $0x2f8] sm:$0xff] %vm2476_vm3, %v2443_v22  ;;  %2216 = vmax.xlane.f32.xlu1 %v4227_v8  ;;  %2098 = vmax.xlane.f32.xlu0 %v4746_v12  ;;  %v2256_v22 = vld [vmem:[%s3364_s11 + $0x120] sm:$0xff] }
 0x427   : > { %v2015_v18 = vpop.xlane.xlu0 %2014  ;;  %v2025_v61 = vpop.xlane.xlu1 %2024 }
 0x428   : > { %v2373_v63 = vmax.f32 %v2245_v37, %v2015_v18  ;;  %v2378_v46 = vmax.f32 %v2250_v39, %v2025_v61  ;;  %v2259_v37 = vld [vmem:[%s3364_s11 + $0x138] sm:$0xff] }
 0x42a   : > { %2502 = vst.msk [vmem:[%s3364_s11 + $0xc8] sm:$0xff] %vm2476_vm3, %v2373_v63  ;;  %2507 = vst.msk [vmem:[%s3364_s11 + $0xf0] sm:$0xff] %vm2476_vm3, %v2378_v46  ;;  %2094 = vmax.xlane.f32.xlu0 %v4747_v32  ;;  %v2324_v63 = vld [vmem:[%s3364_s11 + $0x340] sm:$0xff]  ;;  %v2327_v46 = vld [vmem:[%s3364_s11 + $0x358] sm:$0xff] }
 0x42b   : > { %v2151_v8 = vpop.xlane.xlu0 %2150  ;;  %v2161_v62 = vpop.xlane.xlu1 %2160 }
 0x42c   : > { %v2441_v0 = vmax.f32 %v2313_v48, %v2151_v8  ;;  %v2446_v20 = vmax.f32 %v2318_v30, %v2161_v62  ;;  %v2257_v62 = vld [vmem:[%s3364_s11 + $0x128] sm:$0xff] }
 0x42e   : > { %2570 = vst.msk [vmem:[%s3364_s11 + $0x2e8] sm:$0xff] %vm2476_vm3, %v2441_v0  ;;  %2575 = vst.msk [vmem:[%s3364_s11 + $0x310] sm:$0xff] %vm2476_vm3, %v2446_v20  ;;  %2218 = vmax.xlane.f32.xlu0 %v4748_v51  ;;  %v2262_v0 = vld [vmem:[%s3364_s11 + $0x150] sm:$0xff] }
 0x42f   : > { %v2021_v1 = vpop.xlane.xlu1 %2020  ;;  %v2027_v3 = vpop.xlane.xlu0 %2026 }
 0x430   : > { %v2376_v38 = vmax.f32 %v2248_v23, %v2021_v1  ;;  %v2379_v40 = vmax.f32 %v2251_v49, %v2027_v3  ;;  %v2325_v1 = vld [vmem:[%s3364_s11 + $0x348] sm:$0xff]  ;;  %v2330_v3 = vld [vmem:[%s3364_s11 + $0x370] sm:$0xff] }
 0x432   : > { %2505 = vst.msk [vmem:[%s3364_s11 + $0xe0] sm:$0xff] %vm2476_vm3, %v2376_v38  ;;  %2508 = vst.msk [vmem:[%s3364_s11 + $0xf8] sm:$0xff] %vm2476_vm3, %v2379_v40 }
 0x433   : > { %v2157_v2 = vpop.xlane.xlu1 %2156  ;;  %v2163_v4 = vpop.xlane.xlu0 %2162 }
 0x434   : > { %v2444_v50 = vmax.f32 %v2316_v24, %v2157_v2  ;;  %v2447_v52 = vmax.f32 %v2319_v19, %v2163_v4  ;;  %v2260_v2 = vld [vmem:[%s3364_s11 + $0x140] sm:$0xff]  ;;  %v2263_v4 = vld [vmem:[%s3364_s11 + $0x158] sm:$0xff] }
 0x436   : > { %2573 = vst.msk [vmem:[%s3364_s11 + $0x300] sm:$0xff] %vm2476_vm3, %v2444_v50  ;;  %2576 = vst.msk [vmem:[%s3364_s11 + $0x318] sm:$0xff] %vm2476_vm3, %v2447_v52 }
 0x437   : > { %v2023_v41 = vpop.xlane.xlu0 %2022  ;;  %v2033_v5 = vpop.xlane.xlu1 %2032 }
 0x438   : > { %v2377_v7 = vmax.f32 %v2249_v33, %v2023_v41  ;;  %v2382_v43 = vmax.f32 %v2254_v35, %v2033_v5  ;;  %v2328_v41 = vld [vmem:[%s3364_s11 + $0x360] sm:$0xff]  ;;  %v2331_v5 = vld [vmem:[%s3364_s11 + $0x378] sm:$0xff] }
 0x43a   : > { %2506 = vst.msk [vmem:[%s3364_s11 + $0xe8] sm:$0xff] %vm2476_vm3, %v2377_v7  ;;  %2511 = vst.msk [vmem:[%s3364_s11 + $0x110] sm:$0xff] %vm2476_vm3, %v2382_v43 }
 0x43b   : > { %v2159_v25 = vpop.xlane.xlu0 %2158  ;;  %v2169_v9 = vpop.xlane.xlu1 %2168 }
 0x43c   : > { %v2445_v27 = vmax.f32 %v2317_v53, %v2159_v25  ;;  %v2450_v26 = vmax.f32 %v2322_v55, %v2169_v9  ;;  %v2261_v25 = vld [vmem:[%s3364_s11 + $0x148] sm:$0xff]  ;;  %v2266_v9 = vld [vmem:[%s3364_s11 + $0x170] sm:$0xff] }
 0x43e   : > { %2574 = vst.msk [vmem:[%s3364_s11 + $0x308] sm:$0xff] %vm2476_vm3, %v2445_v27  ;;  %2579 = vst.msk [vmem:[%s3364_s11 + $0x330] sm:$0xff] %vm2476_vm3, %v2450_v26 }
 0x43f   : > { %v2029_v56 = vpop.xlane.xlu1 %2028  ;;  %v2035_v10 = vpop.xlane.xlu0 %2034 }
 0x440   : > { %v2380_v11 = vmax.f32 %v2252_v28, %v2029_v56  ;;  %v2383_v42 = vmax.f32 %v2255_v54, %v2035_v10  ;;  %v2329_v56 = vld [vmem:[%s3364_s11 + $0x368] sm:$0xff]  ;;  %v2334_v10 = vld [vmem:[%s3364_s11 + $0x390] sm:$0xff] }
 0x442   : > { %2509 = vst.msk [vmem:[%s3364_s11 + $0x100] sm:$0xff] %vm2476_vm3, %v2380_v11  ;;  %2512 = vst.msk [vmem:[%s3364_s11 + $0x118] sm:$0xff] %vm2476_vm3, %v2383_v42 }
 0x443   : > { %v2165_v36 = vpop.xlane.xlu1 %2164  ;;  %v2171_v6 = vpop.xlane.xlu0 %2170 }
 0x444   : > { %v2448_v15 = vmax.f32 %v2320_v44, %v2165_v36  ;;  %v2451_v57 = vmax.f32 %v2323_v34, %v2171_v6  ;;  %v2264_v36 = vld [vmem:[%s3364_s11 + $0x160] sm:$0xff]  ;;  %v2267_v6 = vld [vmem:[%s3364_s11 + $0x178] sm:$0xff] }
 0x446   : > { %2577 = vst.msk [vmem:[%s3364_s11 + $0x320] sm:$0xff] %vm2476_vm3, %v2448_v15  ;;  %2580 = vst.msk [vmem:[%s3364_s11 + $0x338] sm:$0xff] %vm2476_vm3, %v2451_v57 }
 0x447   : > { %v2031_v31 = vpop.xlane.xlu0 %2030  ;;  %v2041_v13 = vpop.xlane.xlu1 %2040 }
 0x448   : > { %v2381_v14 = vmax.f32 %v2253_v59, %v2031_v31  ;;  %v2386_v45 = vmax.f32 %v2258_v29, %v2041_v13  ;;  %v2332_v31 = vld [vmem:[%s3364_s11 + $0x380] sm:$0xff]  ;;  %v2335_v13 = vld [vmem:[%s3364_s11 + $0x398] sm:$0xff] }
 0x44a   : > { %2510 = vst.msk [vmem:[%s3364_s11 + $0x108] sm:$0xff] %vm2476_vm3, %v2381_v14  ;;  %2515 = vst.msk [vmem:[%s3364_s11 + $0x130] sm:$0xff] %vm2476_vm3, %v2386_v45 }
 0x44b   : > { %v2167_v60 = vpop.xlane.xlu0 %2166  ;;  %v2177_v16 = vpop.xlane.xlu1 %2176 }
 0x44c   : > { %v2449_v17 = vmax.f32 %v2321_v47, %v2167_v60  ;;  %v2454_v21 = vmax.f32 %v2326_v58, %v2177_v16  ;;  %v2265_v60 = vld [vmem:[%s3364_s11 + $0x168] sm:$0xff]  ;;  %v2270_v16 = vld [vmem:[%s3364_s11 + $0x190] sm:$0xff] }
 0x44e   : > { %2578 = vst.msk [vmem:[%s3364_s11 + $0x328] sm:$0xff] %vm2476_vm3, %v2449_v17  ;;  %2583 = vst.msk [vmem:[%s3364_s11 + $0x350] sm:$0xff] %vm2476_vm3, %v2454_v21 }
 0x44f   : > { %v2037_v39 = vpop.xlane.xlu1 %2036  ;;  %v2043_v12 = vpop.xlane.xlu0 %2042 }
 0x450   : > { %v2384_v18 = vmax.f32 %v2256_v22, %v2037_v39  ;;  %v2387_v61 = vmax.f32 %v2259_v37, %v2043_v12  ;;  %v2333_v39 = vld [vmem:[%s3364_s11 + $0x388] sm:$0xff]  ;;  %v2338_v12 = vld [vmem:[%s3364_s11 + $0x3b0] sm:$0xff] }
 0x452   : > { %2513 = vst.msk [vmem:[%s3364_s11 + $0x120] sm:$0xff] %vm2476_vm3, %v2384_v18  ;;  %2516 = vst.msk [vmem:[%s3364_s11 + $0x138] sm:$0xff] %vm2476_vm3, %v2387_v61 }
 0x453   : > { %v2173_v48 = vpop.xlane.xlu1 %2172  ;;  %v2179_v30 = vpop.xlane.xlu0 %2178 }
 0x454   : > { %v2452_v32 = vmax.f32 %v2324_v63, %v2173_v48  ;;  %v2455_v8 = vmax.f32 %v2327_v46, %v2179_v30  ;;  %v2268_v48 = vld [vmem:[%s3364_s11 + $0x180] sm:$0xff]  ;;  %v2271_v30 = vld [vmem:[%s3364_s11 + $0x198] sm:$0xff] }
 0x456   : > { %2581 = vst.msk [vmem:[%s3364_s11 + $0x340] sm:$0xff] %vm2476_vm3, %v2452_v32  ;;  %2584 = vst.msk [vmem:[%s3364_s11 + $0x358] sm:$0xff] %vm2476_vm3, %v2455_v8 }
 0x457   : > { %v2039_v20 = vpop.xlane.xlu0 %2038  ;;  %v2049_v23 = vpop.xlane.xlu1 %2048 }
 0x458   : > { %v2385_v49 = vmax.f32 %v2257_v62, %v2039_v20  ;;  %v2390_v51 = vmax.f32 %v2262_v0, %v2049_v23  ;;  %v2336_v20 = vld [vmem:[%s3364_s11 + $0x3a0] sm:$0xff]  ;;  %v2339_v23 = vld [vmem:[%s3364_s11 + $0x3b8] sm:$0xff] }
 0x45a   : > { %2514 = vst.msk [vmem:[%s3364_s11 + $0x128] sm:$0xff] %vm2476_vm3, %v2385_v49  ;;  %2519 = vst.msk [vmem:[%s3364_s11 + $0x150] sm:$0xff] %vm2476_vm3, %v2390_v51 }
 0x45b   : > { %v2175_v38 = vpop.xlane.xlu0 %2174  ;;  %v2185_v40 = vpop.xlane.xlu1 %2184 }
 0x45c   : > { %v2453_v24 = vmax.f32 %v2325_v1, %v2175_v38  ;;  %v2458_v19 = vmax.f32 %v2330_v3, %v2185_v40  ;;  %v2269_v38 = vld [vmem:[%s3364_s11 + $0x188] sm:$0xff]  ;;  %v2274_v40 = vld [vmem:[%s3364_s11 + $0x1b0] sm:$0xff] }
 0x45e   : > { %2582 = vst.msk [vmem:[%s3364_s11 + $0x348] sm:$0xff] %vm2476_vm3, %v2453_v24  ;;  %2587 = vst.msk [vmem:[%s3364_s11 + $0x370] sm:$0xff] %vm2476_vm3, %v2458_v19 }
 0x45f   : > { %v2045_v50 = vpop.xlane.xlu1 %2044  ;;  %v2051_v52 = vpop.xlane.xlu0 %2050 }
 0x460   : > { %v2388_v33 = vmax.f32 %v2260_v2, %v2045_v50  ;;  %v2391_v35 = vmax.f32 %v2263_v4, %v2051_v52  ;;  %v2337_v50 = vld [vmem:[%s3364_s11 + $0x3a8] sm:$0xff]  ;;  %v2342_v52 = vld [vmem:[%s3364_s11 + $0x3d0] sm:$0xff] }
 0x462   : > { %2517 = vst.msk [vmem:[%s3364_s11 + $0x140] sm:$0xff] %vm2476_vm3, %v2388_v33  ;;  %2520 = vst.msk [vmem:[%s3364_s11 + $0x158] sm:$0xff] %vm2476_vm3, %v2391_v35 }
 0x463   : > { %v2181_v7 = vpop.xlane.xlu1 %2180  ;;  %v2187_v43 = vpop.xlane.xlu0 %2186 }
 0x464   : > { %v2456_v53 = vmax.f32 %v2328_v41, %v2181_v7  ;;  %v2459_v55 = vmax.f32 %v2331_v5, %v2187_v43  ;;  %v2272_v7 = vld [vmem:[%s3364_s11 + $0x1a0] sm:$0xff]  ;;  %v2275_v43 = vld [vmem:[%s3364_s11 + $0x1b8] sm:$0xff] }
 0x466   : > { %2585 = vst.msk [vmem:[%s3364_s11 + $0x360] sm:$0xff] %vm2476_vm3, %v2456_v53  ;;  %2588 = vst.msk [vmem:[%s3364_s11 + $0x378] sm:$0xff] %vm2476_vm3, %v2459_v55 }
 0x467   : > { %v2047_v27 = vpop.xlane.xlu0 %2046  ;;  %v2057_v26 = vpop.xlane.xlu1 %2056 }
 0x468   : > { %v2389_v28 = vmax.f32 %v2261_v25, %v2047_v27  ;;  %v2394_v54 = vmax.f32 %v2266_v9, %v2057_v26  ;;  %v2340_v27 = vld [vmem:[%s3364_s11 + $0x3c0] sm:$0xff]  ;;  %v2343_v26 = vld [vmem:[%s3364_s11 + $0x3d8] sm:$0xff] }
 0x46a   : > { %2518 = vst.msk [vmem:[%s3364_s11 + $0x148] sm:$0xff] %vm2476_vm3, %v2389_v28  ;;  %2523 = vst.msk [vmem:[%s3364_s11 + $0x170] sm:$0xff] %vm2476_vm3, %v2394_v54 }
 0x46b   : > { %v2183_v11 = vpop.xlane.xlu0 %2182  ;;  %v2193_v42 = vpop.xlane.xlu1 %2192 }
 0x46c   : > { %v2457_v44 = vmax.f32 %v2329_v56, %v2183_v11  ;;  %v2462_v34 = vmax.f32 %v2334_v10, %v2193_v42  ;;  %v2273_v11 = vld [vmem:[%s3364_s11 + $0x1a8] sm:$0xff]  ;;  %v2278_v42 = vld [vmem:[%s3364_s11 + $0x1d0] sm:$0xff] }
 0x46e   : > { %2586 = vst.msk [vmem:[%s3364_s11 + $0x368] sm:$0xff] %vm2476_vm3, %v2457_v44  ;;  %2591 = vst.msk [vmem:[%s3364_s11 + $0x390] sm:$0xff] %vm2476_vm3, %v2462_v34 }
 0x46f   : > { %v2053_v15 = vpop.xlane.xlu1 %2052  ;;  %v2059_v57 = vpop.xlane.xlu0 %2058 }
 0x470   : > { %v2392_v59 = vmax.f32 %v2264_v36, %v2053_v15  ;;  %v2395_v29 = vmax.f32 %v2267_v6, %v2059_v57  ;;  %v2341_v15 = vld [vmem:[%s3364_s11 + $0x3c8] sm:$0xff]  ;;  %v2276_v57 = vld [vmem:[%s3364_s11 + $0x1c0] sm:$0xff] }
 0x472   : > { %2521 = vst.msk [vmem:[%s3364_s11 + $0x160] sm:$0xff] %vm2476_vm3, %v2392_v59  ;;  %2524 = vst.msk [vmem:[%s3364_s11 + $0x178] sm:$0xff] %vm2476_vm3, %v2395_v29 }
 0x473   : > { %v2189_v14 = vpop.xlane.xlu1 %2188  ;;  %v2195_v45 = vpop.xlane.xlu0 %2194 }
 0x474   : > { %v2460_v47 = vmax.f32 %v2332_v31, %v2189_v14  ;;  %v2463_v58 = vmax.f32 %v2335_v13, %v2195_v45  ;;  %v2344_v14 = vld [vmem:[%s3364_s11 + $0x3e0] sm:$0xff]  ;;  %v2279_v45 = vld [vmem:[%s3364_s11 + $0x1d8] sm:$0xff] }
 0x476   : > { %2589 = vst.msk [vmem:[%s3364_s11 + $0x380] sm:$0xff] %vm2476_vm3, %v2460_v47  ;;  %2592 = vst.msk [vmem:[%s3364_s11 + $0x398] sm:$0xff] %vm2476_vm3, %v2463_v58 }
 0x477   : > { %v2055_v17 = vpop.xlane.xlu0 %2054  ;;  %v2065_v21 = vpop.xlane.xlu1 %2064 }
 0x478   : > { %v2393_v22 = vmax.f32 %v2265_v60, %v2055_v17  ;;  %v2398_v37 = vmax.f32 %v2270_v16, %v2065_v21  ;;  %v2277_v17 = vld [vmem:[%s3364_s11 + $0x1c8] sm:$0xff]  ;;  %v2282_v21 = vld [vmem:[%s3364_s11 + $0x1f0] sm:$0xff] }
 0x47a   : > { %2522 = vst.msk [vmem:[%s3364_s11 + $0x168] sm:$0xff] %vm2476_vm3, %v2393_v22  ;;  %2527 = vst.msk [vmem:[%s3364_s11 + $0x190] sm:$0xff] %vm2476_vm3, %v2398_v37 }
 0x47b   : > { %v2191_v18 = vpop.xlane.xlu0 %2190  ;;  %v2201_v61 = vpop.xlane.xlu1 %2200 }
 0x47c   : > { %v2461_v63 = vmax.f32 %v2333_v39, %v2191_v18  ;;  %v2466_v46 = vmax.f32 %v2338_v12, %v2201_v61  ;;  %v2345_v18 = vld [vmem:[%s3364_s11 + $0x3e8] sm:$0xff]  ;;  %v2280_v61 = vld [vmem:[%s3364_s11 + $0x1e0] sm:$0xff] }
 0x47e   : > { %2590 = vst.msk [vmem:[%s3364_s11 + $0x388] sm:$0xff] %vm2476_vm3, %v2461_v63  ;;  %2595 = vst.msk [vmem:[%s3364_s11 + $0x3b0] sm:$0xff] %vm2476_vm3, %v2466_v46 }
 0x47f   : > { %v2061_v32 = vpop.xlane.xlu1 %2060  ;;  %v2067_v8 = vpop.xlane.xlu0 %2066 }
 0x480   : > { %v2396_v62 = vmax.f32 %v2268_v48, %v2061_v32  ;;  %v2399_v0 = vmax.f32 %v2271_v30, %v2067_v8  ;;  %v2283_v32 = vld [vmem:[%s3364_s11 + $0x1f8] sm:$0xff]  ;;  %v2286_v8 = vld [vmem:[%s3364_s11 + $0x210] sm:$0xff] }
 0x482   : > { %2525 = vst.msk [vmem:[%s3364_s11 + $0x180] sm:$0xff] %vm2476_vm3, %v2396_v62  ;;  %2528 = vst.msk [vmem:[%s3364_s11 + $0x198] sm:$0xff] %vm2476_vm3, %v2399_v0 }
 0x483   : > { %v2197_v49 = vpop.xlane.xlu1 %2196  ;;  %v2203_v51 = vpop.xlane.xlu0 %2202 }
 0x484   : > { %v2464_v1 = vmax.f32 %v2336_v20, %v2197_v49  ;;  %v2467_v3 = vmax.f32 %v2339_v23, %v2203_v51  ;;  %v2281_v49 = vld [vmem:[%s3364_s11 + $0x1e8] sm:$0xff]  ;;  %v2284_v51 = vld [vmem:[%s3364_s11 + $0x200] sm:$0xff] }
 0x486   : > { %2593 = vst.msk [vmem:[%s3364_s11 + $0x3a0] sm:$0xff] %vm2476_vm3, %v2464_v1  ;;  %2596 = vst.msk [vmem:[%s3364_s11 + $0x3b8] sm:$0xff] %vm2476_vm3, %v2467_v3 }
 0x487   : > { %v2063_v24 = vpop.xlane.xlu0 %2062  ;;  %v2073_v19 = vpop.xlane.xlu1 %2072 }
 0x488   : > { %v2397_v2 = vmax.f32 %v2269_v38, %v2063_v24  ;;  %v2402_v4 = vmax.f32 %v2274_v40, %v2073_v19  ;;  %v2346_v24 = vld [vmem:[%s3364_s11 + $0x3f0] sm:$0xff]  ;;  %v2287_v19 = vld [vmem:[%s3364_s11 + $0x218] sm:$0xff] }
 0x48a   : > { %2526 = vst.msk [vmem:[%s3364_s11 + $0x188] sm:$0xff] %vm2476_vm3, %v2397_v2  ;;  %2531 = vst.msk [vmem:[%s3364_s11 + $0x1b0] sm:$0xff] %vm2476_vm3, %v2402_v4 }
 0x48b   : > { %v2199_v33 = vpop.xlane.xlu0 %2198  ;;  %v2209_v35 = vpop.xlane.xlu1 %2208 }
 0x48c   : > { %v2465_v41 = vmax.f32 %v2337_v50, %v2199_v33  ;;  %v2470_v5 = vmax.f32 %v2342_v52, %v2209_v35  ;;  %v2285_v33 = vld [vmem:[%s3364_s11 + $0x208] sm:$0xff] }
 0x48e   : > { %2594 = vst.msk [vmem:[%s3364_s11 + $0x3a8] sm:$0xff] %vm2476_vm3, %v2465_v41  ;;  %2599 = vst.msk [vmem:[%s3364_s11 + $0x3d0] sm:$0xff] %vm2476_vm3, %v2470_v5  ;;  %v2347_v5 = vld [vmem:[%s3364_s11 + $0x3f8] sm:$0xff] }
 0x48f   : > { %v2069_v53 = vpop.xlane.xlu1 %2068  ;;  %v2075_v55 = vpop.xlane.xlu0 %2074 }
 0x490   : > { %v2400_v25 = vmax.f32 %v2272_v7, %v2069_v53  ;;  %v2403_v9 = vmax.f32 %v2275_v43, %v2075_v55 }
 0x492   : > { %2529 = vst.msk [vmem:[%s3364_s11 + $0x1a0] sm:$0xff] %vm2476_vm3, %v2400_v25  ;;  %2532 = vst.msk [vmem:[%s3364_s11 + $0x1b8] sm:$0xff] %vm2476_vm3, %v2403_v9 }
 0x493   : > { %v2205_v28 = vpop.xlane.xlu1 %2204  ;;  %v2211_v54 = vpop.xlane.xlu0 %2210 }
 0x494   : > { %v2468_v56 = vmax.f32 %v2340_v27, %v2205_v28  ;;  %v2471_v10 = vmax.f32 %v2343_v26, %v2211_v54 }
 0x496   : > { %2597 = vst.msk [vmem:[%s3364_s11 + $0x3c0] sm:$0xff] %vm2476_vm3, %v2468_v56  ;;  %2600 = vst.msk [vmem:[%s3364_s11 + $0x3d8] sm:$0xff] %vm2476_vm3, %v2471_v10 }
 0x497   : > { %v2071_v44 = vpop.xlane.xlu0 %2070  ;;  %v2081_v34 = vpop.xlane.xlu1 %2080 }
 0x498   : > { %v2401_v36 = vmax.f32 %v2273_v11, %v2071_v44  ;;  %v2406_v6 = vmax.f32 %v2278_v42, %v2081_v34 }
 0x49a   : > { %2530 = vst.msk [vmem:[%s3364_s11 + $0x1a8] sm:$0xff] %vm2476_vm3, %v2401_v36  ;;  %2535 = vst.msk [vmem:[%s3364_s11 + $0x1d0] sm:$0xff] %vm2476_vm3, %v2406_v6 }
 0x49b   : > { %v2207_v59 = vpop.xlane.xlu0 %2206  ;;  %v2077_v29 = vpop.xlane.xlu1 %2076 }
 0x49c   : > { %v2469_v31 = vmax.f32 %v2341_v15, %v2207_v59  ;;  %v2404_v13 = vmax.f32 %v2276_v57, %v2077_v29 }
 0x49e   : > { %2598 = vst.msk [vmem:[%s3364_s11 + $0x3c8] sm:$0xff] %vm2476_vm3, %v2469_v31  ;;  %2533 = vst.msk [vmem:[%s3364_s11 + $0x1c0] sm:$0xff] %vm2476_vm3, %v2404_v13 }
 0x49f   : > { %v2213_v47 = vpop.xlane.xlu1 %2212  ;;  %v2083_v58 = vpop.xlane.xlu0 %2082 }
 0x4a0   : > { %v2472_v60 = vmax.f32 %v2344_v14, %v2213_v47  ;;  %v2407_v16 = vmax.f32 %v2279_v45, %v2083_v58 }
 0x4a2   : > { %2601 = vst.msk [vmem:[%s3364_s11 + $0x3e0] sm:$0xff] %vm2476_vm3, %v2472_v60  ;;  %2536 = vst.msk [vmem:[%s3364_s11 + $0x1d8] sm:$0xff] %vm2476_vm3, %v2407_v16 }
 0x4a3   : > { %v2079_v22 = vpop.xlane.xlu0 %2078  ;;  %v2089_v37 = vpop.xlane.xlu1 %2088 }
 0x4a4   : > { %v2405_v39 = vmax.f32 %v2277_v17, %v2079_v22  ;;  %v2410_v12 = vmax.f32 %v2282_v21, %v2089_v37 }
 0x4a6   : > { %2534 = vst.msk [vmem:[%s3364_s11 + $0x1c8] sm:$0xff] %vm2476_vm3, %v2405_v39  ;;  %2539 = vst.msk [vmem:[%s3364_s11 + $0x1f0] sm:$0xff] %vm2476_vm3, %v2410_v12 }
 0x4a7   : > { %v2215_v63 = vpop.xlane.xlu0 %2214  ;;  %v2085_v46 = vpop.xlane.xlu1 %2084 }
 0x4a8   : > { %v2473_v48 = vmax.f32 %v2345_v18, %v2215_v63  ;;  %v2408_v30 = vmax.f32 %v2280_v61, %v2085_v46 }
 0x4aa   : > { %2602 = vst.msk [vmem:[%s3364_s11 + $0x3e8] sm:$0xff] %vm2476_vm3, %v2473_v48  ;;  %2537 = vst.msk [vmem:[%s3364_s11 + $0x1e0] sm:$0xff] %vm2476_vm3, %v2408_v30 }
 0x4ab   : > { %v2091_v62 = vpop.xlane.xlu0 %2090  ;;  %v2097_v0 = vpop.xlane.xlu1 %2096 }
 0x4ac   : > { %v2411_v20 = vmax.f32 %v2283_v32, %v2091_v62  ;;  %v2414_v23 = vmax.f32 %v2286_v8, %v2097_v0 }
 0x4ae   : > { %2540 = vst.msk [vmem:[%s3364_s11 + $0x1f8] sm:$0xff] %vm2476_vm3, %v2411_v20  ;;  %2543 = vst.msk [vmem:[%s3364_s11 + $0x210] sm:$0xff] %vm2476_vm3, %v2414_v23 }
 0x4af   : > { %v2087_v1 = vpop.xlane.xlu0 %2086  ;;  %v2093_v3 = vpop.xlane.xlu1 %2092 }
 0x4b0   : > { %v2409_v38 = vmax.f32 %v2281_v49, %v2087_v1  ;;  %v2412_v40 = vmax.f32 %v2284_v51, %v2093_v3 }
 0x4b2   : > { %2538 = vst.msk [vmem:[%s3364_s11 + $0x1e8] sm:$0xff] %vm2476_vm3, %v2409_v38  ;;  %2541 = vst.msk [vmem:[%s3364_s11 + $0x200] sm:$0xff] %vm2476_vm3, %v2412_v40 }
 0x4b3   : > { %v2217_v2 = vpop.xlane.xlu1 %2216  ;;  %v2099_v4 = vpop.xlane.xlu0 %2098 }
 0x4b4   : > { %v2474_v50 = vmax.f32 %v2346_v24, %v2217_v2  ;;  %v2415_v52 = vmax.f32 %v2287_v19, %v2099_v4 }
 0x4b6   : > { %2603 = vst.msk [vmem:[%s3364_s11 + $0x3f0] sm:$0xff] %vm2476_vm3, %v2474_v50  ;;  %2544 = vst.msk [vmem:[%s3364_s11 + $0x218] sm:$0xff] %vm2476_vm3, %v2415_v52 }
 0x4b7   : > { %v2095_v35 = vpop.xlane.xlu0 %2094 }
 0x4b8   : > { %v2413_v41 = vmax.f32 %v2285_v33, %v2095_v35 }
 0x4ba   : > { %2542 = vst.msk [vmem:[%s3364_s11 + $0x208] sm:$0xff] %vm2476_vm3, %v2413_v41 }
 0x4bb   : > { %v2219_v7 = vpop.xlane.xlu0 %2218 }
 0x4bc   : > { %v2475_v43 = vmax.f32 %v2347_v5, %v2219_v7 }
 0x4be   : > { %2604 = vst.msk [vmem:[%s3364_s11 + $0x3f8] sm:$0xff] %vm2476_vm3, %v2475_v43 }
 0x4bf PF: > { %s16_s27 = sadd.s32 1, %s3255_s27   ;;  %s4749_s21 = smov %s3235_s22 }
 0x4c0   : > { %p13_p12 = scmp.ge.s32.totalorder %s16_s27, 6   ;;  %s4750_s22 = smov %s3345_s10 }
 0x4c1   : > { %s4751_s23 = smov %s3247_s25  ;;  %s4752_s24 = smov %s3251_s26 }
 0x4c2   : > { %s4753_s25 = smov %s4756_s28  ;;  %s4754_s26 = smov %s4760_s29 }
 0x4c3   :  { %15 = sbr.rel (!%p13_p12) target bundleno = 4 (0x4), region = 121 }

// kernel: stnkd_forward.3
= control target key start
LH: loop header
LB: loop body
LE: loop exit
PB: predicated region body
PF: predicated region fallthrough
CT: control target
= control target key end

     0   :  { %v33_v36 = vlaneseq  ;;  %v3710_v41 = vmov 1983009808   ;;  %s4909_s2 = inlined_call_operand.vmem [shape: bf16[1024,512], index: 2, kind: input, shape index: {}]   ;;  %s4910_s1 = inlined_call_operand.vmem [shape: f32[1,1024], index: 1, kind: input, shape index: {}]   ;;  %s4911_s0 = inlined_call_operand.vmem [shape: f32[2,1024], index: 0, kind: input, shape index: {}]   ;;  %s4912_s4 = inlined_call_operand.vmem [shape: bf16[512,256], index: 4, kind: input, shape index: {}]   ;;  %s4913_s6 = inlined_call_operand.vmem [shape: bf16[256,256], index: 6, kind: input, shape index: {}]   ;;  %s4914_s3 = inlined_call_operand.vmem [shape: f32[1,512], index: 3, kind: input, shape index: {}]   ;;  %s4915_s5 = inlined_call_operand.vmem [shape: f32[1,256], index: 5, kind: input, shape index: {}]   ;;  %s4916_s7 = inlined_call_operand.vmem [shape: f32[1,256], index: 7, kind: input, shape index: {}]   ;;  %s4917_s8 = inlined_call_operand.vmem [shape: f32[2,256], index: 8, kind: output, shape index: {}]  }
   0x1   :  { %v3182_v0 = vld [vmem:[%s4909_s2 + $0x4] ss:$16 sps:$4 sm:$0xff]   ;;  %v3184_v1 = vld [vmem:[%s4909_s2 + $0xc] ss:$16 sps:$4 sm:$0xff]   ;;  %v3186_v2 = vld [vmem:[%s4909_s2] ss:$16 sps:$4 sm:$0xff]   ;;  %v68_v42 = vunpack.c.l.s4 %v3710_v41 }
   0x2   :  { %1715 = vmatprep.subr.bf16.mxu0 %v3182_v0  ;;  %v3187_v3 = vld [vmem:[%s4909_s2 + $0x8] ss:$16 sps:$4 sm:$0xff]   ;;  %1879 = vmatprep.subr.bf16.mxu1 %v3184_v1  ;;  %v3188_v4 = vld [vmem:[%s4909_s2 + $0x24] ss:$16 sps:$4 sm:$0xff]   ;;  %v3190_v5 = vld [vmem:[%s4909_s2 + $0x2c] ss:$16 sps:$4 sm:$0xff]  }
   0x3   :  { %1716 = vmatpush1.bf16.msra.mxu0 %v3186_v2  ;;  %1880 = vmatpush1.bf16.msra.mxu1 %v3187_v3  ;;  %v3192_v6 = vld [vmem:[%s4909_s2 + $0x20] ss:$16 sps:$4 sm:$0xff]   ;;  %v3193_v7 = vld [vmem:[%s4909_s2 + $0x28] ss:$16 sps:$4 sm:$0xff]   ;;  %v3194_v8 = vld [vmem:[%s4909_s2 + $0x44] ss:$16 sps:$4 sm:$0xff]   ;;  %v69_v49 = vunpack.c.0.s8 %v68_v42 }
   0x4   :  { %1717 = vmatprep.subr.bf16.mxu0 %v3188_v4  ;;  %1881 = vmatprep.subr.bf16.mxu1 %v3190_v5  ;;  %v3196_v9 = vld [vmem:[%s4909_s2 + $0x4c] ss:$16 sps:$4 sm:$0xff]   ;;  %v3198_v10 = vld [vmem:[%s4909_s2 + $0x40] ss:$16 sps:$4 sm:$0xff]   ;;  %v3199_v11 = vld [vmem:[%s4909_s2 + $0x48] ss:$16 sps:$4 sm:$0xff]  }
   0x5   :  { %v3200_v12 = vld [vmem:[%s4909_s2 + $0x64] ss:$16 sps:$4 sm:$0xff]   ;;  %v3202_v13 = vld [vmem:[%s4909_s2 + $0x6c] ss:$16 sps:$4 sm:$0xff]   ;;  %v3204_v14 = vld [vmem:[%s4909_s2 + $0x60] ss:$16 sps:$4 sm:$0xff]  }
   0x6   :  { %v3205_v15 = vld [vmem:[%s4909_s2 + $0x68] ss:$16 sps:$4 sm:$0xff]   ;;  %v3206_v16 = vld [vmem:[%s4909_s2 + $0x84] ss:$16 sps:$4 sm:$0xff]   ;;  %v3208_v17 = vld [vmem:[%s4909_s2 + $0x8c] ss:$16 sps:$4 sm:$0xff]  }
   0x7   :  { %1718 = vmatpush1.bf16.msra.mxu0 %v3192_v6  ;;  %1882 = vmatpush1.bf16.msra.mxu1 %v3193_v7  ;;  %v3210_v18 = vld [vmem:[%s4909_s2 + $0x80] ss:$16 sps:$4 sm:$0xff]   ;;  %v3211_v19 = vld [vmem:[%s4909_s2 + $0x88] ss:$16 sps:$4 sm:$0xff]   ;;  %v3212_v20 = vld [vmem:[%s4909_s2 + $0xa4] ss:$16 sps:$4 sm:$0xff]  }
   0x8   :  { %1719 = vmatprep.subr.bf16.mxu0 %v3194_v8  ;;  %1883 = vmatprep.subr.bf16.mxu1 %v3196_v9  ;;  %v3214_v21 = vld [vmem:[%s4909_s2 + $0xac] ss:$16 sps:$4 sm:$0xff]   ;;  %v3216_v22 = vld [vmem:[%s4909_s2 + $0xa0] ss:$16 sps:$4 sm:$0xff]   ;;  %v3217_v23 = vld [vmem:[%s4909_s2 + $0xa8] ss:$16 sps:$4 sm:$0xff]  }
   0x9   :  { %v3218_v24 = vld [vmem:[%s4909_s2 + $0xc4] ss:$16 sps:$4 sm:$0xff]   ;;  %v3220_v25 = vld [vmem:[%s4909_s2 + $0xcc] ss:$16 sps:$4 sm:$0xff]   ;;  %v3222_v26 = vld [vmem:[%s4909_s2 + $0xc0] ss:$16 sps:$4 sm:$0xff]  }
   0xa   :  { %v3223_v27 = vld [vmem:[%s4909_s2 + $0xc8] ss:$16 sps:$4 sm:$0xff]   ;;  %v3224_v28 = vld [vmem:[%s4909_s2 + $0xe4] ss:$16 sps:$4 sm:$0xff]   ;;  %v3226_v29 = vld [vmem:[%s4909_s2 + $0xec] ss:$16 sps:$4 sm:$0xff]  }
   0xb   :  { %1720 = vmatpush1.bf16.msra.mxu0 %v3198_v10  ;;  %1884 = vmatpush1.bf16.msra.mxu1 %v3199_v11  ;;  %v3228_v30 = vld [vmem:[%s4909_s2 + $0xe0] ss:$16 sps:$4 sm:$0xff]   ;;  %v3229_v31 = vld [vmem:[%s4909_s2 + $0xe8] ss:$16 sps:$4 sm:$0xff]   ;;  %v3230_v32 = vld [vmem:[%s4909_s2 + $0x104] ss:$16 sps:$4 sm:$0xff]  }
   0xc   :  { %1721 = vmatprep.subr.bf16.mxu0 %v3200_v12  ;;  %1885 = vmatprep.subr.bf16.mxu1 %v3202_v13  ;;  %v3232_v33 = vld [vmem:[%s4909_s2 + $0x10c] ss:$16 sps:$4 sm:$0xff]   ;;  %v3234_v34 = vld [vmem:[%s4909_s2 + $0x100] ss:$16 sps:$4 sm:$0xff]   ;;  %v3235_v35 = vld [vmem:[%s4909_s2 + $0x108] ss:$16 sps:$4 sm:$0xff]  }
   0xd   :  { %v3236_v37 = vld [vmem:[%s4909_s2 + $0x124] ss:$16 sps:$4 sm:$0xff]   ;;  %v3238_v38 = vld [vmem:[%s4909_s2 + $0x12c] ss:$16 sps:$4 sm:$0xff]   ;;  %v3240_v39 = vld [vmem:[%s4909_s2 + $0x120] ss:$16 sps:$4 sm:$0xff]  }
   0xe   :  { %v3873_v40 = vshrl.u32 %v33_v36, 7  ;;  %v3241_v43 = vld [vmem:[%s4909_s2 + $0x128] ss:$16 sps:$4 sm:$0xff]   ;;  %v3242_v44 = vld [vmem:[%s4909_s2 + $0x144] ss:$16 sps:$4 sm:$0xff]  }
   0xf   :  { %1722 = vmatpush1.bf16.msra.mxu0 %v3204_v14  ;;  %1886 = vmatpush1.bf16.msra.mxu1 %v3205_v15  ;;  %v3244_v45 = vld [vmem:[%s4909_s2 + $0x14c] ss:$16 sps:$4 sm:$0xff]   ;;  %v3246_v46 = vld [vmem:[%s4909_s2 + $0x140] ss:$16 sps:$4 sm:$0xff]   ;;  %v3247_v47 = vld [vmem:[%s4909_s2 + $0x148] ss:$16 sps:$4 sm:$0xff]  }
  0x10   :  { %1723 = vmatprep.subr.bf16.mxu0 %v3206_v16  ;;  %1887 = vmatprep.subr.bf16.mxu1 %v3208_v17  ;;  %v3891_v48 = vsub.s32 0, %v3873_v40  ;;  %v3248_v50 = vld [vmem:[%s4909_s2 + $0x164] ss:$16 sps:$4 sm:$0xff]   ;;  %v3897_v51 = vsub.s32 1, %v3873_v40  ;;  %v43_v52 = vsub.s32 2, %v3873_v40  ;;  %v47_v54 = vsub.s32 3, %v3873_v40 }
  0x11   :  { %v3250_v53 = vld [vmem:[%s4909_s2 + $0x16c] ss:$16 sps:$4 sm:$0xff]   ;;  %v3252_v55 = vld [vmem:[%s4909_s2 + $0x160] ss:$16 sps:$4 sm:$0xff]   ;;  %v3911_v57 = vsub.s32 %v69_v49, %v3873_v40  ;;  %v3253_v58 = vld [vmem:[%s4909_s2 + $0x168] ss:$16 sps:$4 sm:$0xff]  }
  0x12   :  { %v31_v56 = vld [vmem:[%s4910_s1] sm:$0xff]  ;;  %v3256_v63 = vld [vmem:[%s4909_s2 + $0x18c] ss:$16 sps:$4 sm:$0xff]   ;;  %v51_v4 = vsub.s32 4, %v3873_v40  ;;  %v3259_v5 = vld [vmem:[%s4909_s2 + $0x188] ss:$16 sps:$4 sm:$0xff]  }
  0x13   :  { %1724 = vmatpush1.bf16.msra.mxu0 %v3210_v18  ;;  %1888 = vmatpush1.bf16.msra.mxu1 %v3211_v19  ;;  %v3254_v59 = vld [vmem:[%s4909_s2 + $0x184] ss:$16 sps:$4 sm:$0xff]   ;;  %v36_v60 = vrot.slane %v31_v56, %v3891_v48  ;;  %v40_v61 = vrot.slane %v31_v56, %v3897_v51  ;;  %v44_v62 = vrot.slane %v31_v56, %v43_v52  ;;  %v3258_v2 = vld [vmem:[%s4909_s2 + $0x180] ss:$16 sps:$4 sm:$0xff]   ;;  %v55_v8 = vsub.s32 5, %v3873_v40 }
  0x14   :  { %1725 = vmatprep.subr.bf16.mxu0 %v3212_v20  ;;  %1889 = vmatprep.subr.bf16.mxu1 %v3214_v21  ;;  %v48_v0 = vrot.slane %v31_v56, %v47_v54  ;;  %v3260_v6 = vld [vmem:[%s4909_s2 + $0x1a4] ss:$16 sps:$4 sm:$0xff]   ;;  %v3262_v9 = vld [vmem:[%s4909_s2 + $0x1ac] ss:$16 sps:$4 sm:$0xff]   ;;  %v52_v11 = vrot.slane %v31_v56, %v51_v4  ;;  %v59_v12 = vsub.s32 6, %v3873_v40  ;;  %v63_v13 = vsub.s32 7, %v3873_v40 }
  0x15   :  { %v65_v1 = vcombine.low %v36_v60, %v40_v61  ;;  %v29_v14 = vld [vmem:[%s4911_s0] sm:$0xff]  ;;  %v56_v15 = vrot.slane %v31_v56, %v55_v8  ;;  %v3265_v20 = vld [vmem:[%s4909_s2 + $0x1a8] ss:$16 sps:$4 sm:$0xff]   ;;  %v3295_v61 = vld [vmem:[%s4909_s2 + $0x24c] ss:$16 sps:$4 sm:$0xff]  }
  0x16   :  { %v66_v3 = vcombine.low %v44_v62, %v48_v0  ;;  %v3264_v16 = vld [vmem:[%s4909_s2 + $0x1a0] ss:$16 sps:$4 sm:$0xff]   ;;  %v60_v18 = vrot.slane %v31_v56, %v59_v12  ;;  %v64_v19 = vrot.slane %v31_v56, %v63_v13  ;;  %v3266_v21 = vld [vmem:[%s4909_s2 + $0x1c4] ss:$16 sps:$4 sm:$0xff]   ;;  %v3277_v42 = vld [vmem:[%s4909_s2 + $0x1e8] ss:$16 sps:$4 sm:$0xff]  }
  0x17   :  { %1726 = vmatpush1.bf16.msra.mxu0 %v3216_v22  ;;  %1890 = vmatpush1.bf16.msra.mxu1 %v3217_v23  ;;  %v73_v7 = vrot.slane %v65_v1, %v3911_v57  ;;  %v82_v22 = vcombine.low %v52_v11, %v56_v15  ;;  %v3268_v23 = vld [vmem:[%s4909_s2 + $0x1cc] ss:$16 sps:$4 sm:$0xff]   ;;  %v3292_v60 = vld [vmem:[%s4909_s2 + $0x244] ss:$16 sps:$4 sm:$0xff]   ;;  %v3290_v62 = vld [vmem:[%s4909_s2 + $0x240] ss:$16 sps:$4 sm:$0xff]  }
  0x18   :  { %1727 = vmatprep.subr.bf16.mxu0 %v3218_v24  ;;  %1891 = vmatprep.subr.bf16.mxu1 %v3220_v25  ;;  %v80_v10 = vrot.slane %v66_v3, %v3911_v57  ;;  %v83_v25 = vcombine.low %v60_v18, %v64_v19  ;;  %v3298_v0 = vld [vmem:[%s4909_s2 + $0x264] ss:$16 sps:$4 sm:$0xff]   ;;  %v3301_v1 = vld [vmem:[%s4909_s2 + $0x26c] ss:$16 sps:$4 sm:$0xff]   ;;  %v3299_v3 = vld [vmem:[%s4909_s2 + $0x268] ss:$16 sps:$4 sm:$0xff]  }
  0x19   :  { %v3304_v4 = vld [vmem:[%s4909_s2 + $0x284] ss:$16 sps:$4 sm:$0xff]   ;;  %v3311_v11 = vld [vmem:[%s4909_s2 + $0x2a8] ss:$16 sps:$4 sm:$0xff]   ;;  %v3319_v13 = vld [vmem:[%s4909_s2 + $0x2cc] ss:$16 sps:$4 sm:$0xff]  }
  0x1a   :  { %v81_v17 = vcombine.low %v73_v7, %v80_v10  ;;  %v3305_v7 = vld [vmem:[%s4909_s2 + $0x288] ss:$16 sps:$4 sm:$0xff]   ;;  %v3310_v8 = vld [vmem:[%s4909_s2 + $0x2a4] ss:$16 sps:$4 sm:$0xff]   ;;  %v3308_v10 = vld [vmem:[%s4909_s2 + $0x2a0] ss:$16 sps:$4 sm:$0xff]  }
  0x1b   :  { %1728 = vmatpush1.bf16.msra.mxu0 %v3222_v26  ;;  %1892 = vmatpush1.bf16.msra.mxu1 %v3223_v27  ;;  %v90_v26 = vrot.slane %v82_v22, %v3911_v57  ;;  %v3270_v27 = vld [vmem:[%s4909_s2 + $0x1c0] ss:$16 sps:$4 sm:$0xff]   ;;  %v3316_v12 = vld [vmem:[%s4909_s2 + $0x2c4] ss:$16 sps:$4 sm:$0xff]   ;;  %v3317_v15 = vld [vmem:[%s4909_s2 + $0x2c8] ss:$16 sps:$4 sm:$0xff]  }
  0x1c   :  { %1729 = vmatprep.subr.bf16.mxu0 %v3224_v28  ;;  %1893 = vmatprep.subr.bf16.mxu1 %v3226_v29  ;;  %v101_v24 = vadd.f32 %v81_v17, %v29_v14  ;;  %v3271_v28 = vld [vmem:[%s4909_s2 + $0x1c8] ss:$16 sps:$4 sm:$0xff]   ;;  %v3314_v14 = vld [vmem:[%s4909_s2 + $0x2c0] ss:$16 sps:$4 sm:$0xff]   ;;  %v3325_v17 = vld [vmem:[%s4909_s2 + $0x2ec] ss:$16 sps:$4 sm:$0xff]  }
  0x1d   :  { %v3320_v18 = vld [vmem:[%s4909_s2 + $0x2e0] ss:$16 sps:$4 sm:$0xff]   ;;  %v3323_v19 = vld [vmem:[%s4909_s2 + $0x2e8] ss:$16 sps:$4 sm:$0xff]  }
  0x1e   :  { %v103_v29 = vmax.f32 %v101_v24, 0.0  ;;  %v3326_v22 = vld [vmem:[%s4909_s2 + $0x300] ss:$16 sps:$4 sm:$0xff]   ;;  %v3334_v24 = vld [vmem:[%s4909_s2 + $0x324] ss:$16 sps:$4 sm:$0xff]  }
  0x1f   :  { %1730 = vmatpush1.bf16.msra.mxu0 %v3228_v30  ;;  %1894 = vmatpush1.bf16.msra.mxu1 %v3229_v31  ;;  %v97_v30 = vrot.slane %v83_v25, %v3911_v57  ;;  %v3272_v31 = vld [vmem:[%s4909_s2 + $0x1e4] ss:$16 sps:$4 sm:$0xff]   ;;  %v3337_v25 = vld [vmem:[%s4909_s2 + $0x32c] ss:$16 sps:$4 sm:$0xff]   ;;  %v3659_v40 = vld [vmem:[%s4912_s4 + $0x1f0] ss:$8 sps:$4 sm:$0xff]  }
  0x20   :  { %1731 = vmatprep.subr.bf16.mxu0 %v3230_v32  ;;  %1895 = vmatprep.subr.bf16.mxu1 %v3232_v33  ;;  %v30_v32 = vld [vmem:[%s4911_s0 + $0x8] sm:$0xff] }
  0x21   :  { %v3274_v33 = vld [vmem:[%s4909_s2 + $0x1ec] ss:$16 sps:$4 sm:$0xff]   ;;  %v98_v36 = vcombine.low %v90_v26, %v97_v30  ;;  %v3332_v26 = vld [vmem:[%s4909_s2 + $0x320] ss:$16 sps:$4 sm:$0xff]  }
  0x22   :  { %v3338_v30 = vld [vmem:[%s4909_s2 + $0x340] ss:$16 sps:$4 sm:$0xff]  }
  0x23   :  { %1732 = vmatpush1.bf16.msra.mxu0 %v3234_v34  ;;  %1896 = vmatpush1.bf16.msra.mxu1 %v3235_v35  ;;  %v107_v34 = vcombine.high %v103_v29, %v103_v29  ;;  %v114_v35 = vrot.slane %v103_v29, %v3911_v57  ;;  %v3985_v41 = vadd.f32 %v98_v36, %v30_v32  ;;  %v3343_v29 = vld [vmem:[%s4909_s2 + $0x34c] ss:$16 sps:$4 sm:$0xff]   ;;  %v3346_v32 = vld [vmem:[%s4909_s2 + $0x364] ss:$16 sps:$4 sm:$0xff]  }
  0x24   :  { %1733 = vmatprep.subr.bf16.mxu0 %v3236_v37  ;;  %1897 = vmatprep.subr.bf16.mxu1 %v3238_v38  ;;  %v3276_v37 = vld [vmem:[%s4909_s2 + $0x1e0] ss:$16 sps:$4 sm:$0xff]   ;;  %v3352_v36 = vld [vmem:[%s4909_s2 + $0x384] ss:$16 sps:$4 sm:$0xff]  }
  0x25   :  { %v122_v38 = vcombine.high %v114_v35, %v114_v35  ;;  %v149_v49 = vpack.c.bf16 %v114_v35, %v114_v35  ;;  %v3347_v35 = vld [vmem:[%s4909_s2 + $0x368] ss:$16 sps:$4 sm:$0xff]  }
  0x27   :  { %1734 = vmatpush1.bf16.msra.mxu0 %v3240_v39  ;;  %1898 = vmatpush1.bf16.msra.mxu1 %v3241_v43  ;;  %v3983_v39 = vrot.slane %v107_v34, %v3911_v57  ;;  %v3280_v43 = vld [vmem:[%s4909_s2 + $0x204] ss:$16 sps:$4 sm:$0xff]   ;;  %v3344_v34 = vld [vmem:[%s4909_s2 + $0x360] ss:$16 sps:$4 sm:$0xff]  }
  0x28   :  { %1735 = vmatprep.subr.bf16.mxu0 %v3242_v44  ;;  %1899 = vmatprep.subr.bf16.mxu1 %v3244_v45  ;;  %v150_v44 = vpack.c.bf16 %v122_v38, %v122_v38  ;;  %v3283_v45 = vld [vmem:[%s4909_s2 + $0x20c] ss:$16 sps:$4 sm:$0xff]   ;;  %v3350_v38 = vld [vmem:[%s4909_s2 + $0x380] ss:$16 sps:$4 sm:$0xff]  }
  0x2a   :  { %1747 = vmatprep.mubr.bf16.mxu0 %v150_v44  ;;  %1911 = vmatprep.mubr.bf16.mxu1 %v150_v44  ;;  %v3361_v44 = vld [vmem:[%s4909_s2 + $0x3ac] ss:$16 sps:$4 sm:$0xff]  }
  0x2b   :  { %1736 = vmatpush1.bf16.msra.mxu0 %v3246_v46  ;;  %1900 = vmatpush1.bf16.msra.mxu1 %v3247_v47  ;;  %v123_v46 = vcombine.high %v3983_v39, %v3983_v39  ;;  %v3278_v47 = vld [vmem:[%s4909_s2 + $0x200] ss:$16 sps:$4 sm:$0xff]  }
  0x2c   :  { %1737 = vmatprep.subr.bf16.mxu0 %v3248_v50  ;;  %1901 = vmatprep.subr.bf16.mxu1 %v3250_v53  ;;  %v3281_v50 = vld [vmem:[%s4909_s2 + $0x208] ss:$16 sps:$4 sm:$0xff]   ;;  %v3286_v53 = vld [vmem:[%s4909_s2 + $0x224] ss:$16 sps:$4 sm:$0xff]  }
  0x2d   :  { %v152_v56 = vpack.c.bf16 %v123_v46, %v123_v46  ;;  %v3359_v46 = vld [vmem:[%s4909_s2 + $0x3a8] ss:$16 sps:$4 sm:$0xff]  }
  0x2f   :  { %1738 = vmatpush1.bf16.msra.mxu0 %v3252_v55  ;;  %1902 = vmatpush1.bf16.msra.mxu1 %v3253_v58  ;;  %v3289_v55 = vld [vmem:[%s4909_s2 + $0x22c] ss:$16 sps:$4 sm:$0xff]   ;;  %v3284_v58 = vld [vmem:[%s4909_s2 + $0x220] ss:$16 sps:$4 sm:$0xff]  }
  0x30   :  { %1739 = vmatprep.subr.bf16.mxu0 %v3254_v59  ;;  %1903 = vmatprep.subr.bf16.mxu1 %v3256_v63  ;;  %v3287_v59 = vld [vmem:[%s4909_s2 + $0x228] ss:$16 sps:$4 sm:$0xff]  }
  0x31   :  { %v3293_v63 = vld [vmem:[%s4909_s2 + $0x248] ss:$16 sps:$4 sm:$0xff]  }
  0x33   :  { %1740 = vmatpush1.bf16.msra.mxu0 %v3258_v2  ;;  %1904 = vmatpush1.bf16.msra.mxu1 %v3259_v5  ;;  %v3296_v2 = vld [vmem:[%s4909_s2 + $0x260] ss:$16 sps:$4 sm:$0xff]   ;;  %v3307_v5 = vld [vmem:[%s4909_s2 + $0x28c] ss:$16 sps:$4 sm:$0xff]  }
  0x34   :  { %1741 = vmatprep.subr.bf16.mxu0 %v3260_v6  ;;  %1905 = vmatprep.subr.bf16.mxu1 %v3262_v9  ;;  %v3302_v6 = vld [vmem:[%s4909_s2 + $0x280] ss:$16 sps:$4 sm:$0xff]   ;;  %v3313_v9 = vld [vmem:[%s4909_s2 + $0x2ac] ss:$16 sps:$4 sm:$0xff]  }
  0x37   :  { %1742 = vmatpush1.bf16.msra.mxu0 %v3264_v16  ;;  %1906 = vmatpush1.bf16.msra.mxu1 %v3265_v20  ;;  %v3322_v16 = vld [vmem:[%s4909_s2 + $0x2e4] ss:$16 sps:$4 sm:$0xff]  }
  0x38   :  { %1743 = vmatprep.subr.bf16.mxu0 %v3266_v21  ;;  %1907 = vmatprep.subr.bf16.mxu1 %v3268_v23  ;;  %v3328_v20 = vld [vmem:[%s4909_s2 + $0x304] ss:$16 sps:$4 sm:$0xff]   ;;  %v3331_v21 = vld [vmem:[%s4909_s2 + $0x30c] ss:$16 sps:$4 sm:$0xff]   ;;  %v3329_v23 = vld [vmem:[%s4909_s2 + $0x308] ss:$16 sps:$4 sm:$0xff]  }
  0x3b   :  { %1744 = vmatpush1.bf16.msra.mxu0 %v3270_v27  ;;  %1908 = vmatpush1.bf16.msra.mxu1 %v3271_v28  ;;  %v3335_v27 = vld [vmem:[%s4909_s2 + $0x328] ss:$16 sps:$4 sm:$0xff]   ;;  %v3340_v28 = vld [vmem:[%s4909_s2 + $0x344] ss:$16 sps:$4 sm:$0xff]  }
  0x3c   :  { %1745 = vmatprep.subr.bf16.mxu0 %v3272_v31  ;;  %1909 = vmatprep.subr.bf16.mxu1 %v3274_v33  ;;  %v3341_v31 = vld [vmem:[%s4909_s2 + $0x348] ss:$16 sps:$4 sm:$0xff]   ;;  %v3349_v33 = vld [vmem:[%s4909_s2 + $0x36c] ss:$16 sps:$4 sm:$0xff]  }
  0x3f   :  { %1746 = vmatpush1.bf16.msra.mxu0 %v3276_v37  ;;  %1910 = vmatpush1.bf16.msra.mxu1 %v3277_v42  ;;  %v3355_v37 = vld [vmem:[%s4909_s2 + $0x38c] ss:$16 sps:$4 sm:$0xff]   ;;  %v3353_v42 = vld [vmem:[%s4909_s2 + $0x388] ss:$16 sps:$4 sm:$0xff]  }
  0x40   :  { %1756 = vmatprep.subr.bf16.mxu0 %v3280_v43  ;;  %1920 = vmatprep.subr.bf16.mxu1 %v3283_v45  ;;  %v3358_v43 = vld [vmem:[%s4909_s2 + $0x3a4] ss:$16 sps:$4 sm:$0xff]   ;;  %v3356_v45 = vld [vmem:[%s4909_s2 + $0x3a0] ss:$16 sps:$4 sm:$0xff]  }
  0x42   :  { %1748 = vmatmul.mubr.bf16.vlgmr.msra.gmra.mrb[0].mxu0 %v149_v49  ;;  %1912 = vmatmul.mubr.bf16.vlgmr.msra.gmra.mrb[0].mxu1 %v149_v49  ;;  %v3367_v49 = vld [vmem:[%s4909_s2 + $0x3cc] ss:$16 sps:$4 sm:$0xff]  }
  0x43   :  { %1757 = vmatpush1.bf16.msra.mxu0 %v3278_v47  ;;  %1921 = vmatpush1.bf16.msra.mxu1 %v3281_v50  ;;  %v3364_v47 = vld [vmem:[%s4909_s2 + $0x3c4] ss:$16 sps:$4 sm:$0xff]   ;;  %v4167_v50 = vmax.f32 %v3985_v41, 0.0  ;;  %v3373_v41 = vld [vmem:[%s4909_s2 + $0x3ec] ss:$16 sps:$4 sm:$0xff]  }
  0x44   :  { %1758 = vmatprep.subr.bf16.mxu0 %v3286_v53  ;;  %1922 = vmatprep.subr.bf16.mxu1 %v3289_v55  ;;  %v3362_v53 = vld [vmem:[%s4909_s2 + $0x3c0] ss:$16 sps:$4 sm:$0xff]   ;;  %v3365_v55 = vld [vmem:[%s4909_s2 + $0x3c8] ss:$16 sps:$4 sm:$0xff]  }
  0x45   :  { %1788 = vmatprep.mubr.bf16.mxu0 %v152_v56  ;;  %1952 = vmatprep.mubr.bf16.mxu1 %v152_v56  ;;  %v3370_v56 = vld [vmem:[%s4909_s2 + $0x3e4] ss:$16 sps:$4 sm:$0xff]  }
  0x47   :  { %1759 = vmatpush1.bf16.msra.mxu0 %v3284_v58  ;;  %1923 = vmatpush1.bf16.msra.mxu1 %v3287_v59  ;;  %v4183_v58 = vrot.slane %v4167_v50, %v3911_v57  ;;  %v3368_v59 = vld [vmem:[%s4909_s2 + $0x3e0] ss:$16 sps:$4 sm:$0xff]  }
  0x48   :  { %1760 = vmatprep.subr.bf16.mxu0 %v3292_v60  ;;  %1924 = vmatprep.subr.bf16.mxu1 %v3295_v61  ;;  %v3371_v60 = vld [vmem:[%s4909_s2 + $0x3e8] ss:$16 sps:$4 sm:$0xff]   ;;  %v3376_v61 = vld [vmem:[%s4909_s2 + $0x404] ss:$16 sps:$4 sm:$0xff]  }
  0x4b   :  { %1761 = vmatpush1.bf16.msra.mxu0 %v3290_v62  ;;  %1925 = vmatpush1.bf16.msra.mxu1 %v3293_v63  ;;  %v3379_v62 = vld [vmem:[%s4909_s2 + $0x40c] ss:$16 sps:$4 sm:$0xff]   ;;  %v139_v63 = vcombine.high %v4183_v58, %v4183_v58 }
  0x4c   :  { %1762 = vmatprep.subr.bf16.mxu0 %v3298_v0  ;;  %1926 = vmatprep.subr.bf16.mxu1 %v3301_v1  ;;  %v3374_v0 = vld [vmem:[%s4909_s2 + $0x400] ss:$16 sps:$4 sm:$0xff]   ;;  %v151_v1 = vpack.c.bf16 %v3983_v39, %v3983_v39 }
  0x4d   :  { %v3380_v39 = vld [vmem:[%s4909_s2 + $0x420] ss:$16 sps:$4 sm:$0xff]  }
  0x4f   :  { %1763 = vmatpush1.bf16.msra.mxu0 %v3296_v2  ;;  %1927 = vmatpush1.bf16.msra.mxu1 %v3299_v3  ;;  %v3377_v2 = vld [vmem:[%s4909_s2 + $0x408] ss:$16 sps:$4 sm:$0xff]   ;;  %v3382_v3 = vld [vmem:[%s4909_s2 + $0x424] ss:$16 sps:$4 sm:$0xff]  }
  0x50   :  { %1764 = vmatprep.subr.bf16.mxu0 %v3304_v4  ;;  %1928 = vmatprep.subr.bf16.mxu1 %v3307_v5  ;;  %v3385_v4 = vld [vmem:[%s4909_s2 + $0x42c] ss:$16 sps:$4 sm:$0xff]   ;;  %v154_v5 = vpack.c.bf16 %v139_v63, %v139_v63  ;;  %v3455_v63 = vld [vmem:[%s4909_s2 + $0x5a8] ss:$16 sps:$4 sm:$0xff]  }
  0x53   :  { %1765 = vmatpush1.bf16.msra.mxu0 %v3302_v6  ;;  %1929 = vmatpush1.bf16.msra.mxu1 %v3305_v7  ;;  %v3383_v6 = vld [vmem:[%s4909_s2 + $0x428] ss:$16 sps:$4 sm:$0xff]   ;;  %v3388_v7 = vld [vmem:[%s4909_s2 + $0x444] ss:$16 sps:$4 sm:$0xff]  }
  0x54   :  { %1766 = vmatprep.subr.bf16.mxu0 %v3310_v8  ;;  %1930 = vmatprep.subr.bf16.mxu1 %v3313_v9  ;;  %v3391_v8 = vld [vmem:[%s4909_s2 + $0x44c] ss:$16 sps:$4 sm:$0xff]   ;;  %v3386_v9 = vld [vmem:[%s4909_s2 + $0x440] ss:$16 sps:$4 sm:$0xff]  }
  0x57   :  { %1767 = vmatpush1.bf16.msra.mxu0 %v3308_v10  ;;  %1931 = vmatpush1.bf16.msra.mxu1 %v3311_v11  ;;  %v3389_v10 = vld [vmem:[%s4909_s2 + $0x448] ss:$16 sps:$4 sm:$0xff]   ;;  %v3394_v11 = vld [vmem:[%s4909_s2 + $0x464] ss:$16 sps:$4 sm:$0xff]  }
  0x58   :  { %1768 = vmatprep.subr.bf16.mxu0 %v3316_v12  ;;  %1932 = vmatprep.subr.bf16.mxu1 %v3319_v13  ;;  %v3397_v12 = vld [vmem:[%s4909_s2 + $0x46c] ss:$16 sps:$4 sm:$0xff]   ;;  %v3392_v13 = vld [vmem:[%s4909_s2 + $0x460] ss:$16 sps:$4 sm:$0xff]  }
  0x5b   :  { %1769 = vmatpush1.bf16.msra.mxu0 %v3314_v14  ;;  %1933 = vmatpush1.bf16.msra.mxu1 %v3317_v15  ;;  %v3395_v14 = vld [vmem:[%s4909_s2 + $0x468] ss:$16 sps:$4 sm:$0xff]   ;;  %v3400_v15 = vld [vmem:[%s4909_s2 + $0x484] ss:$16 sps:$4 sm:$0xff]  }
  0x5c   :  { %1770 = vmatprep.subr.bf16.mxu0 %v3322_v16  ;;  %1934 = vmatprep.subr.bf16.mxu1 %v3325_v17  ;;  %v3403_v16 = vld [vmem:[%s4909_s2 + $0x48c] ss:$16 sps:$4 sm:$0xff]   ;;  %v3398_v17 = vld [vmem:[%s4909_s2 + $0x480] ss:$16 sps:$4 sm:$0xff]  }
  0x5f   :  { %1771 = vmatpush1.bf16.msra.mxu0 %v3320_v18  ;;  %1935 = vmatpush1.bf16.msra.mxu1 %v3323_v19  ;;  %v3401_v18 = vld [vmem:[%s4909_s2 + $0x488] ss:$16 sps:$4 sm:$0xff]   ;;  %v3406_v19 = vld [vmem:[%s4909_s2 + $0x4a4] ss:$16 sps:$4 sm:$0xff]  }
  0x60   :  { %1772 = vmatprep.subr.bf16.mxu0 %v3328_v20  ;;  %1936 = vmatprep.subr.bf16.mxu1 %v3331_v21  ;;  %v3409_v20 = vld [vmem:[%s4909_s2 + $0x4ac] ss:$16 sps:$4 sm:$0xff]   ;;  %v3404_v21 = vld [vmem:[%s4909_s2 + $0x4a0] ss:$16 sps:$4 sm:$0xff]  }
  0x63   :  { %1773 = vmatpush1.bf16.msra.mxu0 %v3326_v22  ;;  %1937 = vmatpush1.bf16.msra.mxu1 %v3329_v23  ;;  %v3407_v22 = vld [vmem:[%s4909_s2 + $0x4a8] ss:$16 sps:$4 sm:$0xff]   ;;  %v3412_v23 = vld [vmem:[%s4909_s2 + $0x4c4] ss:$16 sps:$4 sm:$0xff]  }
  0x64   :  { %1774 = vmatprep.subr.bf16.mxu0 %v3334_v24  ;;  %1938 = vmatprep.subr.bf16.mxu1 %v3337_v25  ;;  %v3415_v24 = vld [vmem:[%s4909_s2 + $0x4cc] ss:$16 sps:$4 sm:$0xff]   ;;  %v3410_v25 = vld [vmem:[%s4909_s2 + $0x4c0] ss:$16 sps:$4 sm:$0xff]  }
  0x67   :  { %1775 = vmatpush1.bf16.msra.mxu0 %v3332_v26  ;;  %1939 = vmatpush1.bf16.msra.mxu1 %v3335_v27  ;;  %v3413_v26 = vld [vmem:[%s4909_s2 + $0x4c8] ss:$16 sps:$4 sm:$0xff]   ;;  %v3418_v27 = vld [vmem:[%s4909_s2 + $0x4e4] ss:$16 sps:$4 sm:$0xff]  }
  0x68   :  { %1776 = vmatprep.subr.bf16.mxu0 %v3340_v28  ;;  %1940 = vmatprep.subr.bf16.mxu1 %v3343_v29  ;;  %v3421_v28 = vld [vmem:[%s4909_s2 + $0x4ec] ss:$16 sps:$4 sm:$0xff]   ;;  %v3416_v29 = vld [vmem:[%s4909_s2 + $0x4e0] ss:$16 sps:$4 sm:$0xff]  }
  0x6b   :  { %1777 = vmatpush1.bf16.msra.mxu0 %v3338_v30  ;;  %1941 = vmatpush1.bf16.msra.mxu1 %v3341_v31  ;;  %v3419_v30 = vld [vmem:[%s4909_s2 + $0x4e8] ss:$16 sps:$4 sm:$0xff]   ;;  %v3424_v31 = vld [vmem:[%s4909_s2 + $0x504] ss:$16 sps:$4 sm:$0xff]  }
  0x6c   :  { %1778 = vmatprep.subr.bf16.mxu0 %v3346_v32  ;;  %1942 = vmatprep.subr.bf16.mxu1 %v3349_v33  ;;  %v3427_v32 = vld [vmem:[%s4909_s2 + $0x50c] ss:$16 sps:$4 sm:$0xff]   ;;  %v3422_v33 = vld [vmem:[%s4909_s2 + $0x500] ss:$16 sps:$4 sm:$0xff]  }
  0x6f   :  { %1779 = vmatpush1.bf16.msra.mxu0 %v3344_v34  ;;  %1943 = vmatpush1.bf16.msra.mxu1 %v3347_v35  ;;  %v3425_v34 = vld [vmem:[%s4909_s2 + $0x508] ss:$16 sps:$4 sm:$0xff]   ;;  %v3430_v35 = vld [vmem:[%s4909_s2 + $0x524] ss:$16 sps:$4 sm:$0xff]  }
  0x70   :  { %1780 = vmatprep.subr.bf16.mxu0 %v3352_v36  ;;  %1944 = vmatprep.subr.bf16.mxu1 %v3355_v37  ;;  %v3433_v36 = vld [vmem:[%s4909_s2 + $0x52c] ss:$16 sps:$4 sm:$0xff]   ;;  %v3428_v37 = vld [vmem:[%s4909_s2 + $0x520] ss:$16 sps:$4 sm:$0xff]  }
  0x73   :  { %1781 = vmatpush1.bf16.msra.mxu0 %v3350_v38  ;;  %1945 = vmatpush1.bf16.msra.mxu1 %v3353_v42  ;;  %v3431_v38 = vld [vmem:[%s4909_s2 + $0x528] ss:$16 sps:$4 sm:$0xff]   ;;  %v3436_v42 = vld [vmem:[%s4909_s2 + $0x544] ss:$16 sps:$4 sm:$0xff]  }
  0x74   :  { %1782 = vmatprep.subr.bf16.mxu0 %v3358_v43  ;;  %1946 = vmatprep.subr.bf16.mxu1 %v3361_v44  ;;  %v3439_v43 = vld [vmem:[%s4909_s2 + $0x54c] ss:$16 sps:$4 sm:$0xff]   ;;  %v3434_v44 = vld [vmem:[%s4909_s2 + $0x540] ss:$16 sps:$4 sm:$0xff]  }
  0x77   :  { %1783 = vmatpush1.bf16.msra.mxu0 %v3356_v45  ;;  %1947 = vmatpush1.bf16.msra.mxu1 %v3359_v46  ;;  %v3437_v45 = vld [vmem:[%s4909_s2 + $0x548] ss:$16 sps:$4 sm:$0xff]   ;;  %v3442_v46 = vld [vmem:[%s4909_s2 + $0x564] ss:$16 sps:$4 sm:$0xff]  }
  0x78   :  { %1784 = vmatprep.subr.bf16.mxu0 %v3364_v47  ;;  %1948 = vmatprep.subr.bf16.mxu1 %v3367_v49  ;;  %v3445_v47 = vld [vmem:[%s4909_s2 + $0x56c] ss:$16 sps:$4 sm:$0xff]   ;;  %v3440_v49 = vld [vmem:[%s4909_s2 + $0x560] ss:$16 sps:$4 sm:$0xff]  }
  0x7b   :  { %1785 = vmatpush1.bf16.msra.mxu0 %v3362_v53  ;;  %1949 = vmatpush1.bf16.msra.mxu1 %v3365_v55  ;;  %v3443_v53 = vld [vmem:[%s4909_s2 + $0x568] ss:$16 sps:$4 sm:$0xff]   ;;  %v3448_v55 = vld [vmem:[%s4909_s2 + $0x584] ss:$16 sps:$4 sm:$0xff]  }
  0x7c   :  { %1786 = vmatprep.subr.bf16.mxu0 %v3370_v56  ;;  %1950 = vmatprep.subr.bf16.mxu1 %v3373_v41  ;;  %v3451_v56 = vld [vmem:[%s4909_s2 + $0x58c] ss:$16 sps:$4 sm:$0xff]   ;;  %v3446_v41 = vld [vmem:[%s4909_s2 + $0x580] ss:$16 sps:$4 sm:$0xff]  }
  0x7f   :  { %1787 = vmatpush1.bf16.msra.mxu0 %v3368_v59  ;;  %1951 = vmatpush1.bf16.msra.mxu1 %v3371_v60  ;;  %v3449_v59 = vld [vmem:[%s4909_s2 + $0x588] ss:$16 sps:$4 sm:$0xff]   ;;  %v3454_v60 = vld [vmem:[%s4909_s2 + $0x5a4] ss:$16 sps:$4 sm:$0xff]  }
  0x80   :  { %1797 = vmatprep.subr.bf16.mxu0 %v3376_v61  ;;  %1961 = vmatprep.subr.bf16.mxu1 %v3379_v62  ;;  %v3457_v61 = vld [vmem:[%s4909_s2 + $0x5ac] ss:$16 sps:$4 sm:$0xff]   ;;  %v3452_v62 = vld [vmem:[%s4909_s2 + $0x5a0] ss:$16 sps:$4 sm:$0xff]  }
  0x82   :  { %1789 = vmatmul.mubr.bf16.vlgmr.msra.gmra.mrb[0].mxu0 %v151_v1  ;;  %1953 = vmatmul.mubr.bf16.vlgmr.msra.gmra.mrb[0].mxu1 %v151_v1  ;;  %v3463_v1 = vld [vmem:[%s4909_s2 + $0x5cc] ss:$16 sps:$4 sm:$0xff]  }
  0x83   :  { %1798 = vmatpush1.bf16.msra.mxu0 %v3374_v0  ;;  %1962 = vmatpush1.bf16.msra.mxu1 %v3377_v2  ;;  %v3460_v0 = vld [vmem:[%s4909_s2 + $0x5c4] ss:$16 sps:$4 sm:$0xff]   ;;  %v124_v2 = vcombine.high %v4167_v50, %v4167_v50  ;;  %v3469_v50 = vld [vmem:[%s4909_s2 + $0x5ec] ss:$16 sps:$4 sm:$0xff]  }
  0x84   :  { %1799 = vmatprep.subr.bf16.mxu0 %v3382_v3  ;;  %1963 = vmatprep.subr.bf16.mxu1 %v3385_v4  ;;  %v3458_v3 = vld [vmem:[%s4909_s2 + $0x5c0] ss:$16 sps:$4 sm:$0xff]   ;;  %v3461_v4 = vld [vmem:[%s4909_s2 + $0x5c8] ss:$16 sps:$4 sm:$0xff]  }
  0x85   :  { %1829 = vmatprep.mubr.bf16.mxu0 %v154_v5  ;;  %1993 = vmatprep.mubr.bf16.mxu1 %v154_v5  ;;  %v3466_v5 = vld [vmem:[%s4909_s2 + $0x5e4] ss:$16 sps:$4 sm:$0xff]  }
  0x87   :  { %1800 = vmatpush1.bf16.msra.mxu0 %v3380_v39  ;;  %1964 = vmatpush1.bf16.msra.mxu1 %v3383_v6  ;;  %v4384_v39 = vrot.slane %v124_v2, %v3911_v57  ;;  %v3464_v6 = vld [vmem:[%s4909_s2 + $0x5e0] ss:$16 sps:$4 sm:$0xff]   ;;  %v3475_v57 = vld [vmem:[%s4909_s2 + $0x60c] ss:$16 sps:$4 sm:$0xff]   ;;  %v3544_v2 = vld [vmem:[%s4909_s2 + $0x784] ss:$16 sps:$4 sm:$0xff]  }
  0x88   :  { %1801 = vmatprep.subr.bf16.mxu0 %v3388_v7  ;;  %1965 = vmatprep.subr.bf16.mxu1 %v3391_v8  ;;  %v3467_v7 = vld [vmem:[%s4909_s2 + $0x5e8] ss:$16 sps:$4 sm:$0xff]   ;;  %v3472_v8 = vld [vmem:[%s4909_s2 + $0x604] ss:$16 sps:$4 sm:$0xff]  }
  0x8b   :  { %1802 = vmatpush1.bf16.msra.mxu0 %v3386_v9  ;;  %1966 = vmatpush1.bf16.msra.mxu1 %v3389_v10  ;;  %v3470_v9 = vld [vmem:[%s4909_s2 + $0x600] ss:$16 sps:$4 sm:$0xff]   ;;  %v3473_v10 = vld [vmem:[%s4909_s2 + $0x608] ss:$16 sps:$4 sm:$0xff]  }
  0x8c   :  { %1803 = vmatprep.subr.bf16.mxu0 %v3394_v11  ;;  %1967 = vmatprep.subr.bf16.mxu1 %v3397_v12  ;;  %v140_v11 = vcombine.high %v4384_v39, %v4384_v39  ;;  %v153_v12 = vpack.c.bf16 %v4183_v58, %v4183_v58  ;;  %v3479_v58 = vld [vmem:[%s4909_s2 + $0x628] ss:$16 sps:$4 sm:$0xff]  }
  0x8f   :  { %1804 = vmatpush1.bf16.msra.mxu0 %v3392_v13  ;;  %1968 = vmatpush1.bf16.msra.mxu1 %v3395_v14  ;;  %v3478_v13 = vld [vmem:[%s4909_s2 + $0x624] ss:$16 sps:$4 sm:$0xff]   ;;  %v3481_v14 = vld [vmem:[%s4909_s2 + $0x62c] ss:$16 sps:$4 sm:$0xff]  }
  0x90   :  { %1805 = vmatprep.subr.bf16.mxu0 %v3400_v15  ;;  %1969 = vmatprep.subr.bf16.mxu1 %v3403_v16  ;;  %v3476_v15 = vld [vmem:[%s4909_s2 + $0x620] ss:$16 sps:$4 sm:$0xff]   ;;  %v156_v16 = vpack.c.bf16 %v140_v11, %v140_v11  ;;  %v3557_v11 = vld [vmem:[%s4909_s2 + $0x7c8] ss:$16 sps:$4 sm:$0xff]  }
  0x93   :  { %1806 = vmatpush1.bf16.msra.mxu0 %v3398_v17  ;;  %1970 = vmatpush1.bf16.msra.mxu1 %v3401_v18  ;;  %v3484_v17 = vld [vmem:[%s4909_s2 + $0x644] ss:$16 sps:$4 sm:$0xff]   ;;  %v3487_v18 = vld [vmem:[%s4909_s2 + $0x64c] ss:$16 sps:$4 sm:$0xff]  }
  0x94   :  { %1807 = vmatprep.subr.bf16.mxu0 %v3406_v19  ;;  %1971 = vmatprep.subr.bf16.mxu1 %v3409_v20  ;;  %v3482_v19 = vld [vmem:[%s4909_s2 + $0x640] ss:$16 sps:$4 sm:$0xff]   ;;  %v3485_v20 = vld [vmem:[%s4909_s2 + $0x648] ss:$16 sps:$4 sm:$0xff]  }
  0x97   :  { %1808 = vmatpush1.bf16.msra.mxu0 %v3404_v21  ;;  %1972 = vmatpush1.bf16.msra.mxu1 %v3407_v22  ;;  %v3490_v21 = vld [vmem:[%s4909_s2 + $0x664] ss:$16 sps:$4 sm:$0xff]   ;;  %v3493_v22 = vld [vmem:[%s4909_s2 + $0x66c] ss:$16 sps:$4 sm:$0xff]  }
  0x98   :  { %1809 = vmatprep.subr.bf16.mxu0 %v3412_v23  ;;  %1973 = vmatprep.subr.bf16.mxu1 %v3415_v24  ;;  %v3488_v23 = vld [vmem:[%s4909_s2 + $0x660] ss:$16 sps:$4 sm:$0xff]   ;;  %v3491_v24 = vld [vmem:[%s4909_s2 + $0x668] ss:$16 sps:$4 sm:$0xff]  }
  0x9b   :  { %1810 = vmatpush1.bf16.msra.mxu0 %v3410_v25  ;;  %1974 = vmatpush1.bf16.msra.mxu1 %v3413_v26  ;;  %v3496_v25 = vld [vmem:[%s4909_s2 + $0x684] ss:$16 sps:$4 sm:$0xff]   ;;  %v3499_v26 = vld [vmem:[%s4909_s2 + $0x68c] ss:$16 sps:$4 sm:$0xff]  }
  0x9c   :  { %1811 = vmatprep.subr.bf16.mxu0 %v3418_v27  ;;  %1975 = vmatprep.subr.bf16.mxu1 %v3421_v28  ;;  %v3494_v27 = vld [vmem:[%s4909_s2 + $0x680] ss:$16 sps:$4 sm:$0xff]   ;;  %v3497_v28 = vld [vmem:[%s4909_s2 + $0x688] ss:$16 sps:$4 sm:$0xff]  }
  0x9f   :  { %1812 = vmatpush1.bf16.msra.mxu0 %v3416_v29  ;;  %1976 = vmatpush1.bf16.msra.mxu1 %v3419_v30  ;;  %v3502_v29 = vld [vmem:[%s4909_s2 + $0x6a4] ss:$16 sps:$4 sm:$0xff]   ;;  %v3505_v30 = vld [vmem:[%s4909_s2 + $0x6ac] ss:$16 sps:$4 sm:$0xff]  }
  0xa0   :  { %1813 = vmatprep.subr.bf16.mxu0 %v3424_v31  ;;  %1977 = vmatprep.subr.bf16.mxu1 %v3427_v32  ;;  %v3500_v31 = vld [vmem:[%s4909_s2 + $0x6a0] ss:$16 sps:$4 sm:$0xff]   ;;  %v3503_v32 = vld [vmem:[%s4909_s2 + $0x6a8] ss:$16 sps:$4 sm:$0xff]  }
  0xa3   :  { %1814 = vmatpush1.bf16.msra.mxu0 %v3422_v33  ;;  %1978 = vmatpush1.bf16.msra.mxu1 %v3425_v34  ;;  %v3508_v33 = vld [vmem:[%s4909_s2 + $0x6c4] ss:$16 sps:$4 sm:$0xff]   ;;  %v3511_v34 = vld [vmem:[%s4909_s2 + $0x6cc] ss:$16 sps:$4 sm:$0xff]  }
  0xa4   :  { %1815 = vmatprep.subr.bf16.mxu0 %v3430_v35  ;;  %1979 = vmatprep.subr.bf16.mxu1 %v3433_v36  ;;  %v3506_v35 = vld [vmem:[%s4909_s2 + $0x6c0] ss:$16 sps:$4 sm:$0xff]   ;;  %v3509_v36 = vld [vmem:[%s4909_s2 + $0x6c8] ss:$16 sps:$4 sm:$0xff]  }
  0xa7   :  { %1816 = vmatpush1.bf16.msra.mxu0 %v3428_v37  ;;  %1980 = vmatpush1.bf16.msra.mxu1 %v3431_v38  ;;  %v3514_v37 = vld [vmem:[%s4909_s2 + $0x6e4] ss:$16 sps:$4 sm:$0xff]   ;;  %v3517_v38 = vld [vmem:[%s4909_s2 + $0x6ec] ss:$16 sps:$4 sm:$0xff]  }
  0xa8   :  { %1817 = vmatprep.subr.bf16.mxu0 %v3436_v42  ;;  %1981 = vmatprep.subr.bf16.mxu1 %v3439_v43  ;;  %v3512_v42 = vld [vmem:[%s4909_s2 + $0x6e0] ss:$16 sps:$4 sm:$0xff]   ;;  %v3515_v43 = vld [vmem:[%s4909_s2 + $0x6e8] ss:$16 sps:$4 sm:$0xff]  }
  0xab   :  { %1818 = vmatpush1.bf16.msra.mxu0 %v3434_v44  ;;  %1982 = vmatpush1.bf16.msra.mxu1 %v3437_v45  ;;  %v3520_v44 = vld [vmem:[%s4909_s2 + $0x704] ss:$16 sps:$4 sm:$0xff]   ;;  %v3523_v45 = vld [vmem:[%s4909_s2 + $0x70c] ss:$16 sps:$4 sm:$0xff]  }
  0xac   :  { %1819 = vmatprep.subr.bf16.mxu0 %v3442_v46  ;;  %1983 = vmatprep.subr.bf16.mxu1 %v3445_v47  ;;  %v3518_v46 = vld [vmem:[%s4909_s2 + $0x700] ss:$16 sps:$4 sm:$0xff]   ;;  %v3521_v47 = vld [vmem:[%s4909_s2 + $0x708] ss:$16 sps:$4 sm:$0xff]  }
  0xaf   :  { %1820 = vmatpush1.bf16.msra.mxu0 %v3440_v49  ;;  %1984 = vmatpush1.bf16.msra.mxu1 %v3443_v53  ;;  %v3526_v49 = vld [vmem:[%s4909_s2 + $0x724] ss:$16 sps:$4 sm:$0xff]   ;;  %v3529_v53 = vld [vmem:[%s4909_s2 + $0x72c] ss:$16 sps:$4 sm:$0xff]  }
  0xb0   :  { %1821 = vmatprep.subr.bf16.mxu0 %v3448_v55  ;;  %1985 = vmatprep.subr.bf16.mxu1 %v3451_v56  ;;  %v3524_v55 = vld [vmem:[%s4909_s2 + $0x720] ss:$16 sps:$4 sm:$0xff]   ;;  %v3527_v56 = vld [vmem:[%s4909_s2 + $0x728] ss:$16 sps:$4 sm:$0xff]  }
  0xb3   :  { %1822 = vmatpush1.bf16.msra.mxu0 %v3446_v41  ;;  %1986 = vmatpush1.bf16.msra.mxu1 %v3449_v59  ;;  %v3532_v41 = vld [vmem:[%s4909_s2 + $0x744] ss:$16 sps:$4 sm:$0xff]   ;;  %v3535_v59 = vld [vmem:[%s4909_s2 + $0x74c] ss:$16 sps:$4 sm:$0xff]  }
  0xb4   :  { %1823 = vmatprep.subr.bf16.mxu0 %v3454_v60  ;;  %1987 = vmatprep.subr.bf16.mxu1 %v3457_v61  ;;  %v3530_v60 = vld [vmem:[%s4909_s2 + $0x740] ss:$16 sps:$4 sm:$0xff]   ;;  %v3533_v61 = vld [vmem:[%s4909_s2 + $0x748] ss:$16 sps:$4 sm:$0xff]  }
  0xb7   :  { %1824 = vmatpush1.bf16.msra.mxu0 %v3452_v62  ;;  %1988 = vmatpush1.bf16.msra.mxu1 %v3455_v63  ;;  %v3538_v62 = vld [vmem:[%s4909_s2 + $0x764] ss:$16 sps:$4 sm:$0xff]   ;;  %v3541_v63 = vld [vmem:[%s4909_s2 + $0x76c] ss:$16 sps:$4 sm:$0xff]  }
  0xb8   :  { %1825 = vmatprep.subr.bf16.mxu0 %v3460_v0  ;;  %1989 = vmatprep.subr.bf16.mxu1 %v3463_v1  ;;  %v3536_v0 = vld [vmem:[%s4909_s2 + $0x760] ss:$16 sps:$4 sm:$0xff]   ;;  %v3539_v1 = vld [vmem:[%s4909_s2 + $0x768] ss:$16 sps:$4 sm:$0xff]  }
  0xbb   :  { %1826 = vmatpush1.bf16.msra.mxu0 %v3458_v3  ;;  %1990 = vmatpush1.bf16.msra.mxu1 %v3461_v4  ;;  %v3547_v3 = vld [vmem:[%s4909_s2 + $0x78c] ss:$16 sps:$4 sm:$0xff]   ;;  %v3542_v4 = vld [vmem:[%s4909_s2 + $0x780] ss:$16 sps:$4 sm:$0xff]  }
  0xbc   :  { %1827 = vmatprep.subr.bf16.mxu0 %v3466_v5  ;;  %1991 = vmatprep.subr.bf16.mxu1 %v3469_v50  ;;  %v3545_v5 = vld [vmem:[%s4909_s2 + $0x788] ss:$16 sps:$4 sm:$0xff]   ;;  %v3550_v50 = vld [vmem:[%s4909_s2 + $0x7a4] ss:$16 sps:$4 sm:$0xff]  }
  0xbf   :  { %1828 = vmatpush1.bf16.msra.mxu0 %v3464_v6  ;;  %1992 = vmatpush1.bf16.msra.mxu1 %v3467_v7  ;;  %v3553_v6 = vld [vmem:[%s4909_s2 + $0x7ac] ss:$16 sps:$4 sm:$0xff]   ;;  %v3548_v7 = vld [vmem:[%s4909_s2 + $0x7a0] ss:$16 sps:$4 sm:$0xff]  }
  0xc0   :  { %1838 = vmatprep.subr.bf16.mxu0 %v3472_v8  ;;  %2002 = vmatprep.subr.bf16.mxu1 %v3475_v57  ;;  %v3551_v8 = vld [vmem:[%s4909_s2 + $0x7a8] ss:$16 sps:$4 sm:$0xff]   ;;  %v3556_v57 = vld [vmem:[%s4909_s2 + $0x7c4] ss:$16 sps:$4 sm:$0xff]  }
  0xc2   :  { %1830 = vmatmul.mubr.bf16.vlgmr.msra.gmra.mrb[0].mxu0 %v153_v12  ;;  %1994 = vmatmul.mubr.bf16.vlgmr.msra.gmra.mrb[0].mxu1 %v153_v12  ;;  %v3562_v12 = vld [vmem:[%s4909_s2 + $0x7e4] ss:$16 sps:$4 sm:$0xff]  }
  0xc3   :  { %1839 = vmatpush1.bf16.msra.mxu0 %v3470_v9  ;;  %2003 = vmatpush1.bf16.msra.mxu1 %v3473_v10  ;;  %v3559_v9 = vld [vmem:[%s4909_s2 + $0x7cc] ss:$16 sps:$4 sm:$0xff]   ;;  %v3554_v10 = vld [vmem:[%s4909_s2 + $0x7c0] ss:$16 sps:$4 sm:$0xff]  }
  0xc4   :  { %1840 = vmatprep.subr.bf16.mxu0 %v3478_v13  ;;  %2004 = vmatprep.subr.bf16.mxu1 %v3481_v14  ;;  %v3565_v13 = vld [vmem:[%s4909_s2 + $0x7ec] ss:$16 sps:$4 sm:$0xff]   ;;  %v3560_v14 = vld [vmem:[%s4909_s2 + $0x7e0] ss:$16 sps:$4 sm:$0xff]  }
  0xc5   :  { %1870 = vmatprep.mubr.bf16.mxu0 %v156_v16  ;;  %2034 = vmatprep.mubr.bf16.mxu1 %v156_v16  ;;  %v155_v16 = vpack.c.bf16 %v4384_v39, %v4384_v39  ;;  %v3574_v39 = vld [vmem:[%s4912_s4 + $0x24] ss:$8 sps:$4 sm:$0xff]  }
  0xc7   :  { %1841 = vmatpush1.bf16.msra.mxu0 %v3476_v15  ;;  %2005 = vmatpush1.bf16.msra.mxu1 %v3479_v58  ;;  %v3563_v15 = vld [vmem:[%s4909_s2 + $0x7e8] ss:$16 sps:$4 sm:$0xff]   ;;  %v3568_v58 = vld [vmem:[%s4912_s4 + $0x4] ss:$8 sps:$4 sm:$0xff]  }
  0xc8   :  { %1842 = vmatprep.subr.bf16.mxu0 %v3484_v17  ;;  %2006 = vmatprep.subr.bf16.mxu1 %v3487_v18  ;;  %v3566_v17 = vld [vmem:[%s4912_s4] ss:$8 sps:$4 sm:$0xff]   ;;  %v3571_v18 = vld [vmem:[%s4912_s4 + $0x14] ss:$8 sps:$4 sm:$0xff]  }
  0xcb   :  { %1843 = vmatpush1.bf16.msra.mxu0 %v3482_v19  ;;  %2007 = vmatpush1.bf16.msra.mxu1 %v3485_v20  ;;  %v3569_v19 = vld [vmem:[%s4912_s4 + $0x10] ss:$8 sps:$4 sm:$0xff]   ;;  %v3572_v20 = vld [vmem:[%s4912_s4 + $0x20] ss:$8 sps:$4 sm:$0xff]  }
  0xcc   :  { %1844 = vmatprep.subr.bf16.mxu0 %v3490_v21  ;;  %2008 = vmatprep.subr.bf16.mxu1 %v3493_v22  ;;  %v3577_v21 = vld [vmem:[%s4912_s4 + $0x34] ss:$8 sps:$4 sm:$0xff]   ;;  %v3575_v22 = vld [vmem:[%s4912_s4 + $0x30] ss:$8 sps:$4 sm:$0xff]  }
  0xcf   :  { %1845 = vmatpush1.bf16.msra.mxu0 %v3488_v23  ;;  %2009 = vmatpush1.bf16.msra.mxu1 %v3491_v24  ;;  %v3580_v23 = vld [vmem:[%s4912_s4 + $0x44] ss:$8 sps:$4 sm:$0xff]   ;;  %v3578_v24 = vld [vmem:[%s4912_s4 + $0x40] ss:$8 sps:$4 sm:$0xff]  }
  0xd0   :  { %1846 = vmatprep.subr.bf16.mxu0 %v3496_v25  ;;  %2010 = vmatprep.subr.bf16.mxu1 %v3499_v26  ;;  %v3583_v25 = vld [vmem:[%s4912_s4 + $0x54] ss:$8 sps:$4 sm:$0xff]   ;;  %v3581_v26 = vld [vmem:[%s4912_s4 + $0x50] ss:$8 sps:$4 sm:$0xff]  }
  0xd3   :  { %1847 = vmatpush1.bf16.msra.mxu0 %v3494_v27  ;;  %2011 = vmatpush1.bf16.msra.mxu1 %v3497_v28  ;;  %v3586_v27 = vld [vmem:[%s4912_s4 + $0x64] ss:$8 sps:$4 sm:$0xff]   ;;  %v3584_v28 = vld [vmem:[%s4912_s4 + $0x60] ss:$8 sps:$4 sm:$0xff]  }
  0xd4   :  { %1848 = vmatprep.subr.bf16.mxu0 %v3502_v29  ;;  %2012 = vmatprep.subr.bf16.mxu1 %v3505_v30  ;;  %v3589_v29 = vld [vmem:[%s4912_s4 + $0x74] ss:$8 sps:$4 sm:$0xff]   ;;  %v3587_v30 = vld [vmem:[%s4912_s4 + $0x70] ss:$8 sps:$4 sm:$0xff]  }
  0xd7   :  { %1849 = vmatpush1.bf16.msra.mxu0 %v3500_v31  ;;  %2013 = vmatpush1.bf16.msra.mxu1 %v3503_v32  ;;  %v3592_v31 = vld [vmem:[%s4912_s4 + $0x84] ss:$8 sps:$4 sm:$0xff]   ;;  %v3590_v32 = vld [vmem:[%s4912_s4 + $0x80] ss:$8 sps:$4 sm:$0xff]  }
  0xd8   :  { %1850 = vmatprep.subr.bf16.mxu0 %v3508_v33  ;;  %2014 = vmatprep.subr.bf16.mxu1 %v3511_v34  ;;  %v3595_v33 = vld [vmem:[%s4912_s4 + $0x94] ss:$8 sps:$4 sm:$0xff]   ;;  %v3593_v34 = vld [vmem:[%s4912_s4 + $0x90] ss:$8 sps:$4 sm:$0xff]  }
  0xdb   :  { %1851 = vmatpush1.bf16.msra.mxu0 %v3506_v35  ;;  %2015 = vmatpush1.bf16.msra.mxu1 %v3509_v36  ;;  %v3598_v35 = vld [vmem:[%s4912_s4 + $0xa4] ss:$8 sps:$4 sm:$0xff]   ;;  %v3596_v36 = vld [vmem:[%s4912_s4 + $0xa0] ss:$8 sps:$4 sm:$0xff]  }
  0xdc   :  { %1852 = vmatprep.subr.bf16.mxu0 %v3514_v37  ;;  %2016 = vmatprep.subr.bf16.mxu1 %v3517_v38  ;;  %v3601_v37 = vld [vmem:[%s4912_s4 + $0xb4] ss:$8 sps:$4 sm:$0xff]   ;;  %v3599_v38 = vld [vmem:[%s4912_s4 + $0xb0] ss:$8 sps:$4 sm:$0xff]  }
  0xdf   :  { %1853 = vmatpush1.bf16.msra.mxu0 %v3512_v42  ;;  %2017 = vmatpush1.bf16.msra.mxu1 %v3515_v43  ;;  %v3604_v42 = vld [vmem:[%s4912_s4 + $0xc4] ss:$8 sps:$4 sm:$0xff]   ;;  %v3602_v43 = vld [vmem:[%s4912_s4 + $0xc0] ss:$8 sps:$4 sm:$0xff]  }
  0xe0   :  { %1854 = vmatprep.subr.bf16.mxu0 %v3520_v44  ;;  %2018 = vmatprep.subr.bf16.mxu1 %v3523_v45  ;;  %v3607_v44 = vld [vmem:[%s4912_s4 + $0xd4] ss:$8 sps:$4 sm:$0xff]   ;;  %v3605_v45 = vld [vmem:[%s4912_s4 + $0xd0] ss:$8 sps:$4 sm:$0xff]  }
  0xe3   :  { %1855 = vmatpush1.bf16.msra.mxu0 %v3518_v46  ;;  %2019 = vmatpush1.bf16.msra.mxu1 %v3521_v47  ;;  %v3610_v46 = vld [vmem:[%s4912_s4 + $0xe4] ss:$8 sps:$4 sm:$0xff]   ;;  %v3608_v47 = vld [vmem:[%s4912_s4 + $0xe0] ss:$8 sps:$4 sm:$0xff]  }
  0xe4   :  { %1856 = vmatprep.subr.bf16.mxu0 %v3526_v49  ;;  %2020 = vmatprep.subr.bf16.mxu1 %v3529_v53  ;;  %v3613_v49 = vld [vmem:[%s4912_s4 + $0xf4] ss:$8 sps:$4 sm:$0xff]   ;;  %v3611_v53 = vld [vmem:[%s4912_s4 + $0xf0] ss:$8 sps:$4 sm:$0xff]  }
  0xe7   :  { %1857 = vmatpush1.bf16.msra.mxu0 %v3524_v55  ;;  %2021 = vmatpush1.bf16.msra.mxu1 %v3527_v56  ;;  %v3616_v55 = vld [vmem:[%s4912_s4 + $0x104] ss:$8 sps:$4 sm:$0xff]   ;;  %v3662_v56 = vld [vmem:[%s4913_s6] ss:$8 sps:$4 sm:$0xff]  }
  0xe8   :  { %1858 = vmatprep.subr.bf16.mxu0 %v3532_v41  ;;  %2022 = vmatprep.subr.bf16.mxu1 %v3535_v59  ;;  %v3664_v41 = vld [vmem:[%s4913_s6 + $0x4] ss:$8 sps:$4 sm:$0xff]   ;;  %v3667_v59 = vld [vmem:[%s4913_s6 + $0x14] ss:$8 sps:$4 sm:$0xff]  }
  0xeb   :  { %1859 = vmatpush1.bf16.msra.mxu0 %v3530_v60  ;;  %2023 = vmatpush1.bf16.msra.mxu1 %v3533_v61  ;;  %v3665_v60 = vld [vmem:[%s4913_s6 + $0x10] ss:$8 sps:$4 sm:$0xff]   ;;  %v3670_v61 = vld [vmem:[%s4913_s6 + $0x24] ss:$8 sps:$4 sm:$0xff]  }
  0xec   :  { %1860 = vmatprep.subr.bf16.mxu0 %v3538_v62  ;;  %2024 = vmatprep.subr.bf16.mxu1 %v3541_v63  ;;  %v3668_v62 = vld [vmem:[%s4913_s6 + $0x20] ss:$8 sps:$4 sm:$0xff]   ;;  %v3673_v63 = vld [vmem:[%s4913_s6 + $0x34] ss:$8 sps:$4 sm:$0xff]  }
  0xef   :  { %1861 = vmatpush1.bf16.msra.mxu0 %v3536_v0  ;;  %2025 = vmatpush1.bf16.msra.mxu1 %v3539_v1  ;;  %v3671_v0 = vld [vmem:[%s4913_s6 + $0x30] ss:$8 sps:$4 sm:$0xff]   ;;  %v3676_v1 = vld [vmem:[%s4913_s6 + $0x44] ss:$8 sps:$4 sm:$0xff]  }
  0xf0   :  { %1862 = vmatprep.subr.bf16.mxu0 %v3544_v2  ;;  %2026 = vmatprep.subr.bf16.mxu1 %v3547_v3  ;;  %v3674_v2 = vld [vmem:[%s4913_s6 + $0x40] ss:$8 sps:$4 sm:$0xff]   ;;  %v3679_v3 = vld [vmem:[%s4913_s6 + $0x54] ss:$8 sps:$4 sm:$0xff]  }
  0xf3   :  { %1863 = vmatpush1.bf16.msra.mxu0 %v3542_v4  ;;  %2027 = vmatpush1.bf16.msra.mxu1 %v3545_v5  ;;  %v3677_v4 = vld [vmem:[%s4913_s6 + $0x50] ss:$8 sps:$4 sm:$0xff]   ;;  %v3682_v5 = vld [vmem:[%s4913_s6 + $0x64] ss:$8 sps:$4 sm:$0xff]  }
  0xf4   :  { %1864 = vmatprep.subr.bf16.mxu0 %v3550_v50  ;;  %2028 = vmatprep.subr.bf16.mxu1 %v3553_v6  ;;  %v3680_v50 = vld [vmem:[%s4913_s6 + $0x60] ss:$8 sps:$4 sm:$0xff]   ;;  %v3685_v6 = vld [vmem:[%s4913_s6 + $0x74] ss:$8 sps:$4 sm:$0xff]  }
  0xf7   :  { %1865 = vmatpush1.bf16.msra.mxu0 %v3548_v7  ;;  %2029 = vmatpush1.bf16.msra.mxu1 %v3551_v8  ;;  %v3683_v7 = vld [vmem:[%s4913_s6 + $0x70] ss:$8 sps:$4 sm:$0xff]   ;;  %v3688_v8 = vld [vmem:[%s4913_s6 + $0x84] ss:$8 sps:$4 sm:$0xff]  }
  0xf8   :  { %1866 = vmatprep.subr.bf16.mxu0 %v3556_v57  ;;  %2030 = vmatprep.subr.bf16.mxu1 %v3559_v9  ;;  %v3686_v57 = vld [vmem:[%s4913_s6 + $0x80] ss:$8 sps:$4 sm:$0xff]   ;;  %v3691_v9 = vld [vmem:[%s4913_s6 + $0x94] ss:$8 sps:$4 sm:$0xff]  }
  0xfb   :  { %1867 = vmatpush1.bf16.msra.mxu0 %v3554_v10  ;;  %2031 = vmatpush1.bf16.msra.mxu1 %v3557_v11  ;;  %v3689_v10 = vld [vmem:[%s4913_s6 + $0x90] ss:$8 sps:$4 sm:$0xff]   ;;  %v3694_v11 = vld [vmem:[%s4913_s6 + $0xa4] ss:$8 sps:$4 sm:$0xff]  }
  0xfc   :  { %1868 = vmatprep.subr.bf16.mxu0 %v3562_v12  ;;  %2032 = vmatprep.subr.bf16.mxu1 %v3565_v13  ;;  %v3692_v12 = vld [vmem:[%s4913_s6 + $0xa0] ss:$8 sps:$4 sm:$0xff]   ;;  %v3697_v13 = vld [vmem:[%s4913_s6 + $0xb4] ss:$8 sps:$4 sm:$0xff]  }
  0xff   :  { %1869 = vmatpush1.bf16.msra.mxu0 %v3560_v14  ;;  %2033 = vmatpush1.bf16.msra.mxu1 %v3563_v15  ;;  %v3695_v14 = vld [vmem:[%s4913_s6 + $0xb0] ss:$8 sps:$4 sm:$0xff]   ;;  %v3700_v15 = vld [vmem:[%s4913_s6 + $0xc4] ss:$8 sps:$4 sm:$0xff]  }
 0x100   :  { %2447 = vmatprep.subr.bf16.mxu0 %v3568_v58  ;;  %2737 = vmatprep.subr.bf16.mxu1 %v3664_v41  ;;  %v4767_v58 = vld [vmem:[%s4914_s3] sm:$0xf] }
 0x101   :  { %v3632_v41 = vld [vmem:[%s4912_s4 + $0x160] ss:$8 sps:$4 sm:$0xff]  }
 0x102   :  { %1871 = vmatmul.mubr.bf16.vlgmr.msra.gmra.mrb[0].mxu0 %v155_v16  ;;  %2035 = vmatmul.mubr.bf16.vlgmr.msra.gmra.mrb[0].mxu1 %v155_v16  ;;  %v3698_v16 = vld [vmem:[%s4913_s6 + $0xc0] ss:$8 sps:$4 sm:$0xff]  }
 0x103   :  { %2448 = vmatpush1.bf16.msra.mxu0 %v3566_v17  ;;  %2738 = vmatpush1.bf16.msra.mxu1 %v3662_v56  ;;  %v3703_v17 = vld [vmem:[%s4913_s6 + $0xd4] ss:$8 sps:$4 sm:$0xff]   ;;  %v3634_v56 = vld [vmem:[%s4912_s4 + $0x164] ss:$8 sps:$4 sm:$0xff]  }
 0x104   :  { %2449 = vmatprep.subr.bf16.mxu0 %v3571_v18  ;;  %2739 = vmatprep.subr.bf16.mxu1 %v3667_v59  ;;  %v418_v18 = vrot.slane %v4767_v58, %v3891_v48  ;;  %v3637_v59 = vld [vmem:[%s4912_s4 + $0x174] ss:$8 sps:$4 sm:$0xff]  }
 0x107   :  { %2450 = vmatpush1.bf16.msra.mxu0 %v3569_v19  ;;  %2740 = vmatpush1.bf16.msra.mxu1 %v3665_v60  ;;  %v422_v19 = vrot.slane %v4767_v58, %v3897_v51  ;;  %v3635_v60 = vld [vmem:[%s4912_s4 + $0x170] ss:$8 sps:$4 sm:$0xff]  }
 0x108   :  { %2451 = vmatprep.subr.bf16.mxu0 %v3574_v39  ;;  %2741 = vmatprep.subr.bf16.mxu1 %v3670_v61  ;;  %v430_v39 = vrot.slane %v4767_v58, %v47_v54  ;;  %v3640_v61 = vld [vmem:[%s4912_s4 + $0x184] ss:$8 sps:$4 sm:$0xff]  }
 0x10b   :  { %2452 = vmatpush1.bf16.msra.mxu0 %v3572_v20  ;;  %2742 = vmatpush1.bf16.msra.mxu1 %v3668_v62  ;;  %v3701_v20 = vld [vmem:[%s4913_s6 + $0xd0] ss:$8 sps:$4 sm:$0xff]   ;;  %v3638_v62 = vld [vmem:[%s4912_s4 + $0x180] ss:$8 sps:$4 sm:$0xff]  }
 0x10c   :  { %2453 = vmatprep.subr.bf16.mxu0 %v3577_v21  ;;  %2743 = vmatprep.subr.bf16.mxu1 %v3673_v63  ;;  %v3643_v63 = vld [vmem:[%s4912_s4 + $0x194] ss:$8 sps:$4 sm:$0xff]  }
 0x10f   :  { %2454 = vmatpush1.bf16.msra.mxu0 %v3575_v22  ;;  %2744 = vmatpush1.bf16.msra.mxu1 %v3671_v0  ;;  %v3641_v0 = vld [vmem:[%s4912_s4 + $0x190] ss:$8 sps:$4 sm:$0xff]  }
 0x110   :  { %2455 = vmatprep.subr.bf16.mxu0 %v3580_v23  ;;  %2745 = vmatprep.subr.bf16.mxu1 %v3676_v1  ;;  %v3646_v1 = vld [vmem:[%s4912_s4 + $0x1a4] ss:$8 sps:$4 sm:$0xff]  }
 0x113   :  { %2456 = vmatpush1.bf16.msra.mxu0 %v3578_v24  ;;  %2746 = vmatpush1.bf16.msra.mxu1 %v3674_v2  ;;  %v3644_v2 = vld [vmem:[%s4912_s4 + $0x1a0] ss:$8 sps:$4 sm:$0xff]  }
 0x114   :  { %2457 = vmatprep.subr.bf16.mxu0 %v3583_v25  ;;  %2747 = vmatprep.subr.bf16.mxu1 %v3679_v3  ;;  %v3649_v3 = vld [vmem:[%s4912_s4 + $0x1b4] ss:$8 sps:$4 sm:$0xff]  }
 0x117   :  { %2458 = vmatpush1.bf16.msra.mxu0 %v3581_v26  ;;  %2748 = vmatpush1.bf16.msra.mxu1 %v3677_v4  ;;  %v3647_v4 = vld [vmem:[%s4912_s4 + $0x1b0] ss:$8 sps:$4 sm:$0xff]  }
 0x118   :  { %2459 = vmatprep.subr.bf16.mxu0 %v3586_v27  ;;  %2749 = vmatprep.subr.bf16.mxu1 %v3682_v5  ;;  %v3652_v5 = vld [vmem:[%s4912_s4 + $0x1c4] ss:$8 sps:$4 sm:$0xff]  }
 0x11b   :  { %2460 = vmatpush1.bf16.msra.mxu0 %v3584_v28  ;;  %2750 = vmatpush1.bf16.msra.mxu1 %v3680_v50  ;;  %v3650_v50 = vld [vmem:[%s4912_s4 + $0x1c0] ss:$8 sps:$4 sm:$0xff]  }
 0x11c   :  { %2461 = vmatprep.subr.bf16.mxu0 %v3589_v29  ;;  %2751 = vmatprep.subr.bf16.mxu1 %v3685_v6  ;;  %v3655_v6 = vld [vmem:[%s4912_s4 + $0x1d4] ss:$8 sps:$4 sm:$0xff]  }
 0x11f   :  { %2462 = vmatpush1.bf16.msra.mxu0 %v3587_v30  ;;  %2752 = vmatpush1.bf16.msra.mxu1 %v3683_v7  ;;  %v3653_v7 = vld [vmem:[%s4912_s4 + $0x1d0] ss:$8 sps:$4 sm:$0xff]  }
 0x120   :  { %2463 = vmatprep.subr.bf16.mxu0 %v3592_v31  ;;  %2753 = vmatprep.subr.bf16.mxu1 %v3688_v8  ;;  %v426_v8 = vrot.slane %v4767_v58, %v43_v52  ;;  %v3707_v58 = vld [vmem:[%s4913_s6 + $0xf0] ss:$8 sps:$4 sm:$0xff]  }
 0x123   :  { %2464 = vmatpush1.bf16.msra.mxu0 %v3590_v32  ;;  %2754 = vmatpush1.bf16.msra.mxu1 %v3686_v57  ;;  %v3658_v57 = vld [vmem:[%s4912_s4 + $0x1e4] ss:$8 sps:$4 sm:$0xff]  }
 0x124   :  { %2465 = vmatprep.subr.bf16.mxu0 %v3595_v33  ;;  %2755 = vmatprep.subr.bf16.mxu1 %v3691_v9  ;;  %v3656_v9 = vld [vmem:[%s4912_s4 + $0x1e0] ss:$8 sps:$4 sm:$0xff]  }
 0x127   :  { %2466 = vmatpush1.bf16.msra.mxu0 %v3593_v34  ;;  %2756 = vmatpush1.bf16.msra.mxu1 %v3689_v10 }
 0x128   :  { %2467 = vmatprep.subr.bf16.mxu0 %v3598_v35  ;;  %2757 = vmatprep.subr.bf16.mxu1 %v3694_v11  ;;  %v3614_v35 = vld [vmem:[%s4912_s4 + $0x100] ss:$8 sps:$4 sm:$0xff]   ;;  %v3661_v11 = vld [vmem:[%s4912_s4 + $0x1f4] ss:$8 sps:$4 sm:$0xff]  }
 0x12b   :  { %2468 = vmatpush1.bf16.msra.mxu0 %v3596_v36  ;;  %2758 = vmatpush1.bf16.msra.mxu1 %v3692_v12 }
 0x12c   :  { %2469 = vmatprep.subr.bf16.mxu0 %v3601_v37  ;;  %2759 = vmatprep.subr.bf16.mxu1 %v3697_v13  ;;  %v3619_v37 = vld [vmem:[%s4912_s4 + $0x114] ss:$8 sps:$4 sm:$0xff]   ;;  %v3706_v13 = vld [vmem:[%s4913_s6 + $0xe4] ss:$8 sps:$4 sm:$0xff]  }
 0x12f   :  { %2470 = vmatpush1.bf16.msra.mxu0 %v3599_v38  ;;  %2760 = vmatpush1.bf16.msra.mxu1 %v3695_v14  ;;  %v3704_v14 = vld [vmem:[%s4913_s6 + $0xe0] ss:$8 sps:$4 sm:$0xff]  }
 0x130   :  { %2471 = vmatprep.subr.bf16.mxu0 %v3604_v42  ;;  %2761 = vmatprep.subr.bf16.mxu1 %v3700_v15  ;;  %v3617_v42 = vld [vmem:[%s4912_s4 + $0x110] ss:$8 sps:$4 sm:$0xff]   ;;  %v3709_v15 = vld [vmem:[%s4913_s6 + $0xf4] ss:$8 sps:$4 sm:$0xff]  }
 0x133   :  { %2472 = vmatpush1.bf16.msra.mxu0 %v3602_v43  ;;  %2762 = vmatpush1.bf16.msra.mxu1 %v3698_v16  ;;  %v3622_v43 = vld [vmem:[%s4912_s4 + $0x124] ss:$8 sps:$4 sm:$0xff]   ;;  %v2115_v16 = vld [vmem:[%s4915_s5] sm:$0x3] }
 0x134   :  { %2473 = vmatprep.subr.bf16.mxu0 %v3607_v44  ;;  %2763 = vmatprep.subr.bf16.mxu1 %v3703_v17  ;;  %v3620_v44 = vld [vmem:[%s4912_s4 + $0x120] ss:$8 sps:$4 sm:$0xff]   ;;  %v2120_v17 = vrot.slane %v2115_v16, %v3891_v48 }
 0x137   :  { %2474 = vmatpush1.bf16.msra.mxu0 %v3605_v45  ;;  %2764 = vmatpush1.bf16.msra.mxu1 %v3701_v20  ;;  %v3625_v45 = vld [vmem:[%s4912_s4 + $0x134] ss:$8 sps:$4 sm:$0xff]  }
 0x138   :  { %2475 = vmatprep.subr.bf16.mxu0 %v3610_v46  ;;  %v3623_v46 = vld [vmem:[%s4912_s4 + $0x130] ss:$8 sps:$4 sm:$0xff]   ;;  %2765 = vmatprep.subr.bf16.mxu1 %v3706_v13 }
 0x13b   :  { %2476 = vmatpush1.bf16.msra.mxu0 %v3608_v47  ;;  %v3628_v47 = vld [vmem:[%s4912_s4 + $0x144] ss:$8 sps:$4 sm:$0xff]   ;;  %2766 = vmatpush1.bf16.msra.mxu1 %v3704_v14 }
 0x13c   :  { %2477 = vmatprep.subr.bf16.mxu0 %v3613_v49  ;;  %v3626_v49 = vld [vmem:[%s4912_s4 + $0x140] ss:$8 sps:$4 sm:$0xff]   ;;  %2767 = vmatprep.subr.bf16.mxu1 %v3709_v15 }
 0x13f   :  { %2478 = vmatpush1.bf16.msra.mxu0 %v3611_v53  ;;  %v3631_v53 = vld [vmem:[%s4912_s4 + $0x154] ss:$8 sps:$4 sm:$0xff]   ;;  %2768 = vmatpush1.bf16.msra.mxu1 %v3707_v58 }
 0x140   :  { %2488 = vmatprep.subr.bf16.mxu0 %v3616_v55  ;;  %v3629_v55 = vld [vmem:[%s4912_s4 + $0x150] ss:$8 sps:$4 sm:$0xff]  }
 0x1d5   :  { %v1872_v21 = vpop.f32.mrb[0].mxu0  ;;  %v4785_v22 = vpop.f32.mrb[0].mxu1 }
 0x1d6   :  { %v3147_v23 = vadd.f32 %v1872_v21, %v418_v18  ;;  %v1874_v24 = vpop.f32.mrb[1].mxu0  ;;  %v2038_v25 = vpop.f32.mrb[1].mxu1  ;;  %v3149_v10 = vadd.f32 %v4785_v22, %v426_v8  ;;  %v2124_v18 = vrot.slane %v2115_v16, %v3897_v51 }
 0x1d7   :  { %v3148_v26 = vadd.f32 %v1874_v24, %v422_v19  ;;  %v3150_v27 = vadd.f32 %v2038_v25, %v430_v39  ;;  %v1876_v28 = vpop.f32.mrb[2].mxu0  ;;  %v2040_v29 = vpop.f32.mrb[2].mxu1 }
 0x1d8   :  { %v2043_v30 = vmax.f32 %v3147_v23, 0.0  ;;  %v1877_v31 = vpop.f32.mrb[3].mxu0  ;;  %v2041_v54 = vpop.f32.mrb[3].mxu1  ;;  %v2045_v52 = vmax.f32 %v3149_v10, 0.0  ;;  %v2565_v28 = vld [vmem:[%s4916_s7] sm:$0x3] }
 0x1d9   :  { %v2044_v32 = vmax.f32 %v3148_v26, 0.0  ;;  %v2046_v33 = vmax.f32 %v3150_v27, 0.0  ;;  %v2570_v29 = vrot.slane %v2565_v28, %v3891_v48 }
 0x1da   :  { %v2047_v36 = vpack.c.bf16 %v2043_v30, %v2043_v30  ;;  %v2049_v12 = vpack.c.bf16 %v2045_v52, %v2045_v52  ;;  %v2574_v30 = vrot.slane %v2565_v28, %v3897_v51 }
 0x1db   :  { %v2048_v34 = vpack.c.bf16 %v2044_v32, %v2044_v32  ;;  %v2050_v38 = vpack.c.bf16 %v2046_v33, %v2046_v33 }
 0x1dd   :  { %2479 = vmatprep.mubr.bf16.mxu0 %v2048_v34 }
 0x1de   :  { %2480 = vmatmul.mubr.bf16.vlgmr.msra.gmra.mrb[4].mxu0 %v2047_v36 }
 0x1df   :  { %2489 = vmatpush1.bf16.msra.mxu0 %v3614_v35  ;;  %2520 = vmatprep.mubr.bf16.mxu0 %v2050_v38 }
 0x1e0   :  { %2490 = vmatprep.subr.bf16.mxu0 %v3619_v37 }
 0x1e3   :  { %2491 = vmatpush1.bf16.msra.mxu0 %v3617_v42 }
 0x1e4   :  { %2492 = vmatprep.subr.bf16.mxu0 %v3622_v43 }
 0x1e7   :  { %2493 = vmatpush1.bf16.msra.mxu0 %v3620_v44 }
 0x1e8   :  { %2494 = vmatprep.subr.bf16.mxu0 %v3625_v45 }
 0x1eb   :  { %2495 = vmatpush1.bf16.msra.mxu0 %v3623_v46 }
 0x1ec   :  { %2496 = vmatprep.subr.bf16.mxu0 %v3628_v47 }
 0x1ef   :  { %2497 = vmatpush1.bf16.msra.mxu0 %v3626_v49 }
 0x1f0   :  { %2498 = vmatprep.subr.bf16.mxu0 %v3631_v53 }
 0x1f3   :  { %2499 = vmatpush1.bf16.msra.mxu0 %v3629_v55 }
 0x1f4   :  { %2500 = vmatprep.subr.bf16.mxu0 %v3634_v56 }
 0x1f7   :  { %2501 = vmatpush1.bf16.msra.mxu0 %v3632_v41 }
 0x1f8   :  { %2502 = vmatprep.subr.bf16.mxu0 %v3637_v59 }
 0x1fb   :  { %2503 = vmatpush1.bf16.msra.mxu0 %v3635_v60 }
 0x1fc   :  { %2504 = vmatprep.subr.bf16.mxu0 %v3640_v61 }
 0x1ff   :  { %2505 = vmatpush1.bf16.msra.mxu0 %v3638_v62 }
 0x200   :  { %2506 = vmatprep.subr.bf16.mxu0 %v3643_v63 }
 0x203   :  { %2507 = vmatpush1.bf16.msra.mxu0 %v3641_v0 }
 0x204   :  { %2508 = vmatprep.subr.bf16.mxu0 %v3646_v1 }
 0x207   :  { %2509 = vmatpush1.bf16.msra.mxu0 %v3644_v2 }
 0x208   :  { %2510 = vmatprep.subr.bf16.mxu0 %v3649_v3 }
 0x20b   :  { %2511 = vmatpush1.bf16.msra.mxu0 %v3647_v4 }
 0x20c   :  { %2512 = vmatprep.subr.bf16.mxu0 %v3652_v5 }
 0x20f   :  { %2513 = vmatpush1.bf16.msra.mxu0 %v3650_v50 }
 0x210   :  { %2514 = vmatprep.subr.bf16.mxu0 %v3655_v6 }
 0x213   :  { %2515 = vmatpush1.bf16.msra.mxu0 %v3653_v7 }
 0x214   :  { %2516 = vmatprep.subr.bf16.mxu0 %v3658_v57 }
 0x217   :  { %2517 = vmatpush1.bf16.msra.mxu0 %v3656_v9 }
 0x218   :  { %2518 = vmatprep.subr.bf16.mxu0 %v3661_v11 }
 0x21b   :  { %2519 = vmatpush1.bf16.msra.mxu0 %v3659_v40 }
 0x21e   :  { %2521 = vmatmul.mubr.bf16.vlgmr.msra.gmra.mrb[4].mxu0 %v2049_v12 }
 0x2f1   :  { %v2522_v19 = vpop.f32.mrb[4].mxu0 }
 0x2f2   :  { %v3151_v39 = vadd.f32 %v2522_v19, %v2120_v17  ;;  %v2524_v20 = vpop.f32.mrb[5].mxu0 }
 0x2f3   :  { %v3152_v21 = vadd.f32 %v2524_v20, %v2124_v18  ;;  %v2526_v22 = vpop.f32.mrb[6].mxu0 }
 0x2f4   :  { %v2529_v23 = vmax.f32 %v3151_v39, 0.0  ;;  %v2527_v24 = vpop.f32.mrb[7].mxu0 }
 0x2f5   :  { %v2530_v25 = vmax.f32 %v3152_v21, 0.0 }
 0x2f6   :  { %v2531_v27 = vpack.c.bf16 %v2529_v23, %v2529_v23 }
 0x2f7   :  { %v2532_v26 = vpack.c.bf16 %v2530_v25, %v2530_v25 }
 0x2f9   :  { %2769 = vmatprep.mubr.bf16.mxu1 %v2532_v26 }
 0x2fa   :  { %2770 = vmatmul.mubr.bf16.vlgmr.msra.gmra.mrb[4].mxu1 %v2531_v27 }
 0x3cd   :  { %v2771_v31 = vpop.f32.mrb[4].mxu1 }
 0x3ce   :  { %v2772_v54 = vadd.f32 %v2771_v31, %v2570_v29  ;;  %v2773_v32 = vpop.f32.mrb[5].mxu1 }
 0x3cf   :  { %v2774_v33 = vadd.f32 %v2773_v32, %v2574_v30  ;;  %v2775_v34 = vpop.f32.mrb[6].mxu1 }
 0x3d0   :  { %v2776_v35 = vpop.f32.mrb[7].mxu1 }
 0x3d1   :  { %v2780_v36 = vcombine.low %v2772_v54, %v2774_v33 }
 0x3d3   :  { %3146 = vst.sshfl [vmem:[%s4917_s8] sm:$0x33 pattern:$0x76325410] %v2780_v36 }

</bundles_post_ra>
